<compile_context>
chip_gen: v7x
topology: tpu7x:2x2x1
jax: 0.10.0
libtpu: 0.0.40
codegen_flags: <defaults>
</compile_context>

<pallas_src>
import functools

import jax
import jax.numpy as jnp
from jax.experimental import pallas as pl
from jax.experimental.pallas import tpu as pltpu

LN_EPS = 1e-5


def ffn_kernel(x_ref, gamma_ref, beta_ref, w1_ref, b1_ref, w2_ref, b2_ref, o_ref):
    # x_ref: (tm, D) input dtype   gamma/beta: (1, D) f32   b1: (1, H) f32  b2: (1, D) f32
    # w1_ref: (D, H) bf16          w2_ref: (H, D) bf16
    x = x_ref[...].astype(jnp.float32)

    # LayerNorm over the feature (last) dim, eps=1e-5, affine — all in f32.
    mean = jnp.mean(x, axis=-1, keepdims=True)
    centered = x - mean
    var = jnp.mean(centered * centered, axis=-1, keepdims=True)
    xn = centered * jax.lax.rsqrt(var + LN_EPS)
    xn = xn * gamma_ref[...] + beta_ref[...]

    # Linear 1 (D -> H): bf16 operands, f32 accumulation on the MXU.  SiLU in f32.
    h = jnp.dot(xn.astype(jnp.bfloat16), w1_ref[...],
                preferred_element_type=jnp.float32) + b1_ref[...]
    h = h * jax.nn.sigmoid(h)

    # Dropout(p=0.1) is identity at inference.
    # TODO(synk): training-mode dropout (pltpu.prng_random_bits mask) not implemented.

    # Linear 2 (H -> D): bf16 operands, f32 accumulation on the MXU.
    y = jnp.dot(h.astype(jnp.bfloat16), w2_ref[...],
                preferred_element_type=jnp.float32) + b2_ref[...]

    o_ref[...] = y.astype(o_ref.dtype)


def _estimate_vmem_bytes(tm, D, H, x_itemsize, out_itemsize):
    # Rough upper bound: double-buffered x/out streams + double-buffered bf16
    # weights/biases + f32 intermediates inside the kernel body.
    io = 2 * tm * D * (x_itemsize + out_itemsize)
    weights = 2 * (2 * D * H * 2)            # W1 + W2 in bf16, double-buffered
    biases = 2 * (H + 2 * D) * 4
    interm = tm * H * 4 + 3 * tm * D * 4
    return io + weights + biases + interm


@functools.partial(jax.jit, static_argnames=("tm",))
def feed_forward_module(x, gamma, beta, w1, b1, w2, b2, *, tm=256):
    """x: (batch, time, dim) -> (batch, time, dim).  Inference-mode forward."""
    B, T, D = x.shape
    H = w1.shape[1]
    rows = B * T

    # Pad rows up to a multiple of tm; extra rows are zeros and get sliced off.
    num_tiles = pl.cdiv(rows, tm)
    rows_p = num_tiles * tm

    x2d = x.reshape(rows, D)
    if rows_p != rows:
        x2d = jnp.pad(x2d, ((0, rows_p - rows), (0, 0)))

    # bf16 weights for the MXU fast path (also halves resident weight VMEM);
    # LayerNorm params and biases stay f32.
    w1_bf = w1.astype(jnp.bfloat16)
    w2_bf = w2.astype(jnp.bfloat16)
    gamma2d = gamma.reshape(1, D).astype(jnp.float32)
    beta2d = beta.reshape(1, D).astype(jnp.float32)
    b1_2d = b1.reshape(1, H).astype(jnp.float32)
    b2_2d = b2.reshape(1, D).astype(jnp.float32)

    est = _estimate_vmem_bytes(tm, D, H, jnp.dtype(x.dtype).itemsize,
                               jnp.dtype(x.dtype).itemsize)
    vmem_limit = None
    if est > 24 * 1024 * 1024:
        # Raise the scoped-VMEM limit above the default, capped at v7x's 64 MiB.
        vmem_limit = min(max(2 * est, 32 * 1024 * 1024), 64 * 1024 * 1024)

    out2d = pl.pallas_call(
        ffn_kernel,
        out_shape=jax.ShapeDtypeStruct((rows_p, D), x.dtype),
        grid_spec=pltpu.PrefetchScalarGridSpec(
            num_scalar_prefetch=0,
            grid=(num_tiles,),
            in_specs=[
                pl.BlockSpec((tm, D), lambda i: (i, 0)),   # x row tile
                pl.BlockSpec((1, D), lambda i: (0, 0)),    # gamma (resident)
                pl.BlockSpec((1, D), lambda i: (0, 0)),    # beta  (resident)
                pl.BlockSpec((D, H), lambda i: (0, 0)),    # W1 bf16 (resident)
                pl.BlockSpec((1, H), lambda i: (0, 0)),    # b1    (resident)
                pl.BlockSpec((H, D), lambda i: (0, 0)),    # W2 bf16 (resident)
                pl.BlockSpec((1, D), lambda i: (0, 0)),    # b2    (resident)
            ],
            out_specs=pl.BlockSpec((tm, D), lambda i: (i, 0)),
        ),
        compiler_params=pltpu.CompilerParams(
            dimension_semantics=("parallel",),   # shards row tiles across v7x's 2 TCs
            vmem_limit_bytes=vmem_limit,
        ),
    )(x2d, gamma2d, beta2d, w1_bf, b1_2d, w2_bf, b2_2d)

    return out2d[:rows].reshape(B, T, D)


def reference(x, gamma, beta, w1, b1, w2, b2):
    xf = x.astype(jnp.float32)
    mean = jnp.mean(xf, axis=-1, keepdims=True)
    var = jnp.mean((xf - mean) ** 2, axis=-1, keepdims=True)
    xn = (xf - mean) / jnp.sqrt(var + LN_EPS) * gamma + beta
    h = xn @ w1 + b1
    h = h * jax.nn.sigmoid(h)
    y = h @ w2 + b2
    return y.astype(x.dtype)


if __name__ == "__main__":
    # Module-consistent shapes: encoder_dim=256 (lane-dense), expansion_factor=4.
    # rows = B*T = 96 exercises the pad-to-tile path (tm=256 -> 1 grid step).
    B, T, D = 2, 48, 256
    H = D * 4

    key = jax.random.PRNGKey(0)
    kx, kw1, kb1, kw2, kb2 = jax.random.split(key, 5)

    x = jax.random.normal(kx, (B, T, D), dtype=jnp.float32)

    # Deterministic parameter init (LayerNorm: ones/zeros; Linear: small normals).
    gamma = jnp.ones((D,), jnp.float32)
    beta = jnp.zeros((D,), jnp.float32)
    w1 = jax.random.normal(kw1, (D, H), dtype=jnp.float32) * (1.0 / jnp.sqrt(D))
    b1 = jax.random.normal(kb1, (H,), dtype=jnp.float32) * 0.01
    w2 = jax.random.normal(kw2, (H, D), dtype=jnp.float32) * (1.0 / jnp.sqrt(H))
    b2 = jax.random.normal(kb2, (D,), dtype=jnp.float32) * 0.01

    out = feed_forward_module(x, gamma, beta, w1, b1, w2, b2)
    out = jax.block_until_ready(out)

    ref = reference(x, gamma, beta, w1, b1, w2, b2)
    assert out.shape == (B, T, D)
    # bf16 GEMMs with f32 accumulation -> relaxed tolerance vs the all-f32 reference.
    assert jnp.allclose(out, ref, atol=5e-2, rtol=5e-2), "mismatch vs reference"

    print("KERNEL_OK")
</pallas_src>

<mosaic_0001>
module attributes {stable_mosaic.version = 11 : i64} {
  func.func @ffn_kernel(%arg0: i32, %arg1: memref<256x256xf32, #tpu.memory_space<vmem>>, %arg2: memref<1x256xf32, #tpu.memory_space<vmem>>, %arg3: memref<1x256xf32, #tpu.memory_space<vmem>>, %arg4: memref<256x1024xbf16, #tpu.memory_space<vmem>>, %arg5: memref<1x1024xf32, #tpu.memory_space<vmem>>, %arg6: memref<1024x256xbf16, #tpu.memory_space<vmem>>, %arg7: memref<1x256xf32, #tpu.memory_space<vmem>>, %arg8: memref<256x256xf32, #tpu.memory_space<vmem>>) attributes {dimension_semantics = [#tpu.dimension_semantics<parallel>], iteration_bounds = array<i64: 1>, scalar_prefetch = 0 : i64, scratch_operands = 0 : i64, tpu.core_type = #tpu.core_type<tc>, window_params = [{transform_indices = @transform_0, window_bounds = array<i64: 256, 256>}, {pipeline_mode = #tpu.pipeline_mode<synchronous>, transform_indices = @transform_1, window_bounds = array<i64: 1, 256>}, {pipeline_mode = #tpu.pipeline_mode<synchronous>, transform_indices = @transform_2, window_bounds = array<i64: 1, 256>}, {pipeline_mode = #tpu.pipeline_mode<synchronous>, transform_indices = @transform_3, window_bounds = array<i64: 256, 1024>}, {pipeline_mode = #tpu.pipeline_mode<synchronous>, transform_indices = @transform_4, window_bounds = array<i64: 1, 1024>}, {pipeline_mode = #tpu.pipeline_mode<synchronous>, transform_indices = @transform_5, window_bounds = array<i64: 1024, 256>}, {pipeline_mode = #tpu.pipeline_mode<synchronous>, transform_indices = @transform_6, window_bounds = array<i64: 1, 256>}, {transform_indices = @transform_7, window_bounds = array<i64: 256, 256>}]} {
    %c0 = arith.constant 0 : index
    %c0_0 = arith.constant 0 : index
    %0 = vector.load %arg1[%c0, %c0_0] : memref<256x256xf32, #tpu.memory_space<vmem>>, vector<256x256xf32>
    %cst = arith.constant dense<0.000000e+00> : vector<256xf32>
    %1 = vector.multi_reduction <add>, %0, %cst [1] : vector<256x256xf32> to vector<256xf32>
    %2 = vector.shape_cast %1 : vector<256xf32> to vector<256x1xf32>
    %cst_1 = arith.constant 2.560000e+02 : f32
    %3 = vector.broadcast %cst_1 : f32 to vector<256x1xf32>
    %4 = arith.divf %2, %3 : vector<256x1xf32>
    %5 = vector.broadcast %4 : vector<256x1xf32> to vector<256x256xf32>
    %6 = arith.subf %0, %5 : vector<256x256xf32>
    %7 = arith.mulf %6, %6 : vector<256x256xf32>
    %cst_2 = arith.constant dense<0.000000e+00> : vector<256xf32>
    %8 = vector.multi_reduction <add>, %7, %cst_2 [1] : vector<256x256xf32> to vector<256xf32>
    %9 = vector.shape_cast %8 : vector<256xf32> to vector<256x1xf32>
    %cst_3 = arith.constant 2.560000e+02 : f32
    %10 = vector.broadcast %cst_3 : f32 to vector<256x1xf32>
    %11 = arith.divf %9, %10 : vector<256x1xf32>
    %cst_4 = arith.constant 9.99999974E-6 : f32
    %12 = vector.broadcast %cst_4 : f32 to vector<256x1xf32>
    %13 = arith.addf %11, %12 : vector<256x1xf32>
    %14 = math.rsqrt %13 : vector<256x1xf32>
    %15 = vector.broadcast %14 : vector<256x1xf32> to vector<256x256xf32>
    %16 = arith.mulf %6, %15 : vector<256x256xf32>
    %c0_5 = arith.constant 0 : index
    %c0_6 = arith.constant 0 : index
    %17 = vector.load %arg2[%c0_5, %c0_6] : memref<1x256xf32, #tpu.memory_space<vmem>>, vector<1x256xf32>
    %18 = vector.broadcast %17 : vector<1x256xf32> to vector<256x256xf32>
    %19 = arith.mulf %16, %18 : vector<256x256xf32>
    %c0_7 = arith.constant 0 : index
    %c0_8 = arith.constant 0 : index
    %20 = vector.load %arg3[%c0_7, %c0_8] : memref<1x256xf32, #tpu.memory_space<vmem>>, vector<1x256xf32>
    %21 = vector.broadcast %20 : vector<1x256xf32> to vector<256x256xf32>
    %22 = arith.addf %19, %21 : vector<256x256xf32>
    %23 = arith.truncf %22 : vector<256x256xf32> to vector<256x256xbf16>
    %c0_9 = arith.constant 0 : index
    %c0_10 = arith.constant 0 : index
    %24 = vector.load %arg4[%c0_9, %c0_10] : memref<256x1024xbf16, #tpu.memory_space<vmem>>, vector<256x1024xbf16>
    %cst_11 = arith.constant dense<0.000000e+00> : vector<256x1024xf32>
    %25 = tpu.matmul %23, %24, %cst_11 {dimension_numbers = #tpu.dot_dimension_numbers<[1], [0], [0], [1], [0, 0, 1, 1], [], []>} : vector<256x256xbf16>, vector<256x1024xbf16>, vector<256x1024xf32> -> vector<256x1024xf32>
    %c0_12 = arith.constant 0 : index
    %c0_13 = arith.constant 0 : index
    %26 = vector.load %arg5[%c0_12, %c0_13] : memref<1x1024xf32, #tpu.memory_space<vmem>>, vector<1x1024xf32>
    %27 = vector.broadcast %26 : vector<1x1024xf32> to vector<256x1024xf32>
    %28 = arith.addf %25, %27 : vector<256x1024xf32>
    %29 = arith.negf %28 : vector<256x1024xf32>
    %30 = math.exp %29 : vector<256x1024xf32>
    %cst_14 = arith.constant 1.000000e+00 : f32
    %31 = vector.broadcast %cst_14 : f32 to vector<256x1024xf32>
    %32 = arith.addf %31, %30 : vector<256x1024xf32>
    %33 = arith.divf %31, %32 : vector<256x1024xf32>
    %34 = arith.mulf %28, %33 : vector<256x1024xf32>
    %35 = arith.truncf %34 : vector<256x1024xf32> to vector<256x1024xbf16>
    %c0_15 = arith.constant 0 : index
    %c0_16 = arith.constant 0 : index
    %36 = vector.load %arg6[%c0_15, %c0_16] : memref<1024x256xbf16, #tpu.memory_space<vmem>>, vector<1024x256xbf16>
    %cst_17 = arith.constant dense<0.000000e+00> : vector<256x256xf32>
    %37 = tpu.matmul %35, %36, %cst_17 {dimension_numbers = #tpu.dot_dimension_numbers<[1], [0], [0], [1], [0, 0, 1, 1], [], []>} : vector<256x1024xbf16>, vector<1024x256xbf16>, vector<256x256xf32> -> vector<256x256xf32>
    %c0_18 = arith.constant 0 : index
    %c0_19 = arith.constant 0 : index
    %38 = vector.load %arg7[%c0_18, %c0_19] : memref<1x256xf32, #tpu.memory_space<vmem>>, vector<1x256xf32>
    %39 = vector.broadcast %38 : vector<1x256xf32> to vector<256x256xf32>
    %40 = arith.addf %37, %39 : vector<256x256xf32>
    %c0_20 = arith.constant 0 : index
    %c0_21 = arith.constant 0 : index
    %41 = vector.load %arg8[%c0_20, %c0_21] : memref<256x256xf32, #tpu.memory_space<vmem>>, vector<256x256xf32>
    tpu.vector_store %arg8[%c0_20, %c0_21], %40 {strides = array<i32>} : memref<256x256xf32, #tpu.memory_space<vmem>>, vector<256x256xf32>,
    return
  }
  func.func @transform_0(%arg0: i32) -> (i32, i32) {
    %c0_i32 = arith.constant 0 : i32
    %c0_i32_0 = arith.constant 0 : i32
    return %arg0, %c0_i32 : i32, i32
  }
  func.func @transform_1(%arg0: i32) -> (i32, i32) {
    %c0_i32 = arith.constant 0 : i32
    %c0_i32_0 = arith.constant 0 : i32
    %c0_i32_1 = arith.constant 0 : i32
    return %c0_i32, %c0_i32_0 : i32, i32
  }
  func.func @transform_2(%arg0: i32) -> (i32, i32) {
    %c0_i32 = arith.constant 0 : i32
    %c0_i32_0 = arith.constant 0 : i32
    %c0_i32_1 = arith.constant 0 : i32
    return %c0_i32, %c0_i32_0 : i32, i32
  }
  func.func @transform_3(%arg0: i32) -> (i32, i32) {
    %c0_i32 = arith.constant 0 : i32
    %c0_i32_0 = arith.constant 0 : i32
    %c0_i32_1 = arith.constant 0 : i32
    return %c0_i32, %c0_i32_0 : i32, i32
  }
  func.func @transform_4(%arg0: i32) -> (i32, i32) {
    %c0_i32 = arith.constant 0 : i32
    %c0_i32_0 = arith.constant 0 : i32
    %c0_i32_1 = arith.constant 0 : i32
    return %c0_i32, %c0_i32_0 : i32, i32
  }
  func.func @transform_5(%arg0: i32) -> (i32, i32) {
    %c0_i32 = arith.constant 0 : i32
    %c0_i32_0 = arith.constant 0 : i32
    %c0_i32_1 = arith.constant 0 : i32
    return %c0_i32, %c0_i32_0 : i32, i32
  }
  func.func @transform_6(%arg0: i32) -> (i32, i32) {
    %c0_i32 = arith.constant 0 : i32
    %c0_i32_0 = arith.constant 0 : i32
    %c0_i32_1 = arith.constant 0 : i32
    return %c0_i32, %c0_i32_0 : i32, i32
  }
  func.func @transform_7(%arg0: i32) -> (i32, i32) {
    %c0_i32 = arith.constant 0 : i32
    %c0_i32_0 = arith.constant 0 : i32
    return %arg0, %c0_i32 : i32, i32
  }
}

</mosaic_0001>

<bundles_post_ra>
// kernel: feed_forward_module.1
= control target key start
LH: loop header
LB: loop body
LE: loop exit
PB: predicated region body
PF: predicated region fallthrough
CT: control target
= control target key end

     0   :  { %s11601_s0 = inlined_call_operand.vmem [shape: f32[256,256], index: 0, kind: input, shape index: {}]   ;;  %s11602_s3 = inlined_call_operand.vmem [shape: bf16[256,1024], index: 3, kind: input, shape index: {}]   ;;  %s11603_s1 = inlined_call_operand.vmem [shape: f32[1,256], index: 1, kind: input, shape index: {}]   ;;  %s11604_s2 = inlined_call_operand.vmem [shape: f32[1,256], index: 2, kind: input, shape index: {}]   ;;  %s11605_s5 = inlined_call_operand.vmem [shape: bf16[1024,256], index: 5, kind: input, shape index: {}]   ;;  %s11606_s4 = inlined_call_operand.vmem [shape: f32[1,1024], index: 4, kind: input, shape index: {}]   ;;  %s11607_s6 = inlined_call_operand.vmem [shape: f32[1,256], index: 6, kind: input, shape index: {}]   ;;  %s11608_s7 = inlined_call_operand.vmem [shape: f32[256,256], index: 7, kind: output, shape index: {}]  }
   0x1   :  { %v8003_v0 = vld [vmem:[%s11601_s0] sm:$0xff]  ;;  %v8008_v1 = vld [vmem:[%s11601_s0 + $0x8] sm:$0xff]  ;;  %v8013_v2 = vld [vmem:[%s11601_s0 + $0x10] sm:$0xff] }
   0x2   :  { %v90_v3 = vadd.f32 %v8008_v1, %v8003_v0  ;;  %v8020_v4 = vld [vmem:[%s11601_s0 + $0x18] sm:$0xff]  ;;  %v8025_v5 = vld [vmem:[%s11601_s0 + $0x20] sm:$0xff]  ;;  %v8030_v6 = vld [vmem:[%s11601_s0 + $0x28] sm:$0xff] }
   0x3   :  { %v96_v7 = vadd.f32 %v8030_v6, %v8025_v5  ;;  %v8037_v8 = vld [vmem:[%s11601_s0 + $0x30] sm:$0xff]  ;;  %v8042_v9 = vld [vmem:[%s11601_s0 + $0x38] sm:$0xff]  ;;  %v93_v10 = vadd.f32 %v8020_v4, %v8013_v2  ;;  %v8051_v12 = vld [vmem:[%s11601_s0 + $0x40] sm:$0xff] }
   0x4   :  { %91 = vadd.xlane.f32.xlu0 %v90_v3  ;;  %v99_v11 = vadd.f32 %v8042_v9, %v8037_v8  ;;  %v8056_v13 = vld [vmem:[%s11601_s0 + $0x48] sm:$0xff]  ;;  %v8061_v14 = vld [vmem:[%s11601_s0 + $0x50] sm:$0xff]  ;;  %v8066_v15 = vld [vmem:[%s11601_s0 + $0x58] sm:$0xff] }
   0x5   :  { %97 = vadd.xlane.f32.xlu1 %v96_v7  ;;  %v102_v16 = vadd.f32 %v8056_v13, %v8051_v12  ;;  %v105_v17 = vadd.f32 %v8066_v15, %v8061_v14  ;;  %v8075_v18 = vld [vmem:[%s11601_s0 + $0x60] sm:$0xff]  ;;  %v8080_v19 = vld [vmem:[%s11601_s0 + $0x68] sm:$0xff]  ;;  %v8085_v20 = vld [vmem:[%s11601_s0 + $0x70] sm:$0xff] }
   0x6   :  { %v8090_v21 = vld [vmem:[%s11601_s0 + $0x78] sm:$0xff]  ;;  %v108_v22 = vadd.f32 %v8080_v19, %v8075_v18  ;;  %v8099_v24 = vld [vmem:[%s11601_s0 + $0x80] sm:$0xff]  ;;  %v8104_v25 = vld [vmem:[%s11601_s0 + $0x88] sm:$0xff] }
   0x7   :  { %v111_v23 = vadd.f32 %v8090_v21, %v8085_v20  ;;  %v8109_v26 = vld [vmem:[%s11601_s0 + $0x90] sm:$0xff]  ;;  %v8114_v27 = vld [vmem:[%s11601_s0 + $0x98] sm:$0xff]  ;;  %v114_v28 = vadd.f32 %v8104_v25, %v8099_v24  ;;  %v8123_v30 = vld [vmem:[%s11601_s0 + $0xa0] sm:$0xff] }
   0x8   :  { %94 = vadd.xlane.f32.xlu0 %v93_v10  ;;  %v117_v29 = vadd.f32 %v8114_v27, %v8109_v26  ;;  %v8128_v31 = vld [vmem:[%s11601_s0 + $0xa8] sm:$0xff]  ;;  %v8133_v32 = vld [vmem:[%s11601_s0 + $0xb0] sm:$0xff]  ;;  %v8138_v33 = vld [vmem:[%s11601_s0 + $0xb8] sm:$0xff] }
   0x9   :  { %100 = vadd.xlane.f32.xlu1 %v99_v11  ;;  %v120_v34 = vadd.f32 %v8128_v31, %v8123_v30  ;;  %v123_v35 = vadd.f32 %v8138_v33, %v8133_v32  ;;  %v8147_v36 = vld [vmem:[%s11601_s0 + $0xc0] sm:$0xff]  ;;  %v8152_v37 = vld [vmem:[%s11601_s0 + $0xc8] sm:$0xff]  ;;  %v8157_v38 = vld [vmem:[%s11601_s0 + $0xd0] sm:$0xff] }
   0xa   :  { %v8162_v39 = vld [vmem:[%s11601_s0 + $0xd8] sm:$0xff]  ;;  %v126_v40 = vadd.f32 %v8152_v37, %v8147_v36  ;;  %v8171_v42 = vld [vmem:[%s11601_s0 + $0xe0] sm:$0xff]  ;;  %v8176_v43 = vld [vmem:[%s11601_s0 + $0xe8] sm:$0xff] }
   0xb   :  { %v129_v41 = vadd.f32 %v8162_v39, %v8157_v38  ;;  %v8181_v44 = vld [vmem:[%s11601_s0 + $0xf0] sm:$0xff]  ;;  %v8186_v45 = vld [vmem:[%s11601_s0 + $0xf8] sm:$0xff]  ;;  %v132_v46 = vadd.f32 %v8176_v43, %v8171_v42  ;;  %v8195_v48 = vld [vmem:[%s11601_s0 + $0x100] sm:$0xff] }
   0xc   :  { %103 = vadd.xlane.f32.xlu0 %v102_v16  ;;  %v135_v47 = vadd.f32 %v8186_v45, %v8181_v44  ;;  %v8200_v49 = vld [vmem:[%s11601_s0 + $0x108] sm:$0xff]  ;;  %v8205_v50 = vld [vmem:[%s11601_s0 + $0x110] sm:$0xff]  ;;  %v8210_v51 = vld [vmem:[%s11601_s0 + $0x118] sm:$0xff] }
   0xd   :  { %106 = vadd.xlane.f32.xlu1 %v105_v17  ;;  %v138_v52 = vadd.f32 %v8200_v49, %v8195_v48  ;;  %v141_v53 = vadd.f32 %v8210_v51, %v8205_v50  ;;  %v8219_v54 = vld [vmem:[%s11601_s0 + $0x120] sm:$0xff]  ;;  %v8224_v55 = vld [vmem:[%s11601_s0 + $0x128] sm:$0xff]  ;;  %v8229_v56 = vld [vmem:[%s11601_s0 + $0x130] sm:$0xff] }
   0xe   :  { %v8234_v57 = vld [vmem:[%s11601_s0 + $0x138] sm:$0xff]  ;;  %v144_v58 = vadd.f32 %v8224_v55, %v8219_v54  ;;  %v8243_v60 = vld [vmem:[%s11601_s0 + $0x140] sm:$0xff]  ;;  %v8248_v61 = vld [vmem:[%s11601_s0 + $0x148] sm:$0xff] }
   0xf   :  { %v147_v59 = vadd.f32 %v8234_v57, %v8229_v56  ;;  %v8253_v62 = vld [vmem:[%s11601_s0 + $0x150] sm:$0xff]  ;;  %v8258_v63 = vld [vmem:[%s11601_s0 + $0x158] sm:$0xff]  ;;  %v150_v3 = vadd.f32 %v8248_v61, %v8243_v60  ;;  %v787_v10 = vld [vmem:[%s11602_s3] sm:$0xff] }
  0x10   :  { %109 = vadd.xlane.f32.xlu0 %v108_v22  ;;  %v153_v7 = vadd.f32 %v8258_v63, %v8253_v62  ;;  %v791_v11 = vld [vmem:[%s11602_s3 + $0x20] sm:$0xff] }
  0x11   :  { %112 = vadd.xlane.f32.xlu1 %v111_v23  ;;  %v795_v16 = vld [vmem:[%s11602_s3 + $0x40] sm:$0xff]  ;;  %v5910_v17 = vcombine.high %v787_v10, %v791_v11  ;;  %v5909_v22 = vcombine.low %v787_v10, %v791_v11 }
  0x12   :  { %v799_v23 = vld [vmem:[%s11602_s3 + $0x60] sm:$0xff] }
  0x13   :  { %1597 = vmatprep.subr.bf16.mxu1 %v5910_v17  ;;  %v831_v10 = vld [vmem:[%s11602_s3 + $0x160] sm:$0xff] }
  0x14   :  { %115 = vadd.xlane.f32.xlu0 %v114_v28  ;;  %v5918_v28 = vcombine.high %v795_v16, %v799_v23  ;;  %1598 = vmatpush1.bf16.msra.mxu1 %v5909_v22  ;;  %v835_v17 = vld [vmem:[%s11602_s3 + $0x180] sm:$0xff] }
  0x15   :  { %118 = vadd.xlane.f32.xlu1 %v117_v29  ;;  %v803_v29 = vld [vmem:[%s11602_s3 + $0x80] sm:$0xff] }
  0x16   :  { %1599 = vmatprep.subr.bf16.mxu1 %v5918_v28  ;;  %v839_v22 = vld [vmem:[%s11602_s3 + $0x1a0] sm:$0xff] }
  0x17   :  { %v5958_v28 = vcombine.high %v835_v17, %v839_v22 }
  0x18   :  { %121 = vadd.xlane.f32.xlu0 %v120_v34  ;;  %v807_v34 = vld [vmem:[%s11602_s3 + $0xa0] sm:$0xff] }
  0x19   :  { %124 = vadd.xlane.f32.xlu1 %v123_v35  ;;  %v5917_v35 = vcombine.low %v795_v16, %v799_v23 }
  0x1b   :  { %1600 = vmatpush1.bf16.msra.mxu1 %v5917_v35  ;;  %v5957_v35 = vcombine.low %v835_v17, %v839_v22 }
  0x1c   :  { %127 = vadd.xlane.f32.xlu0 %v126_v40  ;;  %v5926_v40 = vcombine.high %v803_v29, %v807_v34 }
  0x1d   :  { %130 = vadd.xlane.f32.xlu1 %v129_v41  ;;  %v811_v41 = vld [vmem:[%s11602_s3 + $0xc0] sm:$0xff] }
  0x1e   :  { %1601 = vmatprep.subr.bf16.mxu1 %v5926_v40 }
  0x20   :  { %133 = vadd.xlane.f32.xlu0 %v132_v46  ;;  %v815_v46 = vld [vmem:[%s11602_s3 + $0xe0] sm:$0xff] }
  0x21   :  { %136 = vadd.xlane.f32.xlu1 %v135_v47  ;;  %v5925_v47 = vcombine.low %v803_v29, %v807_v34  ;;  %v843_v29 = vld [vmem:[%s11602_s3 + $0x1c0] sm:$0xff] }
  0x22   :  { %v847_v34 = vld [vmem:[%s11602_s3 + $0x1e0] sm:$0xff] }
  0x23   :  { %1602 = vmatpush1.bf16.msra.mxu1 %v5925_v47  ;;  %v5966_v40 = vcombine.high %v843_v29, %v847_v34  ;;  %v5965_v47 = vcombine.low %v843_v29, %v847_v34 }
  0x24   :  { %139 = vadd.xlane.f32.xlu0 %v138_v52  ;;  %v5934_v52 = vcombine.high %v811_v41, %v815_v46 }
  0x25   :  { %142 = vadd.xlane.f32.xlu1 %v141_v53  ;;  %v819_v53 = vld [vmem:[%s11602_s3 + $0x100] sm:$0xff] }
  0x26   :  { %1603 = vmatprep.subr.bf16.mxu1 %v5934_v52 }
  0x28   :  { %145 = vadd.xlane.f32.xlu0 %v144_v58  ;;  %v823_v58 = vld [vmem:[%s11602_s3 + $0x120] sm:$0xff] }
  0x29   :  { %148 = vadd.xlane.f32.xlu1 %v147_v59  ;;  %v5933_v59 = vcombine.low %v811_v41, %v815_v46  ;;  %v5941_v11 = vcombine.low %v819_v53, %v823_v58  ;;  %v851_v41 = vld [vmem:[%s11602_s3 + $0x200] sm:$0xff] }
  0x2a   :  { %v855_v46 = vld [vmem:[%s11602_s3 + $0x220] sm:$0xff] }
  0x2b   :  { %1604 = vmatpush1.bf16.msra.mxu1 %v5933_v59  ;;  %v5974_v52 = vcombine.high %v851_v41, %v855_v46 }
  0x2c   :  { %151 = vadd.xlane.f32.xlu0 %v150_v3  ;;  %v5942_v3 = vcombine.high %v819_v53, %v823_v58  ;;  %v5973_v53 = vcombine.low %v851_v41, %v855_v46 }
  0x2d   :  { %154 = vadd.xlane.f32.xlu1 %v153_v7  ;;  %v827_v7 = vld [vmem:[%s11602_s3 + $0x140] sm:$0xff] }
  0x2e   :  { %1605 = vmatprep.subr.bf16.mxu1 %v5942_v3  ;;  %v5950_v16 = vcombine.high %v827_v7, %v831_v10  ;;  %v5949_v23 = vcombine.low %v827_v7, %v831_v10 }
  0x2f   :  { %1606 = vmatpush1.bf16.msra.mxu1 %v5941_v11 }
  0x30   :  { %1607 = vmatprep.subr.bf16.mxu1 %v5950_v16 }
  0x33   :  { %1608 = vmatpush1.bf16.msra.mxu1 %v5949_v23 }
  0x34   :  { %1609 = vmatprep.subr.bf16.mxu1 %v5958_v28 }
  0x37   :  { %1610 = vmatpush1.bf16.msra.mxu1 %v5957_v35 }
  0x38   :  { %1611 = vmatprep.subr.bf16.mxu1 %v5966_v40 }
  0x3b   :  { %1612 = vmatpush1.bf16.msra.mxu1 %v5965_v47 }
  0x3c   :  { %1613 = vmatprep.subr.bf16.mxu1 %v5974_v52 }
  0x3f   :  { %1614 = vmatpush1.bf16.msra.mxu1 %v5973_v53 }
  0x91   :  { %v92_v58 = vpop.xlane.xlu0 %91 }
  0x92   :  { %v187_v59 = vmul.f32 0.00390625, %v92_v58  ;;  %v98_v3 = vpop.xlane.xlu1 %97 }
  0x93   :  { %v189_v7 = vmul.f32 0.00390625, %v98_v3  ;;  %v8374_v3 = vld [vmem:[%s11601_s0 + $0x178] sm:$0xff] }
  0x94   :  { %v8319_v10 = vsub.f32 %v8003_v0, %v187_v59  ;;  %v8322_v11 = vsub.f32 %v8008_v1, %v187_v59  ;;  %v8337_v0 = vld [vmem:[%s11601_s0 + $0x160] sm:$0xff]  ;;  %v8342_v1 = vld [vmem:[%s11601_s0 + $0x168] sm:$0xff]  ;;  %v8369_v59 = vld [vmem:[%s11601_s0 + $0x170] sm:$0xff] }
  0x95   :  { %v95_v16 = vpop.xlane.xlu0 %94  ;;  %v8325_v17 = vsub.f32 %v8025_v5, %v189_v7  ;;  %v8328_v22 = vsub.f32 %v8030_v6, %v189_v7  ;;  %v156_v46 = vadd.f32 %v8342_v1, %v8337_v0 }
  0x96   :  { %v188_v23 = vmul.f32 0.00390625, %v95_v16  ;;  %v283_v28 = vmul.f32 %v8319_v10, %v8319_v10  ;;  %v284_v29 = vmul.f32 %v8322_v11, %v8322_v11  ;;  %v101_v34 = vpop.xlane.xlu1 %100 }
  0x97   :  { %11679 = vst [vmem:[#allocation2_spill] sm:$0xff] %v8325_v17  ;;  %11680 = vst [vmem:[#allocation3_spill] sm:$0xff] %v8328_v22  ;;  %v190_v5 = vmul.f32 0.00390625, %v101_v34  ;;  %v287_v52 = vmul.f32 %v8325_v17, %v8325_v17  ;;  %v288_v53 = vmul.f32 %v8328_v22, %v8328_v22 }
  0x98   :  { %v8345_v6 = vsub.f32 %v8013_v2, %v188_v23  ;;  %v8348_v35 = vsub.f32 %v8020_v4, %v188_v23  ;;  %v347_v40 = vadd.f32 %v284_v29, %v283_v28  ;;  %v159_v23 = vadd.f32 %v8374_v3, %v8369_v59 }
  0x99   :  { %v8351_v41 = vsub.f32 %v8037_v8, %v190_v5  ;;  %v104_v47 = vpop.xlane.xlu0 %103  ;;  %v8360_v2 = vsub.f32 %v8042_v9, %v190_v5  ;;  %v353_v16 = vadd.f32 %v288_v53, %v287_v52  ;;  %v8394_v52 = vld [vmem:[%s11601_s0 + $0x188] sm:$0xff] }
  0x9a   :  { %11681 = vst [vmem:[#allocation4_spill] sm:$0xff] %v8345_v6  ;;  %11682 = vst [vmem:[#allocation5_spill] sm:$0xff] %v8348_v35  ;;  %348 = vadd.xlane.f32.xlu0 %v347_v40  ;;  %v285_v4 = vmul.f32 %v8345_v6, %v8345_v6  ;;  %v286_v8 = vmul.f32 %v8348_v35, %v8348_v35  ;;  %v191_v58 = vmul.f32 0.00390625, %v104_v47  ;;  %v107_v7 = vpop.xlane.xlu1 %106  ;;  %v8389_v47 = vld [vmem:[%s11601_s0 + $0x180] sm:$0xff]  ;;  %v8453_v6 = vld [vmem:[%s11601_s0 + $0x1b0] sm:$0xff] }
  0x9b   :  { %11683 = vst [vmem:[#allocation6_spill] sm:$0xff] %v8351_v41  ;;  %11684 = vst [vmem:[#allocation7_spill] sm:$0xff] %v8360_v2  ;;  %v192_v28 = vmul.f32 0.00390625, %v107_v7  ;;  %v289_v29 = vmul.f32 %v8351_v41, %v8351_v41  ;;  %v8414_v7 = vld [vmem:[%s11601_s0 + $0x198] sm:$0xff] }
  0x9c   :  { %v350_v9 = vadd.f32 %v286_v8, %v285_v4  ;;  %v8381_v5 = vsub.f32 %v8051_v12, %v191_v58  ;;  %v8384_v40 = vsub.f32 %v8056_v13, %v191_v58  ;;  %v162_v4 = vadd.f32 %v8394_v52, %v8389_v47  ;;  %v8409_v58 = vld [vmem:[%s11601_s0 + $0x190] sm:$0xff]  ;;  %11690 = vst [vmem:[#allocation13_spill] sm:$0xff] %v8414_v7 }
  0x9d   :  { %v110_v34 = vpop.xlane.xlu0 %109  ;;  %v8399_v12 = vsub.f32 %v8061_v14, %v192_v28  ;;  %v8402_v13 = vsub.f32 %v8066_v15, %v192_v28  ;;  %11689 = vst [vmem:[#allocation12_spill] sm:$0xff] %v8409_v58 }
  0x9e   :  { %157 = vadd.xlane.f32.xlu0 %v156_v46  ;;  %351 = vadd.xlane.f32.xlu1 %v350_v9  ;;  %11685 = vst [vmem:[#allocation8_spill] sm:$0xff] %v8381_v5  ;;  %11686 = vst [vmem:[#allocation9_spill] sm:$0xff] %v8384_v40  ;;  %v290_v46 = vmul.f32 %v8360_v2, %v8360_v2  ;;  %v113_v53 = vpop.xlane.xlu1 %112  ;;  %v193_v8 = vmul.f32 0.00390625, %v110_v34  ;;  %v291_v15 = vmul.f32 %v8381_v5, %v8381_v5  ;;  %v8425_v2 = vld [vmem:[%s11601_s0 + $0x1a0] sm:$0xff] }
  0x9f   :  { %11687 = vst [vmem:[#allocation10_spill] sm:$0xff] %v8399_v12  ;;  %11688 = vst [vmem:[#allocation11_spill] sm:$0xff] %v8402_v13  ;;  %v292_v28 = vmul.f32 %v8384_v40, %v8384_v40  ;;  %v165_v34 = vadd.f32 %v8414_v7, %v8409_v58  ;;  %v859_v5 = vld [vmem:[%s11602_s3 + $0x240] sm:$0xff] }
  0xa0   :  { %v356_v14 = vadd.f32 %v290_v46, %v289_v29  ;;  %v8428_v22 = vsub.f32 %v8075_v18, %v193_v8  ;;  %v294_v29 = vmul.f32 %v8402_v13, %v8402_v13  ;;  %v8437_v46 = vld [vmem:[%s11601_s0 + $0x1a8] sm:$0xff]  ;;  %v863_v18 = vld [vmem:[%s11602_s3 + $0x260] sm:$0xff] }
  0xa1   :  { %v116_v9 = vpop.xlane.xlu0 %115  ;;  %v359_v13 = vadd.f32 %v292_v28, %v291_v15  ;;  %v5981_v17 = vcombine.low %v859_v5, %v863_v18  ;;  %v168_v35 = vadd.f32 %v8437_v46, %v8425_v2 }
  0xa2   :  { %354 = vadd.xlane.f32.xlu0 %v353_v16  ;;  %160 = vadd.xlane.f32.xlu1 %v159_v23  ;;  %v119_v41 = vpop.xlane.xlu1 %118  ;;  %11691 = vst [vmem:[#allocation14_spill] sm:$0xff] %v8428_v22  ;;  %v194_v16 = vmul.f32 0.00390625, %v113_v53  ;;  %v293_v23 = vmul.f32 %v8399_v12, %v8399_v12  ;;  %v8446_v53 = vsub.f32 %v8080_v19, %v193_v8  ;;  %v195_v8 = vmul.f32 0.00390625, %v116_v9 }
  0xa3   :  { %v5982_v12 = vcombine.high %v859_v5, %v863_v18  ;;  %v8464_v5 = vld [vmem:[%s11601_s0 + $0x1b8] sm:$0xff]  ;;  %v879_v18 = vld [vmem:[%s11602_s3 + $0x2e0] sm:$0xff] }
  0xa4   :  { %11692 = vst [vmem:[#allocation15_spill] sm:$0xff] %v8446_v53  ;;  %v8456_v58 = vsub.f32 %v8085_v20, %v194_v16  ;;  %v362_v19 = vadd.f32 %v294_v29, %v293_v23  ;;  %v871_v20 = vld [vmem:[%s11602_s3 + $0x2a0] sm:$0xff]  ;;  %v196_v23 = vmul.f32 0.00390625, %v119_v41 }
  0xa5   :  { %v122_v40 = vpop.xlane.xlu0 %121  ;;  %1615 = vmatprep.subr.bf16.mxu1 %v5982_v12  ;;  %v296_v12 = vmul.f32 %v8446_v53, %v8446_v53  ;;  %v875_v29 = vld [vmem:[%s11602_s3 + $0x2c0] sm:$0xff] }
  0xa6   :  { %163 = vadd.xlane.f32.xlu0 %v162_v4  ;;  %357 = vadd.xlane.f32.xlu1 %v356_v14  ;;  %v125_v7 = vpop.xlane.xlu1 %124  ;;  %11693 = vst [vmem:[#allocation16_spill] sm:$0xff] %v8456_v58  ;;  %v8459_v4 = vsub.f32 %v8090_v21, %v194_v16  ;;  %v867_v14 = vld [vmem:[%s11602_s3 + $0x280] sm:$0xff]  ;;  %v295_v21 = vmul.f32 %v8428_v22, %v8428_v22 }
  0xa7   :  { %1616 = vmatpush1.bf16.msra.mxu1 %v5981_v17  ;;  %v5990_v9 = vcombine.high %v867_v14, %v871_v20  ;;  %v5989_v28 = vcombine.low %v867_v14, %v871_v20  ;;  %v171_v17 = vadd.f32 %v8464_v5, %v8453_v6  ;;  %v8479_v16 = vsub.f32 %v8099_v24, %v195_v8  ;;  %v8497_v14 = vld [vmem:[%s11601_s0 + $0x1c0] sm:$0xff]  ;;  %v8502_v20 = vld [vmem:[%s11601_s0 + $0x1c8] sm:$0xff] }
  0xa8   :  { %11694 = vst [vmem:[#allocation17_spill] sm:$0xff] %v8459_v4  ;;  %v8492_v24 = vsub.f32 %v8104_v25, %v195_v8  ;;  %v365_v41 = vadd.f32 %v296_v12, %v295_v21  ;;  %v8508_v25 = vsub.f32 %v8114_v27, %v196_v23  ;;  %v174_v8 = vadd.f32 %v8502_v20, %v8497_v14  ;;  %v883_v12 = vld [vmem:[%s11602_s3 + $0x300] sm:$0xff]  ;;  %v8521_v27 = vld [vmem:[%s11601_s0 + $0x1d0] sm:$0xff] }
  0xa9   :  { %v128_v15 = vpop.xlane.xlu0 %127  ;;  %1617 = vmatprep.subr.bf16.mxu1 %v5990_v9  ;;  %11695 = vst [vmem:[#allocation18_spill] sm:$0xff] %v8479_v16 }
  0xaa   :  { %166 = vadd.xlane.f32.xlu1 %v165_v34  ;;  %360 = vadd.xlane.f32.xlu0 %v359_v13  ;;  %v297_v13 = vmul.f32 %v8456_v58, %v8456_v58  ;;  %v298_v34 = vmul.f32 %v8459_v4, %v8459_v4  ;;  %11696 = vst [vmem:[#allocation19_spill] sm:$0xff] %v8492_v24  ;;  %v131_v9 = vpop.xlane.xlu1 %130  ;;  %11698 = vst [vmem:[#allocation21_spill] sm:$0xff] %v8508_v25 }
  0xab   :  { %1618 = vmatpush1.bf16.msra.mxu1 %v5989_v28  ;;  %v5998_v28 = vcombine.high %v875_v29, %v879_v18  ;;  %v5997_v4 = vcombine.low %v875_v29, %v879_v18  ;;  %v887_v29 = vld [vmem:[%s11602_s3 + $0x320] sm:$0xff]  ;;  %v302_v53 = vmul.f32 %v8508_v25, %v8508_v25 }
  0xad   :  { %1619 = vmatprep.subr.bf16.mxu1 %v5998_v28  ;;  %v134_v21 = vpop.xlane.xlu0 %133  ;;  %v199_v28 = vmul.f32 0.00390625, %v128_v15 }
  0xae   :  { %363 = vadd.xlane.f32.xlu1 %v362_v19  ;;  %169 = vadd.xlane.f32.xlu0 %v168_v35  ;;  %v8505_v35 = vsub.f32 %v8109_v26, %v196_v23  ;;  %v368_v19 = vadd.f32 %v298_v34, %v297_v13  ;;  %v197_v26 = vmul.f32 0.00390625, %v122_v40  ;;  %v299_v23 = vmul.f32 %v8479_v16, %v8479_v16  ;;  %v137_v18 = vpop.xlane.xlu1 %136  ;;  %v8541_v16 = vld [vmem:[%s11601_s0 + $0x1e0] sm:$0xff] }
  0xaf   :  { %1620 = vmatpush1.bf16.msra.mxu1 %v5997_v4  ;;  %v8526_v4 = vld [vmem:[%s11601_s0 + $0x1d8] sm:$0xff]  ;;  %v300_v13 = vmul.f32 %v8492_v24, %v8492_v24  ;;  %v6006_v34 = vcombine.high %v883_v12, %v887_v29  ;;  %v6005_v40 = vcombine.low %v883_v12, %v887_v29  ;;  %v8552_v29 = vld [vmem:[%s11601_s0 + $0x1e8] sm:$0xff]  ;;  %v8567_v25 = vsub.f32 %v8147_v36, %v199_v28  ;;  %v899_v36 = vld [vmem:[%s11602_s3 + $0x380] sm:$0xff] }
  0xb0   :  { %11697 = vst [vmem:[#allocation20_spill] sm:$0xff] %v8505_v35  ;;  %v301_v58 = vmul.f32 %v8505_v35, %v8505_v35  ;;  %v8547_v12 = vsub.f32 %v8128_v31, %v197_v26  ;;  %v8570_v35 = vsub.f32 %v8152_v37, %v199_v28  ;;  %v180_v24 = vadd.f32 %v8552_v29, %v8541_v16  ;;  %v903_v37 = vld [vmem:[%s11602_s3 + $0x3a0] sm:$0xff] }
  0xb1   :  { %1621 = vmatprep.subr.bf16.mxu1 %v6006_v34  ;;  %v371_v15 = vadd.f32 %v300_v13, %v299_v23  ;;  %v891_v34 = vld [vmem:[%s11602_s3 + $0x340] sm:$0xff]  ;;  %v200_v23 = vmul.f32 0.00390625, %v131_v9  ;;  %11701 = vst [vmem:[#allocation24_spill] sm:$0xff] %v8567_v25  ;;  %v201_v22 = vmul.f32 0.00390625, %v134_v21  ;;  %v8587_v21 = vld [vmem:[%s11601_s0 + $0x1f0] sm:$0xff]  ;;  %v6022_v28 = vcombine.high %v899_v36, %v903_v37 }
  0xb2   :  { %172 = vadd.xlane.f32.xlu1 %v171_v17  ;;  %366 = vadd.xlane.f32.xlu0 %v365_v41  ;;  %v198_v17 = vmul.f32 0.00390625, %v125_v7  ;;  %v177_v41 = vadd.f32 %v8526_v4, %v8521_v27  ;;  %v8544_v7 = vsub.f32 %v8123_v30, %v197_v26  ;;  %11702 = vst [vmem:[#allocation25_spill] sm:$0xff] %v8570_v35 }
  0xb3   :  { %1622 = vmatpush1.bf16.msra.mxu1 %v6005_v40  ;;  %v304_v9 = vmul.f32 %v8547_v12, %v8547_v12 }
  0xb4   :  { %11699 = vst [vmem:[#allocation22_spill] sm:$0xff] %v8544_v7  ;;  %v8561_v30 = vsub.f32 %v8133_v32, %v198_v17  ;;  %v8564_v31 = vsub.f32 %v8138_v33, %v198_v17  ;;  %v374_v32 = vadd.f32 %v302_v53, %v301_v58  ;;  %v303_v33 = vmul.f32 %v8544_v7, %v8544_v7  ;;  %v143_v17 = vpop.xlane.xlu1 %142  ;;  %v8592_v58 = vld [vmem:[%s11601_s0 + $0x1f8] sm:$0xff] }
  0xb5   :  { %v202_v53 = vmul.f32 0.00390625, %v137_v18  ;;  %v307_v18 = vmul.f32 %v8567_v25, %v8567_v25 }
  0xb6   :  { %369 = vadd.xlane.f32.xlu1 %v368_v19  ;;  %175 = vadd.xlane.f32.xlu0 %v174_v8  ;;  %v895_v19 = vld [vmem:[%s11602_s3 + $0x360] sm:$0xff]  ;;  %11700 = vst [vmem:[#allocation23_spill] sm:$0xff] %v8561_v30  ;;  %v140_v8 = vpop.xlane.xlu0 %139  ;;  %v305_v40 = vmul.f32 %v8561_v30, %v8561_v30  ;;  %v308_v30 = vmul.f32 %v8570_v35, %v8570_v35 }
  0xb7   :  { %v6014_v26 = vcombine.high %v891_v34, %v895_v19  ;;  %v6013_v13 = vcombine.low %v891_v34, %v895_v19  ;;  %v6021_v34 = vcombine.low %v899_v36, %v903_v37  ;;  %v8602_v19 = vsub.f32 %v8162_v39, %v200_v23  ;;  %v911_v36 = vld [vmem:[%s11602_s3 + $0x3e0] sm:$0xff] }
  0xb8   :  { %v183_v39 = vadd.f32 %v8592_v58, %v8587_v21  ;;  %v8623_v37 = vsub.f32 %v8181_v44, %v202_v53 }
  0xb9   :  { %1623 = vmatprep.subr.bf16.mxu1 %v6014_v26  ;;  %v8605_v26 = vsub.f32 %v8171_v42, %v201_v22  ;;  %v907_v42 = vld [vmem:[%s11602_s3 + $0x3c0] sm:$0xff]  ;;  %v310_v35 = vmul.f32 %v8602_v19, %v8602_v19 }
  0xba   :  { %178 = vadd.xlane.f32.xlu1 %v177_v41  ;;  %372 = vadd.xlane.f32.xlu0 %v371_v15  ;;  %v306_v41 = vmul.f32 %v8564_v31, %v8564_v31  ;;  %v8599_v15 = vsub.f32 %v8157_v38, %v200_v23  ;;  %v146_v7 = vpop.xlane.xlu0 %145  ;;  %v8612_v38 = vsub.f32 %v8176_v43, %v201_v22 }
  0xbb   :  { %1624 = vmatpush1.bf16.msra.mxu1 %v6013_v13  ;;  %v377_v23 = vadd.f32 %v304_v9, %v303_v33  ;;  %v203_v13 = vmul.f32 0.00390625, %v140_v8  ;;  %v6030_v43 = vcombine.high %v907_v42, %v911_v36  ;;  %v8626_v22 = vsub.f32 %v8186_v45, %v202_v53  ;;  %v149_v33 = vpop.xlane.xlu1 %148 }
  0xbc   :  { %1625 = vmatprep.subr.bf16.mxu1 %v6022_v28  ;;  %v309_v8 = vmul.f32 %v8599_v15, %v8599_v15  ;;  %v6029_v9 = vcombine.low %v907_v42, %v911_v36  ;;  %v383_v28 = vadd.f32 %v308_v30, %v307_v18  ;;  %v205_v25 = vmul.f32 0.00390625, %v146_v7 }
  0xbd   :  { %v311_v44 = vmul.f32 %v8605_v26, %v8605_v26  ;;  %v8635_v45 = vsub.f32 %v8195_v48, %v203_v13  ;;  %v312_v53 = vmul.f32 %v8612_v38, %v8612_v38  ;;  %v313_v7 = vmul.f32 %v8623_v37, %v8623_v37 }
  0xbe   :  { %375 = vadd.xlane.f32.xlu1 %v374_v32  ;;  %181 = vadd.xlane.f32.xlu0 %v180_v24  ;;  %v380_v24 = vadd.f32 %v306_v41, %v305_v40  ;;  %v204_v32 = vmul.f32 0.00390625, %v143_v17  ;;  %v8638_v17 = vsub.f32 %v8200_v49, %v203_v13  ;;  %v152_v30 = vpop.xlane.xlu0 %151  ;;  %v314_v48 = vmul.f32 %v8626_v22, %v8626_v22 }
  0xbf   :  { %1626 = vmatpush1.bf16.msra.mxu1 %v6021_v34  ;;  %v206_v34 = vmul.f32 0.00390625, %v149_v33  ;;  %v8653_v49 = vsub.f32 %v8219_v54, %v205_v25  ;;  %v8656_v18 = vsub.f32 %v8224_v55, %v205_v25  ;;  %v207_v13 = vmul.f32 0.00390625, %v152_v30  ;;  %v155_v42 = vpop.xlane.xlu1 %154 }
  0xc0   :  { %1627 = vmatprep.subr.bf16.mxu1 %v6030_v43  ;;  %v8645_v40 = vsub.f32 %v8205_v50, %v204_v32  ;;  %v8648_v41 = vsub.f32 %v8210_v51, %v204_v32  ;;  %v315_v50 = vmul.f32 %v8635_v45, %v8635_v45  ;;  %v316_v51 = vmul.f32 %v8638_v17, %v8638_v17 }
  0xc1   :  { %11703 = vst [vmem:[#allocation26_spill] sm:$0xff] %v8653_v49  ;;  %11704 = vst [vmem:[#allocation27_spill] sm:$0xff] %v8656_v18  ;;  %v8663_v36 = vsub.f32 %v8229_v56, %v206_v34  ;;  %v392_v54 = vadd.f32 %v314_v48, %v313_v7  ;;  %v8670_v25 = vsub.f32 %v8234_v57, %v206_v34 }
  0xc2   :  { %184 = vadd.xlane.f32.xlu1 %v183_v39  ;;  %378 = vadd.xlane.f32.xlu0 %v377_v23  ;;  %v386_v39 = vadd.f32 %v310_v35, %v309_v8  ;;  %v389_v23 = vadd.f32 %v312_v53, %v311_v44  ;;  %v317_v55 = vmul.f32 %v8645_v40, %v8645_v40 }
  0xc3   :  { %1628 = vmatpush1.bf16.msra.mxu1 %v6029_v9  ;;  %11705 = vst [vmem:[#allocation28_spill] sm:$0xff] %v8663_v36  ;;  %v318_v35 = vmul.f32 %v8648_v41, %v8648_v41  ;;  %v319_v43 = vmul.f32 %v8653_v49, %v8653_v49  ;;  %v320_v32 = vmul.f32 %v8656_v18, %v8656_v18 }
  0xc4   :  { %v8677_v56 = vsub.f32 %v8243_v60, %v207_v13  ;;  %v8680_v8 = vsub.f32 %v8248_v61, %v207_v13  ;;  %v395_v33 = vadd.f32 %v316_v51, %v315_v50  ;;  %v321_v44 = vmul.f32 %v8663_v36, %v8663_v36 }
  0xc5   :  { %v398_v9 = vadd.f32 %v318_v35, %v317_v55  ;;  %v322_v53 = vmul.f32 %v8670_v25, %v8670_v25  ;;  %v605_v50 = vlaneseq }
  0xc6   :  { %381 = vadd.xlane.f32.xlu1 %v380_v24  ;;  %384 = vadd.xlane.f32.xlu0 %v383_v28  ;;  %v208_v24 = vmul.f32 0.00390625, %v155_v42  ;;  %11706 = vst [vmem:[#allocation29_spill] sm:$0xff] %v8677_v56  ;;  %11707 = vst [vmem:[#allocation30_spill] sm:$0xff] %v8680_v8  ;;  %v401_v28 = vadd.f32 %v320_v32, %v319_v43  ;;  %v323_v61 = vmul.f32 %v8677_v56, %v8677_v56 }
  0xc7   :  { %v324_v30 = vmul.f32 %v8680_v8, %v8680_v8  ;;  %v11724_v8 = vld [vmem:[#allocation5_spill] sm:$0xff] }
  0xc8   :  { %v8683_v57 = vsub.f32 %v8253_v62, %v208_v24  ;;  %v8690_v60 = vsub.f32 %v8258_v63, %v208_v24  ;;  %v404_v62 = vadd.f32 %v322_v53, %v321_v44 }
  0xc9   :  { %v407_v7 = vadd.f32 %v324_v30, %v323_v61  ;;  %v679_v61 = vld [vmem:[%s11604_s2] sm:$0x3] }
  0xca   :  { %387 = vadd.xlane.f32.xlu1 %v386_v39  ;;  %390 = vadd.xlane.f32.xlu0 %v389_v23  ;;  %11708 = vst [vmem:[#allocation31_spill] sm:$0xff] %v8683_v57  ;;  %11709 = vst [vmem:[#allocation32_spill] sm:$0xff] %v8690_v60  ;;  %v325_v34 = vmul.f32 %v8683_v57, %v8683_v57  ;;  %v326_v48 = vmul.f32 %v8690_v60, %v8690_v60  ;;  %v8703_v39 = vld [vmem:[%s11602_s3 + $0x8] sm:$0xff]  ;;  %v11723_v57 = vld [vmem:[#allocation4_spill] sm:$0xff] }
  0xcb   :  { %v8708_v23 = vld [vmem:[%s11602_s3 + $0x28] sm:$0xff] }
  0xcc   :  { %v410_v63 = vadd.f32 %v326_v48, %v325_v34  ;;  %v5912_v13 = vcombine.high %v8703_v39, %v8708_v23 }
  0xce   :  { %393 = vadd.xlane.f32.xlu1 %v392_v54  ;;  %396 = vadd.xlane.f32.xlu0 %v395_v33  ;;  %v8712_v54 = vshrl.u32 %v605_v50, 7  ;;  %v603_v33 = vld [vmem:[%s11603_s1] sm:$0x3] }
  0xcf   :  { %1790 = vmatprep.subr.bf16.mxu1 %v5912_v13 }
  0xd0   :  { %11710 = vst [vmem:[#allocation33_spill] sm:$0xff] %v8712_v54  ;;  %v8730_v30 = vsub.s32 0, %v8712_v54 }
  0xd2   :  { %399 = vadd.xlane.f32.xlu1 %v398_v9  ;;  %402 = vadd.xlane.f32.xlu0 %v401_v28  ;;  %v8718_v9 = vsub.s32 1, %v8712_v54  ;;  %11714 = vst [vmem:[#allocation37_spill] sm:$0xff] %v8730_v30  ;;  %v8814_v54 = vld [vmem:[%s11602_s3 + $0x128] sm:$0xff] }
  0xd4   :  { %11711 = vst [vmem:[#allocation34_spill] sm:$0xff] %v8718_v9  ;;  %v8747_v50 = vrot.slane %v603_v33, %v8718_v9 }
  0xd6   :  { %405 = vadd.xlane.f32.xlu1 %v404_v62  ;;  %408 = vadd.xlane.f32.xlu0 %v407_v7 }
  0xda   :  { %411 = vadd.xlane.f32.xlu1 %v410_v63 }
 0x127   :  { %v349_v51 = vpop.xlane.xlu0 %348 }
 0x128   :  { %v443_v42 = vmul.f32 0.00390625, %v349_v51  ;;  %v8750_v51 = vrot.slane %v679_v61, %v8718_v9 }
 0x12a   :  { %v475_v55 = vadd.f32 1e-05, %v443_v42 }
 0x12b   :  { %v352_v35 = vpop.xlane.xlu1 %351  ;;  %v158_v24 = vpop.xlane.xlu0 %157 }
 0x12c   :  { %6869 = vrsqrt.f32 %v475_v55  ;;  %v444_v43 = vmul.f32 0.00390625, %v352_v35  ;;  %v209_v32 = vmul.f32 0.00390625, %v158_v24  ;;  %v8759_v24 = vrot.slane %v603_v33, %v8730_v30  ;;  %v8809_v33 = vld [vmem:[%s11602_s3 + $0x108] sm:$0xff] }
 0x12e   :  { %v476_v28 = vadd.f32 1e-05, %v444_v43  ;;  %v8721_v44 = vsub.f32 %v8337_v0, %v209_v32  ;;  %v8724_v53 = vsub.f32 %v8342_v1, %v209_v32  ;;  %v8737_v0 = vld [vmem:[%s11602_s3 + $0x48] sm:$0xff] }
 0x12f   :  { %v161_v62 = vpop.xlane.xlu1 %160  ;;  %v355_v7 = vpop.xlane.xlu0 %354  ;;  %v8742_v1 = vld [vmem:[%s11602_s3 + $0x68] sm:$0xff] }
 0x130   :  { %11712 = vst [vmem:[#allocation35_spill] sm:$0xff] %v8721_v44  ;;  %11713 = vst [vmem:[#allocation36_spill] sm:$0xff] %v8724_v53  ;;  %6871 = vrsqrt.f32 %v476_v28  ;;  %v210_v34 = vmul.f32 0.00390625, %v161_v62  ;;  %v445_v48 = vmul.f32 0.00390625, %v355_v7  ;;  %v327_v63 = vmul.f32 %v8721_v44, %v8721_v44  ;;  %v8764_v43 = vld [vmem:[%s11602_s3 + $0x88] sm:$0xff] }
 0x131   :  { %v328_v13 = vmul.f32 %v8724_v53, %v8724_v53  ;;  %v8769_v32 = vld [vmem:[%s11602_s3 + $0xa8] sm:$0xff] }
 0x132   :  { %v8753_v42 = vsub.f32 %v8369_v59, %v210_v34  ;;  %v8756_v55 = vsub.f32 %v8374_v3, %v210_v34  ;;  %v477_v35 = vadd.f32 1e-05, %v445_v48  ;;  %v8772_v3 = vrot.slane %v679_v61, %v8730_v30  ;;  %v8781_v34 = vld [vmem:[%s11602_s3 + $0xc8] sm:$0xff] }
 0x133   :  { %v358_v28 = vpop.xlane.xlu1 %357  ;;  %v164_v59 = vpop.xlane.xlu0 %163  ;;  %v413_v62 = vadd.f32 %v328_v13, %v327_v63  ;;  %v8786_v48 = vld [vmem:[%s11602_s3 + $0xe8] sm:$0xff] }
 0x134   :  { %11715 = vst [vmem:[#allocation38_spill] sm:$0xff] %v8753_v42  ;;  %11716 = vst [vmem:[#allocation39_spill] sm:$0xff] %v8756_v55  ;;  %6873 = vrsqrt.f32 %v477_v35  ;;  %v446_v63 = vmul.f32 0.00390625, %v358_v28  ;;  %v211_v61 = vmul.f32 0.00390625, %v164_v59  ;;  %v329_v13 = vmul.f32 %v8753_v42, %v8753_v42  ;;  %v8825_v44 = vld [vmem:[%s11602_s3 + $0x148] sm:$0xff] }
 0x135   :  { %414 = vadd.xlane.f32.xlu0 %v413_v62  ;;  %v330_v7 = vmul.f32 %v8756_v55, %v8756_v55  ;;  %v11721_v62 = vld [vmem:[#allocation13_spill] sm:$0xff] }
 0x136   :  { %v6870_v30 = vpop.eup %6869  ;;  %v478_v35 = vadd.f32 1e-05, %v446_v63  ;;  %v8799_v28 = vsub.f32 %v8389_v47, %v211_v61  ;;  %v8802_v59 = vsub.f32 %v8394_v52, %v211_v61 }
 0x137   :  { %v539_v63 = vmul.f32 %v6870_v30, %v8319_v10  ;;  %v540_v47 = vmul.f32 %v6870_v30, %v8322_v11  ;;  %v167_v9 = vpop.xlane.xlu1 %166  ;;  %v361_v52 = vpop.xlane.xlu0 %360  ;;  %v416_v61 = vadd.f32 %v330_v7, %v329_v13  ;;  %v8830_v10 = vld [vmem:[%s11602_s3 + $0x168] sm:$0xff] }
 0x138   :  { %11717 = vst [vmem:[#allocation40_spill] sm:$0xff] %v8799_v28  ;;  %11718 = vst [vmem:[#allocation41_spill] sm:$0xff] %v8802_v59  ;;  %6875 = vrsqrt.f32 %v478_v35  ;;  %v212_v55 = vmul.f32 0.00390625, %v167_v9  ;;  %v447_v42 = vmul.f32 0.00390625, %v361_v52  ;;  %v331_v53 = vmul.f32 %v8799_v28, %v8799_v28  ;;  %v11719_v35 = vld [vmem:[#allocation12_spill] sm:$0xff] }
 0x139   :  { %417 = vadd.xlane.f32.xlu1 %v416_v61  ;;  %v332_v11 = vmul.f32 %v8802_v59, %v8802_v59  ;;  %v616_v9 = vmul.f32 %v8747_v50, %v540_v47  ;;  %v615_v61 = vmul.f32 %v8759_v24, %v539_v63 }
 0x13a   :  { %v6872_v13 = vpop.eup %6871  ;;  %v8840_v52 = vsub.f32 %v11719_v35, %v212_v55  ;;  %v8843_v28 = vsub.f32 %v11721_v62, %v212_v55  ;;  %v479_v56 = vadd.f32 1e-05, %v447_v42 }
 0x13b   :  { %v541_v59 = vmul.f32 %v6872_v13, %v11723_v57  ;;  %v542_v47 = vmul.f32 %v6872_v13, %v11724_v8  ;;  %v364_v60 = vpop.xlane.xlu1 %363  ;;  %v170_v49 = vpop.xlane.xlu0 %169  ;;  %v419_v30 = vadd.f32 %v332_v11, %v331_v53  ;;  %v692_v8 = vadd.f32 %v8750_v51, %v616_v9  ;;  %v11726_v13 = vld [vmem:[#allocation3_spill] sm:$0xff] }
 0x13c   :  { %11720 = vst [vmem:[#allocation12_spill] sm:$0xff] %v8840_v52  ;;  %11722 = vst [vmem:[#allocation13_spill] sm:$0xff] %v8843_v28  ;;  %6877 = vrsqrt.f32 %v479_v56  ;;  %v448_v36 = vmul.f32 0.00390625, %v364_v60  ;;  %v213_v35 = vmul.f32 0.00390625, %v170_v49  ;;  %v333_v55 = vmul.f32 %v8840_v52, %v8840_v52  ;;  %v11725_v60 = vld [vmem:[#allocation2_spill] sm:$0xff] }
 0x13d   :  { %420 = vadd.xlane.f32.xlu0 %v419_v30  ;;  %v334_v42 = vmul.f32 %v8843_v28, %v8843_v28  ;;  %v618_v57 = vmul.f32 %v8747_v50, %v542_v47  ;;  %v617_v62 = vmul.f32 %v8759_v24, %v541_v59  ;;  %v691_v56 = vadd.f32 %v8772_v3, %v615_v61 }
 0x13e   :  { %v6874_v53 = vpop.eup %6873  ;;  %v480_v63 = vadd.f32 1e-05, %v448_v36  ;;  %v8858_v11 = vsub.f32 %v8425_v2, %v213_v35  ;;  %v8861_v49 = vsub.f32 %v8437_v46, %v213_v35 }
 0x13f   :  { %v543_v30 = vmul.f32 %v6874_v53, %v11725_v60  ;;  %v544_v7 = vmul.f32 %v6874_v53, %v11726_v13  ;;  %v173_v28 = vpop.xlane.xlu1 %172  ;;  %v367_v47 = vpop.xlane.xlu0 %366  ;;  %v422_v52 = vadd.f32 %v334_v42, %v333_v55  ;;  %v694_v9 = vadd.f32 %v8750_v51, %v618_v57 }
 0x140   :  { %6879 = vrsqrt.f32 %v480_v63  ;;  %v214_v59 = vmul.f32 0.00390625, %v173_v28  ;;  %v449_v36 = vmul.f32 0.00390625, %v367_v47  ;;  %v693_v2 = vadd.f32 %v8772_v3, %v617_v62  ;;  %v11728_v62 = vld [vmem:[#allocation7_spill] sm:$0xff] }
 0x141   :  { %423 = vadd.xlane.f32.xlu1 %v422_v52  ;;  %v8868_v18 = vpack.c.bf16 %v694_v9, %v692_v8  ;;  %v335_v46 = vmul.f32 %v8858_v11, %v8858_v11  ;;  %v336_v61 = vmul.f32 %v8861_v49, %v8861_v49  ;;  %v620_v35 = vmul.f32 %v8747_v50, %v544_v7  ;;  %v11727_v52 = vld [vmem:[#allocation6_spill] sm:$0xff] }
 0x142   :  { %v6876_v53 = vpop.eup %6875  ;;  %v8876_v55 = vsub.f32 %v8453_v6, %v214_v59  ;;  %v8879_v28 = vsub.f32 %v8464_v5, %v214_v59  ;;  %v481_v42 = vadd.f32 1e-05, %v449_v36  ;;  %v8881_v57 = vpack.c.bf16 %v693_v2, %v691_v56 }
 0x143   :  { %v545_v8 = vmul.f32 %v6876_v53, %v11727_v52  ;;  %v546_v63 = vmul.f32 %v6876_v53, %v11728_v62  ;;  %v370_v60 = vpop.xlane.xlu1 %369  ;;  %1629 = vmatprep.mubr.bf16.mxu1 %v8868_v18  ;;  %v176_v13 = vpop.xlane.xlu0 %175  ;;  %v425_v47 = vadd.f32 %v336_v61, %v335_v46  ;;  %v619_v36 = vmul.f32 %v8759_v24, %v543_v30 }
 0x144   :  { %6881 = vrsqrt.f32 %v481_v42  ;;  %v450_v6 = vmul.f32 0.00390625, %v370_v60  ;;  %v215_v9 = vmul.f32 0.00390625, %v176_v13  ;;  %1630 = vmatmul.mubr.bf16.vlgmr.msra.gmra.mrb[0].mxu1 %v8881_v57  ;;  %v337_v5 = vmul.f32 %v8876_v55, %v8876_v55  ;;  %v11730_v60 = vld [vmem:[#allocation8_spill] sm:$0xff]  ;;  %v11731_v13 = vld [vmem:[#allocation9_spill] sm:$0xff] }
 0x145   :  { %426 = vadd.xlane.f32.xlu0 %v425_v47  ;;  %v338_v56 = vmul.f32 %v8879_v28, %v8879_v28  ;;  %v622_v59 = vmul.f32 %v8747_v50, %v546_v63  ;;  %v621_v2 = vmul.f32 %v8759_v24, %v545_v8  ;;  %v696_v52 = vadd.f32 %v8750_v51, %v620_v35 }
 0x146   :  { %v6878_v46 = vpop.eup %6877  ;;  %v482_v61 = vadd.f32 1e-05, %v450_v6  ;;  %v8897_v53 = vsub.f32 %v8497_v14, %v215_v9  ;;  %v8900_v42 = vsub.f32 %v8502_v20, %v215_v9  ;;  %v11729_v62 = vcombine.low %v8703_v39, %v8708_v23 }
 0x147   :  { %v547_v63 = vmul.f32 %v6878_v46, %v11730_v60  ;;  %v548_v30 = vmul.f32 %v6878_v46, %v11731_v13  ;;  %v179_v47 = vpop.xlane.xlu1 %178  ;;  %v373_v8 = vpop.xlane.xlu0 %372  ;;  %v428_v7 = vadd.f32 %v338_v56, %v337_v5  ;;  %v698_v6 = vadd.f32 %v8750_v51, %v622_v59  ;;  %v11735_v60 = vld [vmem:[#allocation11_spill] sm:$0xff] }
 0x148   :  { %1791 = vmatpush1.bf16.msra.mxu1 %v11729_v62  ;;  %v11732_v14 = vcombine.high %v8737_v0, %v8742_v1  ;;  %6883 = vrsqrt.f32 %v482_v61  ;;  %v216_v20 = vmul.f32 0.00390625, %v179_v47  ;;  %v451_v35 = vmul.f32 0.00390625, %v373_v8 }
 0x149   :  { %v695_v9 = vadd.f32 %v8772_v3, %v619_v36  ;;  %429 = vadd.xlane.f32.xlu1 %v428_v7  ;;  %v8913_v39 = vpack.c.bf16 %v698_v6, %v696_v52  ;;  %v697_v23 = vadd.f32 %v8772_v3, %v621_v2  ;;  %v339_v46 = vmul.f32 %v8897_v53, %v8897_v53  ;;  %v11734_v2 = vld [vmem:[#allocation10_spill] sm:$0xff] }
 0x14a   :  { %1792 = vmatprep.subr.bf16.mxu1 %v11732_v14  ;;  %v340_v5 = vmul.f32 %v8900_v42, %v8900_v42  ;;  %v6880_v56 = vpop.eup %6879  ;;  %v8921_v59 = vsub.f32 %v8521_v27, %v216_v20  ;;  %v8924_v61 = vsub.f32 %v8526_v4, %v216_v20  ;;  %v483_v62 = vadd.f32 1e-05, %v451_v35 }
 0x14b   :  { %v624_v7 = vmul.f32 %v8747_v50, %v548_v30  ;;  %v11733_v36 = vcombine.low %v8737_v0, %v8742_v1  ;;  %v549_v52 = vmul.f32 %v6880_v56, %v11734_v2  ;;  %v550_v13 = vmul.f32 %v6880_v56, %v11735_v60  ;;  %v376_v47 = vpop.xlane.xlu1 %375  ;;  %1639 = vmatprep.mubr.bf16.mxu1 %v8913_v39  ;;  %v182_v8 = vpop.xlane.xlu0 %181  ;;  %v11739_v60 = vld [vmem:[#allocation15_spill] sm:$0xff] }
 0x14c   :  { %v8933_v27 = vpack.c.bf16 %v697_v23, %v695_v9  ;;  %v431_v6 = vadd.f32 %v340_v5, %v339_v46  ;;  %6885 = vrsqrt.f32 %v483_v62  ;;  %v452_v4 = vmul.f32 0.00390625, %v376_v47 }
 0x14d   :  { %1793 = vmatpush1.bf16.msra.mxu1 %v11733_v36  ;;  %v217_v14 = vmul.f32 0.00390625, %v182_v8  ;;  %v341_v30 = vmul.f32 %v8921_v59, %v8921_v59  ;;  %v11736_v0 = vcombine.high %v8764_v43, %v8769_v32  ;;  %v342_v1 = vmul.f32 %v8924_v61, %v8924_v61  ;;  %v11738_v36 = vld [vmem:[#allocation14_spill] sm:$0xff] }
 0x14e   :  { %1640 = vmatmul.mubr.bf16.gmra.mrb[4].mxu1 %v8933_v27  ;;  %432 = vadd.xlane.f32.xlu0 %v431_v6  ;;  %v626_v20 = vmul.f32 %v8747_v50, %v550_v13  ;;  %v700_v35 = vadd.f32 %v8750_v51, %v624_v7  ;;  %v6882_v9 = vpop.eup %6881  ;;  %v484_v23 = vadd.f32 1e-05, %v452_v4  ;;  %v623_v56 = vmul.f32 %v8759_v24, %v547_v63 }
 0x14f   :  { %1794 = vmatprep.subr.bf16.mxu1 %v11736_v0  ;;  %v8946_v46 = vsub.f32 %v8541_v16, %v217_v14  ;;  %v8949_v5 = vsub.f32 %v8552_v29, %v217_v14  ;;  %v11737_v62 = vcombine.low %v8764_v43, %v8769_v32  ;;  %v551_v2 = vmul.f32 %v6882_v9, %v11738_v36  ;;  %v185_v47 = vpop.xlane.xlu1 %184  ;;  %v379_v7 = vpop.xlane.xlu0 %378 }
 0x150   :  { %v552_v13 = vmul.f32 %v6882_v9, %v11739_v60  ;;  %v434_v8 = vadd.f32 %v342_v1, %v341_v30  ;;  %v702_v6 = vadd.f32 %v8750_v51, %v626_v20  ;;  %v11740_v16 = vcombine.high %v8781_v34, %v8786_v48 }
 0x151   :  { %1795 = vmatpush1.bf16.msra.mxu1 %v11737_v62  ;;  %6887 = vrsqrt.f32 %v484_v23  ;;  %v218_v29 = vmul.f32 0.00390625, %v185_v47  ;;  %v453_v63 = vmul.f32 0.00390625, %v379_v7  ;;  %v625_v4 = vmul.f32 %v8759_v24, %v549_v52  ;;  %v8982_v23 = vld [vmem:[%s11602_s3 + $0x188] sm:$0xff]  ;;  %v11743_v62 = vld [vmem:[#allocation17_spill] sm:$0xff] }
 0x152   :  { %1796 = vmatprep.subr.bf16.mxu1 %v11740_v16  ;;  %435 = vadd.xlane.f32.xlu1 %v434_v8  ;;  %v8962_v43 = vpack.c.bf16 %v702_v6, %v700_v35  ;;  %v699_v32 = vadd.f32 %v8772_v3, %v623_v56  ;;  %v343_v14 = vmul.f32 %v8946_v46, %v8946_v46  ;;  %v6884_v0 = vpop.eup %6883  ;;  %v11742_v56 = vld [vmem:[#allocation16_spill] sm:$0xff] }
 0x153   :  { %v344_v30 = vmul.f32 %v8949_v5, %v8949_v5  ;;  %v8970_v1 = vsub.f32 %v8587_v21, %v218_v29  ;;  %v8973_v20 = vsub.f32 %v8592_v58, %v218_v29  ;;  %v485_v9 = vadd.f32 1e-05, %v453_v63  ;;  %v8987_v21 = vld [vmem:[%s11602_s3 + $0x1a8] sm:$0xff]  ;;  %v382_v60 = vpop.xlane.xlu1 %381  ;;  %v385_v47 = vpop.xlane.xlu0 %384 }
 0x154   :  { %v701_v52 = vadd.f32 %v8772_v3, %v625_v4  ;;  %v11741_v35 = vcombine.low %v8781_v34, %v8786_v48  ;;  %v553_v58 = vmul.f32 %v6884_v0, %v11742_v56  ;;  %v554_v36 = vmul.f32 %v6884_v0, %v11743_v62  ;;  %1649 = vmatprep.mubr.bf16.mxu1 %v8962_v43 }
 0x155   :  { %v437_v34 = vadd.f32 %v344_v30, %v343_v14  ;;  %v628_v48 = vmul.f32 %v8747_v50, %v552_v13  ;;  %6889 = vrsqrt.f32 %v485_v9  ;;  %v454_v7 = vmul.f32 0.00390625, %v382_v60 }
 0x156   :  { %1797 = vmatpush1.bf16.msra.mxu1 %v11741_v35  ;;  %v455_v8 = vmul.f32 0.00390625, %v385_v47  ;;  %v8993_v6 = vpack.c.bf16 %v701_v52, %v699_v32  ;;  %v11744_v16 = vcombine.high %v8809_v33, %v8814_v54  ;;  %v345_v29 = vmul.f32 %v8970_v1, %v8970_v1  ;;  %v6886_v14 = vpop.eup %6885  ;;  %v11745_v52 = vld [vmem:[#allocation19_spill] sm:$0xff] }
 0x157   :  { %438 = vadd.xlane.f32.xlu0 %v437_v34  ;;  %v346_v63 = vmul.f32 %v8973_v20, %v8973_v20  ;;  %v630_v4 = vmul.f32 %v8747_v50, %v554_v36  ;;  %v5960_v13 = vcombine.high %v8982_v23, %v8987_v21  ;;  %v486_v30 = vadd.f32 1e-05, %v454_v7  ;;  %v388_v56 = vpop.xlane.xlu1 %387  ;;  %v391_v62 = vpop.xlane.xlu0 %390  ;;  %v11747_v7 = vld [vmem:[#allocation18_spill] sm:$0xff] }
 0x158   :  { %1798 = vmatprep.subr.bf16.mxu1 %v11744_v16  ;;  %v487_v32 = vadd.f32 1e-05, %v455_v8  ;;  %1650 = vmatmul.mubr.bf16.gmra.mrb[8].mxu1 %v8993_v6  ;;  %v627_v0 = vmul.f32 %v8759_v24, %v551_v2  ;;  %v629_v9 = vmul.f32 %v8759_v24, %v553_v58  ;;  %v556_v35 = vmul.f32 %v6886_v14, %v11745_v52  ;;  %v11750_v52 = vld [vmem:[#allocation20_spill] sm:$0xff] }
 0x159   :  { %v440_v60 = vadd.f32 %v346_v63, %v345_v29  ;;  %v704_v47 = vadd.f32 %v8750_v51, %v628_v48  ;;  %v706_v36 = vadd.f32 %v8750_v51, %v630_v4  ;;  %v11746_v34 = vcombine.low %v8809_v33, %v8814_v54 }
 0x15a   :  { %v555_v8 = vmul.f32 %v6886_v14, %v11747_v7  ;;  %6891 = vrsqrt.f32 %v486_v30  ;;  %v456_v16 = vmul.f32 0.00390625, %v388_v56  ;;  %v457_v2 = vmul.f32 0.00390625, %v391_v62  ;;  %v844_v14 = vld [vmem:[%s11602_s3 + $0x1c8] sm:$0xff]  ;;  %v11751_v56 = vld [vmem:[#allocation21_spill] sm:$0xff] }
 0x15b   :  { %1799 = vmatpush1.bf16.msra.mxu1 %v11746_v34  ;;  %v11748_v58 = vcombine.high %v8825_v44, %v8830_v10  ;;  %6893 = vrsqrt.f32 %v487_v32  ;;  %441 = vadd.xlane.f32.xlu1 %v440_v60  ;;  %v9018_v29 = vpack.c.bf16 %v706_v36, %v704_v47  ;;  %v703_v48 = vadd.f32 %v8772_v3, %v627_v0  ;;  %v6888_v4 = vpop.eup %6887  ;;  %v848_v30 = vld [vmem:[%s11602_s3 + $0x1e8] sm:$0xff]  ;;  %v394_v60 = vpop.xlane.xlu1 %393 }
 0x15c   :  { %v705_v63 = vadd.f32 %v8772_v3, %v629_v9  ;;  %v488_v54 = vadd.f32 1e-05, %v456_v16  ;;  %v489_v33 = vadd.f32 1e-05, %v457_v2  ;;  %v557_v32 = vmul.f32 %v6888_v4, %v11750_v52  ;;  %v397_v0 = vpop.xlane.xlu0 %396 }
 0x15d   :  { %1800 = vmatprep.subr.bf16.mxu1 %v11748_v58  ;;  %11749 = vst [vmem:[#allocation4_spill] sm:$0xff] %v9018_v29  ;;  %v558_v62 = vmul.f32 %v6888_v4, %v11751_v56  ;;  %1659 = vmatprep.mubr.bf16.mxu1 %v9018_v29  ;;  %v632_v47 = vmul.f32 %v8747_v50, %v556_v35  ;;  %v458_v36 = vmul.f32 0.00390625, %v394_v60  ;;  %v459_v4 = vmul.f32 0.00390625, %v397_v0  ;;  %v11754_v56 = vld [vmem:[#allocation22_spill] sm:$0xff] }
 0x15e   :  { %v9031_v9 = vpack.c.bf16 %v705_v63, %v703_v48  ;;  %6895 = vrsqrt.f32 %v488_v54  ;;  %v631_v34 = vmul.f32 %v8759_v24, %v555_v8  ;;  %v11753_v7 = vcombine.low %v8825_v44, %v8830_v10  ;;  %v852_v44 = vld [vmem:[%s11602_s3 + $0x208] sm:$0xff] }
 0x15f   :  { %v5959_v16 = vcombine.low %v8982_v23, %v8987_v21  ;;  %6897 = vrsqrt.f32 %v489_v33  ;;  %v634_v2 = vmul.f32 %v8747_v50, %v558_v62  ;;  %v633_v58 = vmul.f32 %v8759_v24, %v557_v32  ;;  %v6890_v63 = vpop.eup %6889  ;;  %v856_v10 = vld [vmem:[%s11602_s3 + $0x228] sm:$0xff]  ;;  %v400_v21 = vpop.xlane.xlu1 %399 }
 0x160   :  { %11752 = vst [vmem:[#allocation5_spill] sm:$0xff] %v9031_v9  ;;  %1801 = vmatpush1.bf16.msra.mxu1 %v11753_v7  ;;  %v5968_v48 = vcombine.high %v844_v14, %v848_v30  ;;  %v490_v35 = vadd.f32 1e-05, %v458_v36  ;;  %v560_v23 = vmul.f32 %v6890_v63, %v8547_v12  ;;  %v708_v8 = vadd.f32 %v8750_v51, %v632_v47 }
 0x161   :  { %1802 = vmatprep.subr.bf16.mxu1 %v5960_v13  ;;  %1660 = vmatmul.mubr.bf16.gmra.mrb[12].mxu1 %v9031_v9  ;;  %v710_v13 = vadd.f32 %v8750_v51, %v634_v2  ;;  %v709_v54 = vadd.f32 %v8772_v3, %v633_v58  ;;  %v460_v33 = vmul.f32 0.00390625, %v400_v21  ;;  %v707_v52 = vadd.f32 %v8772_v3, %v631_v34  ;;  %v860_v2 = vld [vmem:[%s11602_s3 + $0x248] sm:$0xff] }
 0x162   :  { %6899 = vrsqrt.f32 %v490_v35  ;;  %v5967_v32 = vcombine.low %v844_v14, %v848_v30  ;;  %v559_v62 = vmul.f32 %v6890_v63, %v11754_v56  ;;  %v5976_v0 = vcombine.high %v852_v44, %v856_v10  ;;  %v864_v34 = vld [vmem:[%s11602_s3 + $0x268] sm:$0xff] }
 0x163   :  { %v9055_v60 = vpack.c.bf16 %v710_v13, %v708_v8  ;;  %v491_v36 = vadd.f32 1e-05, %v459_v4  ;;  %v492_v7 = vadd.f32 1e-05, %v460_v33  ;;  %v9057_v47 = vpack.c.bf16 %v709_v54, %v707_v52  ;;  %v11757_v30 = vld [vmem:[#allocation23_spill] sm:$0xff]  ;;  %v406_v63 = vpop.xlane.xlu1 %405  ;;  %v11758_v4 = vld [vmem:[#allocation25_spill] sm:$0xff] }
 0x164   :  { %1803 = vmatpush1.bf16.msra.mxu1 %v5959_v16  ;;  %v6892_v12 = vpop.eup %6891  ;;  %v636_v35 = vmul.f32 %v8747_v50, %v560_v23  ;;  %v462_v8 = vmul.f32 0.00390625, %v406_v63  ;;  %v5975_v13 = vcombine.low %v852_v44, %v856_v10  ;;  %v635_v33 = vmul.f32 %v8759_v24, %v559_v62 }
 0x165   :  { %11755 = vst [vmem:[#allocation2_spill] sm:$0xff] %v9055_v60  ;;  %1804 = vmatprep.subr.bf16.mxu1 %v5968_v48  ;;  %11756 = vst [vmem:[#allocation3_spill] sm:$0xff] %v9057_v47  ;;  %v6894_v14 = vpop.eup %6893  ;;  %v561_v16 = vmul.f32 %v6892_v12, %v11757_v30  ;;  %v562_v58 = vmul.f32 %v6892_v12, %v8564_v31  ;;  %v403_v48 = vpop.xlane.xlu0 %402  ;;  %1669 = vmatprep.mubr.bf16.mxu1 %v9055_v60  ;;  %6901 = vrsqrt.f32 %v492_v7 }
 0x166   :  { %v564_v21 = vmul.f32 %v6894_v14, %v11758_v4  ;;  %v5984_v31 = vcombine.high %v860_v2, %v864_v34  ;;  %6903 = vrsqrt.f32 %v491_v36  ;;  %v461_v12 = vmul.f32 0.00390625, %v403_v48 }
 0x167   :  { %v638_v54 = vmul.f32 %v8747_v50, %v562_v58  ;;  %v637_v52 = vmul.f32 %v8759_v24, %v561_v16  ;;  %v712_v7 = vadd.f32 %v8750_v51, %v636_v35  ;;  %v494_v62 = vadd.f32 1e-05, %v462_v8  ;;  %v412_v16 = vpop.xlane.xlu1 %411  ;;  %v11760_v35 = vld [vmem:[#allocation24_spill] sm:$0xff] }
 0x168   :  { %1805 = vmatpush1.bf16.msra.mxu1 %v5967_v32  ;;  %v6896_v56 = vpop.eup %6895  ;;  %v640_v10 = vmul.f32 %v8747_v50, %v564_v21  ;;  %v711_v36 = vadd.f32 %v8772_v3, %v635_v33  ;;  %v563_v4 = vmul.f32 %v6894_v14, %v11760_v35  ;;  %v464_v33 = vmul.f32 0.00390625, %v412_v16 }
 0x169   :  { %1806 = vmatprep.subr.bf16.mxu1 %v5976_v0  ;;  %1670 = vmatmul.mubr.bf16.gmra.mrb[16].mxu1 %v9057_v47  ;;  %v6898_v23 = vpop.eup %6897  ;;  %v566_v30 = vmul.f32 %v6896_v56, %v8602_v19  ;;  %v714_v44 = vadd.f32 %v8750_v51, %v638_v54  ;;  %v565_v32 = vmul.f32 %v6896_v56, %v8599_v15  ;;  %v493_v54 = vadd.f32 1e-05, %v461_v12  ;;  %v409_v8 = vpop.xlane.xlu0 %408 }
 0x16a   :  { %v5983_v0 = vcombine.low %v860_v2, %v864_v34  ;;  %v713_v48 = vadd.f32 %v8772_v3, %v637_v52  ;;  %v568_v21 = vmul.f32 %v6898_v23, %v8612_v38  ;;  %v716_v34 = vadd.f32 %v8750_v51, %v640_v10 }
 0x16b   :  { %v9079_v58 = vpack.c.bf16 %v714_v44, %v712_v7  ;;  %v642_v19 = vmul.f32 %v8747_v50, %v566_v30  ;;  %6905 = vrsqrt.f32 %v494_v62  ;;  %v641_v52 = vmul.f32 %v8759_v24, %v565_v32 }
 0x16c   :  { %1807 = vmatpush1.bf16.msra.mxu1 %v5975_v13  ;;  %v6900_v63 = vpop.eup %6899  ;;  %v9088_v2 = vpack.c.bf16 %v713_v48, %v711_v36  ;;  %6907 = vrsqrt.f32 %v493_v54  ;;  %v639_v56 = vmul.f32 %v8759_v24, %v563_v4  ;;  %v644_v12 = vmul.f32 %v8747_v50, %v568_v21  ;;  %v880_v4 = vld [vmem:[%s11602_s3 + $0x2e8] sm:$0xff] }
 0x16d   :  { %11759 = vst [vmem:[#allocation6_spill] sm:$0xff] %v9079_v58  ;;  %1808 = vmatprep.subr.bf16.mxu1 %v5984_v31  ;;  %v570_v15 = vmul.f32 %v6900_v63, %v8626_v22  ;;  %1679 = vmatprep.mubr.bf16.mxu1 %v9079_v58  ;;  %v718_v13 = vadd.f32 %v8750_v51, %v642_v19  ;;  %v463_v22 = vmul.f32 0.00390625, %v409_v8  ;;  %v496_v44 = vadd.f32 1e-05, %v464_v33  ;;  %v888_v33 = vld [vmem:[%s11602_s3 + $0x328] sm:$0xff] }
 0x16e   :  { %11761 = vst [vmem:[#allocation7_spill] sm:$0xff] %v9088_v2  ;;  %v569_v7 = vmul.f32 %v6900_v63, %v8623_v37  ;;  %v717_v10 = vadd.f32 %v8772_v3, %v641_v52  ;;  %v715_v36 = vadd.f32 %v8772_v3, %v639_v56  ;;  %v720_v19 = vadd.f32 %v8750_v51, %v644_v12  ;;  %v868_v37 = vld [vmem:[%s11602_s3 + $0x288] sm:$0xff] }
 0x16f   :  { %v9093_v14 = vpack.c.bf16 %v718_v13, %v716_v34  ;;  %v646_v38 = vmul.f32 %v8747_v50, %v570_v15  ;;  %v6902_v31 = vpop.eup %6901  ;;  %v495_v16 = vadd.f32 1e-05, %v463_v22  ;;  %v872_v63 = vld [vmem:[%s11602_s3 + $0x2a8] sm:$0xff]  ;;  %6909 = vrsqrt.f32 %v496_v44 }
 0x170   :  { %1809 = vmatpush1.bf16.msra.mxu1 %v5983_v0  ;;  %v6904_v30 = vpop.eup %6903  ;;  %v574_v32 = vmul.f32 %v6902_v31, %v8648_v41  ;;  %v567_v0 = vmul.f32 %v6898_v23, %v8605_v26  ;;  %v9114_v41 = vpack.c.bf16 %v717_v10, %v715_v36  ;;  %v645_v26 = vmul.f32 %v8759_v24, %v569_v7  ;;  %v884_v13 = vld [vmem:[%s11602_s3 + $0x308] sm:$0xff] }
 0x171   :  { %11762 = vst [vmem:[#allocation8_spill] sm:$0xff] %v9093_v14  ;;  %1680 = vmatmul.mubr.bf16.gmra.mrb[20].mxu1 %v9088_v2  ;;  %v722_v62 = vadd.f32 %v8750_v51, %v646_v38  ;;  %v572_v48 = vmul.f32 %v6904_v30, %v8638_v17  ;;  %v876_v17 = vld [vmem:[%s11602_s3 + $0x2c8] sm:$0xff]  ;;  %6911 = vrsqrt.f32 %v495_v16  ;;  %v5991_v15 = vcombine.low %v868_v37, %v872_v63 }
 0x172   :  { %1689 = vmatprep.mubr.bf16.mxu1 %v9093_v14  ;;  %11763 = vst [vmem:[#allocation9_spill] sm:$0xff] %v9114_v41  ;;  %v650_v35 = vmul.f32 %v8747_v50, %v574_v32  ;;  %v643_v54 = vmul.f32 %v8759_v24, %v567_v0  ;;  %v5992_v8 = vcombine.high %v868_v37, %v872_v63  ;;  %v6677_v12 = vld [vmem:[%s11605_s5 + $0x4] ss:$8 sps:$4 sm:$0xff]  }
 0x173   :  { %v9117_v23 = vpack.c.bf16 %v722_v62, %v720_v19  ;;  %v648_v34 = vmul.f32 %v8747_v50, %v572_v48  ;;  %v573_v38 = vmul.f32 %v6902_v31, %v8645_v40  ;;  %v721_v22 = vadd.f32 %v8772_v3, %v645_v26  ;;  %v892_v32 = vld [vmem:[%s11602_s3 + $0x348] sm:$0xff]  ;;  %5069 = vmatprep.subr.bf16.mxu0 %v6677_v12 }
 0x174   :  { %1810 = vmatprep.subr.bf16.mxu1 %v5992_v8  ;;  %v6000_v56 = vcombine.high %v876_v17, %v880_v4  ;;  %v726_v44 = vadd.f32 %v8750_v51, %v650_v35  ;;  %v5999_v10 = vcombine.low %v876_v17, %v880_v4  ;;  %v896_v40 = vld [vmem:[%s11602_s3 + $0x368] sm:$0xff]  ;;  %v571_v31 = vmul.f32 %v6904_v30, %v8635_v45 }
 0x175   :  { %11764 = vst [vmem:[#allocation10_spill] sm:$0xff] %v9117_v23  ;;  %v6906_v21 = vpop.eup %6905  ;;  %1811 = vmatpush1.bf16.msra.mxu1 %v5991_v15  ;;  %v719_v62 = vadd.f32 %v8772_v3, %v643_v54  ;;  %v6008_v0 = vcombine.high %v884_v13, %v888_v33  ;;  %v11765_v16 = vld [vmem:[#allocation27_spill] sm:$0xff]  ;;  %v724_v36 = vadd.f32 %v8750_v51, %v648_v34  ;;  %v11767_v34 = vld [vmem:[#allocation28_spill] sm:$0xff] }
 0x176   :  { %v6908_v52 = vpop.eup %6907  ;;  %v578_v7 = vmul.f32 %v6906_v21, %v8670_v25  ;;  %1812 = vmatprep.subr.bf16.mxu1 %v6000_v56  ;;  %v649_v19 = vmul.f32 %v8759_v24, %v573_v38  ;;  %v6007_v26 = vcombine.low %v884_v13, %v888_v33  ;;  %v647_v30 = vmul.f32 %v8759_v24, %v571_v31  ;;  %v900_v17 = vld [vmem:[%s11602_s3 + $0x388] sm:$0xff]  ;;  %v6680_v38 = vld [vmem:[%s11605_s5 + $0x14] ss:$8 sps:$4 sm:$0xff]   ;;  %v11768_v56 = vld [vmem:[#allocation26_spill] sm:$0xff] }
 0x177   :  { %v576_v25 = vmul.f32 %v6908_v52, %v11765_v16  ;;  %v9153_v48 = vpack.c.bf16 %v721_v22, %v719_v62  ;;  %v9156_v37 = vpack.c.bf16 %v726_v44, %v724_v36  ;;  %v6016_v35 = vcombine.high %v892_v32, %v896_v40  ;;  %v904_v4 = vld [vmem:[%s11602_s3 + $0x3a8] sm:$0xff]  ;;  %v6682_v22 = vld [vmem:[%s11605_s5 + $0x10] ss:$8 sps:$4 sm:$0xff]  }
 0x178   :  { %v654_v63 = vmul.f32 %v8747_v50, %v578_v7  ;;  %v6679_v54 = vld [vmem:[%s11605_s5] ss:$8 sps:$4 sm:$0xff]   ;;  %v577_v13 = vmul.f32 %v6906_v21, %v11767_v34  ;;  %v725_v33 = vadd.f32 %v8772_v3, %v649_v19  ;;  %v575_v12 = vmul.f32 %v6908_v52, %v11768_v56  ;;  %v11769_v7 = vld [vmem:[#allocation32_spill] sm:$0xff] }
 0x179   :  { %1690 = vmatmul.mubr.bf16.gmra.mrb[24].mxu1 %v9114_v41  ;;  %11766 = vst [vmem:[#allocation11_spill] sm:$0xff] %v9156_v37  ;;  %v6910_v45 = vpop.eup %6909  ;;  %v652_v15 = vmul.f32 %v8747_v50, %v576_v25  ;;  %5070 = vmatpush1.bf16.msra.mxu0 %v6679_v54  ;;  %v6015_v31 = vcombine.low %v892_v32, %v896_v40  ;;  %v908_v21 = vld [vmem:[%s11602_s3 + $0x3c8] sm:$0xff]  ;;  %v9195_v52 = vld [vmem:[%s11602_s3 + $0x10] sm:$0xff]  ;;  %v11770_v19 = vld [vmem:[#allocation30_spill] sm:$0xff] }
 0x17a   :  { %1699 = vmatprep.mubr.bf16.mxu1 %v9117_v23  ;;  %1813 = vmatpush1.bf16.msra.mxu1 %v5999_v10  ;;  %v582_v44 = vmul.f32 %v6910_v45, %v11769_v7  ;;  %v730_v10 = vadd.f32 %v8750_v51, %v654_v63  ;;  %v912_v62 = vld [vmem:[%s11602_s3 + $0x3e8] sm:$0xff]  ;;  %v9200_v32 = vld [vmem:[%s11602_s3 + $0x30] sm:$0xff]  ;;  %v723_v40 = vadd.f32 %v8772_v3, %v647_v30 }
 0x17b   :  { %1814 = vmatprep.subr.bf16.mxu1 %v6008_v0  ;;  %v6912_v8 = vpop.eup %6911  ;;  %v6683_v0 = vld [vmem:[%s11605_s5 + $0x24] ss:$8 sps:$4 sm:$0xff]   ;;  %v6024_v16 = vcombine.high %v900_v17, %v904_v4  ;;  %5071 = vmatprep.subr.bf16.mxu0 %v6680_v38  ;;  %v5913_v25 = vcombine.low %v9195_v52, %v9200_v32  ;;  %v6685_v36 = vld [vmem:[%s11605_s5 + $0x20] ss:$8 sps:$4 sm:$0xff]   ;;  %v653_v34 = vmul.f32 %v8759_v24, %v577_v13 }
 0x17c   :  { %v580_v63 = vmul.f32 %v6912_v8, %v11770_v19  ;;  %v9210_v54 = vpack.c.bf16 %v725_v33, %v723_v40  ;;  %v6023_v38 = vcombine.low %v900_v17, %v904_v4  ;;  %v651_v56 = vmul.f32 %v8759_v24, %v575_v12  ;;  %v11773_v33 = vld [vmem:[#allocation31_spill] sm:$0xff]  ;;  %v6686_v17 = vld [vmem:[%s11605_s5 + $0x34] ss:$8 sps:$4 sm:$0xff]   ;;  %v6688_v4 = vld [vmem:[%s11605_s5 + $0x30] ss:$8 sps:$4 sm:$0xff]  }
 0x17d   :  { %5072 = vmatpush1.bf16.msra.mxu0 %v6682_v22  ;;  %v6032_v7 = vcombine.high %v908_v21, %v912_v62  ;;  %v581_v13 = vmul.f32 %v6910_v45, %v11773_v33  ;;  %v729_v22 = vadd.f32 %v8772_v3, %v653_v34  ;;  %v11774_v45 = vld [vmem:[#allocation29_spill] sm:$0xff]  ;;  %v5914_v40 = vcombine.high %v9195_v52, %v9200_v32  ;;  %v6727_v52 = vld [vmem:[%s11605_s5 + $0x104] ss:$8 sps:$4 sm:$0xff]  }
 0x17e   :  { %1815 = vmatpush1.bf16.msra.mxu1 %v6007_v26  ;;  %v728_v26 = vadd.f32 %v8750_v51, %v652_v15  ;;  %11771 = vst [vmem:[#allocation14_spill] sm:$0xff] %v9210_v54  ;;  %5073 = vmatprep.subr.bf16.mxu0 %v6683_v0  ;;  %v656_v15 = vmul.f32 %v8747_v50, %v580_v63  ;;  %v6694_v34 = vld [vmem:[%s11605_s5 + $0x50] ss:$8 sps:$4 sm:$0xff]  }
 0x17f   :  { %1816 = vmatprep.subr.bf16.mxu1 %v6016_v35  ;;  %v658_v35 = vmul.f32 %v8747_v50, %v582_v44  ;;  %v6031_v44 = vcombine.low %v908_v21, %v912_v62  ;;  %v727_v0 = vadd.f32 %v8772_v3, %v651_v56  ;;  %v657_v62 = vmul.f32 %v8759_v24, %v581_v13  ;;  %v6697_v56 = vld [vmem:[%s11605_s5 + $0x60] ss:$8 sps:$4 sm:$0xff]   ;;  %v6700_v33 = vld [vmem:[%s11605_s5 + $0x70] ss:$8 sps:$4 sm:$0xff]   ;;  %v6701_v13 = vld [vmem:[%s11605_s5 + $0x84] ss:$8 sps:$4 sm:$0xff]  }
 0x180   :  { %v9213_v30 = vpack.c.bf16 %v730_v10, %v728_v26  ;;  %v6689_v10 = vld [vmem:[%s11605_s5 + $0x44] ss:$8 sps:$4 sm:$0xff]   ;;  %v6692_v26 = vld [vmem:[%s11605_s5 + $0x54] ss:$8 sps:$4 sm:$0xff]  }
 0x181   :  { %1700 = vmatmul.mubr.bf16.gmra.mrb[28].mxu1 %v9153_v48  ;;  %5074 = vmatpush1.bf16.msra.mxu0 %v6685_v36  ;;  %v734_v12 = vadd.f32 %v8750_v51, %v658_v35  ;;  %v732_v36 = vadd.f32 %v8750_v51, %v656_v15  ;;  %v9240_v21 = vpack.c.bf16 %v729_v22, %v727_v0  ;;  %v6695_v35 = vld [vmem:[%s11605_s5 + $0x64] ss:$8 sps:$4 sm:$0xff]   ;;  %v6698_v15 = vld [vmem:[%s11605_s5 + $0x74] ss:$8 sps:$4 sm:$0xff]   ;;  %v6703_v22 = vld [vmem:[%s11605_s5 + $0x80] ss:$8 sps:$4 sm:$0xff]  }
 0x182   :  { %1709 = vmatprep.mubr.bf16.mxu1 %v9156_v37  ;;  %11772 = vst [vmem:[#allocation15_spill] sm:$0xff] %v9213_v30  ;;  %1817 = vmatpush1.bf16.msra.mxu1 %v6015_v31  ;;  %v579_v31 = vmul.f32 %v6912_v8, %v11774_v45  ;;  %v733_v63 = vadd.f32 %v8772_v3, %v657_v62  ;;  %v6712_v45 = vld [vmem:[%s11605_s5 + $0xb0] ss:$8 sps:$4 sm:$0xff]   ;;  %v6715_v0 = vld [vmem:[%s11605_s5 + $0xc0] ss:$8 sps:$4 sm:$0xff]  }
 0x183   :  { %1818 = vmatprep.subr.bf16.mxu1 %v6024_v16  ;;  %5075 = vmatprep.subr.bf16.mxu0 %v6686_v17  ;;  %v6691_v16 = vld [vmem:[%s11605_s5 + $0x40] ss:$8 sps:$4 sm:$0xff]   ;;  %11775 = vst [vmem:[#allocation16_spill] sm:$0xff] %v9240_v21  ;;  %v9243_v19 = vpack.c.bf16 %v734_v12, %v732_v36  ;;  %v6704_v17 = vld [vmem:[%s11605_s5 + $0x94] ss:$8 sps:$4 sm:$0xff]  }
 0x184   :  { %v655_v8 = vmul.f32 %v8759_v24, %v579_v31  ;;  %v6707_v12 = vld [vmem:[%s11605_s5 + $0xa4] ss:$8 sps:$4 sm:$0xff]   ;;  %v6721_v62 = vld [vmem:[%s11605_s5 + $0xe0] ss:$8 sps:$4 sm:$0xff]   ;;  %v9439_v32 = vld [vmem:[%s11602_s3 + $0x18] sm:$0xff] }
 0x185   :  { %5076 = vmatpush1.bf16.msra.mxu0 %v6688_v4  ;;  %11776 = vst [vmem:[#allocation17_spill] sm:$0xff] %v9243_v19  ;;  %v6706_v4 = vld [vmem:[%s11605_s5 + $0x90] ss:$8 sps:$4 sm:$0xff]   ;;  %v6713_v31 = vld [vmem:[%s11605_s5 + $0xc4] ss:$8 sps:$4 sm:$0xff]  }
 0x186   :  { %1819 = vmatpush1.bf16.msra.mxu1 %v6023_v38  ;;  %5077 = vmatprep.subr.bf16.mxu0 %v6689_v10  ;;  %v731_v38 = vadd.f32 %v8772_v3, %v655_v8  ;;  %v6710_v10 = vld [vmem:[%s11605_s5 + $0xb4] ss:$8 sps:$4 sm:$0xff]   ;;  %v6719_v36 = vld [vmem:[%s11605_s5 + $0xe4] ss:$8 sps:$4 sm:$0xff]  }
 0x187   :  { %1820 = vmatprep.subr.bf16.mxu1 %v6032_v7  ;;  %v6722_v8 = vld [vmem:[%s11605_s5 + $0xf4] ss:$8 sps:$4 sm:$0xff]  }
 0x188   :  { %v9262_v7 = vpack.c.bf16 %v733_v63, %v731_v38  ;;  %v6724_v63 = vld [vmem:[%s11605_s5 + $0xf0] ss:$8 sps:$4 sm:$0xff]  }
 0x189   :  { %1710 = vmatmul.mubr.bf16.gmra.mrb[32].mxu1 %v9210_v54  ;;  %5078 = vmatpush1.bf16.msra.mxu0 %v6691_v16  ;;  %v6718_v16 = vld [vmem:[%s11605_s5 + $0xd0] ss:$8 sps:$4 sm:$0xff]  }
 0x18a   :  { %1719 = vmatprep.mubr.bf16.mxu1 %v9213_v30  ;;  %1821 = vmatpush1.bf16.msra.mxu1 %v6031_v44  ;;  %11777 = vst [vmem:[#allocation19_spill] sm:$0xff] %v9262_v7  ;;  %v6709_v44 = vld [vmem:[%s11605_s5 + $0xa0] ss:$8 sps:$4 sm:$0xff]  }
 0x18b   :  { %1983 = vmatprep.subr.bf16.mxu1 %v5914_v40  ;;  %5079 = vmatprep.subr.bf16.mxu0 %v6692_v26  ;;  %v6716_v40 = vld [vmem:[%s11605_s5 + $0xd4] ss:$8 sps:$4 sm:$0xff]  }
 0x18d   :  { %5080 = vmatpush1.bf16.msra.mxu0 %v6694_v34 }
 0x18e   :  { %5081 = vmatprep.subr.bf16.mxu0 %v6695_v35 }
 0x191   :  { %1720 = vmatmul.mubr.bf16.gmra.mrb[36].mxu1 %v9240_v21  ;;  %5082 = vmatpush1.bf16.msra.mxu0 %v6697_v56 }
 0x192   :  { %1729 = vmatprep.mubr.bf16.mxu1 %v9243_v19  ;;  %5083 = vmatprep.subr.bf16.mxu0 %v6698_v15 }
 0x195   :  { %5084 = vmatpush1.bf16.msra.mxu0 %v6700_v33 }
 0x196   :  { %5085 = vmatprep.subr.bf16.mxu0 %v6701_v13 }
 0x199   :  { %1730 = vmatmul.mubr.bf16.gmra.mrb[40].mxu1 %v9262_v7  ;;  %5086 = vmatpush1.bf16.msra.mxu0 %v6703_v22 }
 0x19a   :  { %5087 = vmatprep.subr.bf16.mxu0 %v6704_v17 }
 0x19d   :  { %5088 = vmatpush1.bf16.msra.mxu0 %v6706_v4 }
 0x19e   :  { %5089 = vmatprep.subr.bf16.mxu0 %v6707_v12 }
 0x1a1   :  { %5090 = vmatpush1.bf16.msra.mxu0 %v6709_v44 }
 0x1a2   :  { %5091 = vmatprep.subr.bf16.mxu0 %v6710_v10  ;;  %v11778_v10 = vld [vmem:[#allocation35_spill] sm:$0xff] }
 0x1a5   :  { %5092 = vmatpush1.bf16.msra.mxu0 %v6712_v45 }
 0x1a6   :  { %5093 = vmatprep.subr.bf16.mxu0 %v6713_v31  ;;  %v11779_v31 = vld [vmem:[#allocation36_spill] sm:$0xff] }
 0x1a9   :  { %5094 = vmatpush1.bf16.msra.mxu0 %v6715_v0 }
 0x1aa   :  { %5095 = vmatprep.subr.bf16.mxu0 %v6716_v40 }
 0x1ad   :  { %5096 = vmatpush1.bf16.msra.mxu0 %v6718_v16 }
 0x1ae   :  { %5097 = vmatprep.subr.bf16.mxu0 %v6719_v36 }
 0x1b1   :  { %5098 = vmatpush1.bf16.msra.mxu0 %v6721_v62 }
 0x1b2   :  { %5099 = vmatprep.subr.bf16.mxu0 %v6722_v8 }
 0x1b5   :  { %5100 = vmatpush1.bf16.msra.mxu0 %v6724_v63 }
 0x1b6   :  { %5262 = vmatprep.subr.bf16.mxu0 %v6727_v52 }
 0x1c2   :  { %v415_v26 = vpop.xlane.xlu0 %414 }
 0x1c3   :  { %v465_v34 = vmul.f32 0.00390625, %v415_v26  ;;  %v11780_v26 = vld [vmem:[#allocation38_spill] sm:$0xff] }
 0x1c5   :  { %v497_v35 = vadd.f32 1e-05, %v465_v34 }
 0x1c6   :  { %v418_v38 = vpop.xlane.xlu1 %417 }
 0x1c7   :  { %6913 = vrsqrt.f32 %v497_v35  ;;  %v466_v56 = vmul.f32 0.00390625, %v418_v38  ;;  %v11781_v35 = vld [vmem:[#allocation39_spill] sm:$0xff] }
 0x1c9   :  { %v498_v15 = vadd.f32 1e-05, %v466_v56 }
 0x1ca   :  { %v421_v33 = vpop.xlane.xlu0 %420 }
 0x1cb   :  { %6915 = vrsqrt.f32 %v498_v15  ;;  %v467_v13 = vmul.f32 0.00390625, %v421_v33 }
 0x1cd   :  { %v499_v22 = vadd.f32 1e-05, %v467_v13 }
 0x1ce   :  { %v424_v17 = vpop.xlane.xlu1 %423 }
 0x1cf   :  { %6917 = vrsqrt.f32 %v499_v22  ;;  %v468_v4 = vmul.f32 0.00390625, %v424_v17 }
 0x1d1   :  { %v6914_v12 = vpop.eup %6913  ;;  %v500_v44 = vadd.f32 1e-05, %v468_v4 }
 0x1d2   :  { %v583_v45 = vmul.f32 %v6914_v12, %v11778_v10  ;;  %v584_v0 = vmul.f32 %v6914_v12, %v11779_v31  ;;  %v427_v40 = vpop.xlane.xlu0 %426 }
 0x1d3   :  { %6919 = vrsqrt.f32 %v500_v44  ;;  %v469_v16 = vmul.f32 0.00390625, %v427_v40  ;;  %v11782_v44 = vld [vmem:[#allocation40_spill] sm:$0xff] }
 0x1d4   :  { %v660_v8 = vmul.f32 %v8747_v50, %v584_v0  ;;  %v659_v63 = vmul.f32 %v8759_v24, %v583_v45  ;;  %v11783_v45 = vld [vmem:[#allocation41_spill] sm:$0xff] }
 0x1d5   :  { %v6916_v36 = vpop.eup %6915  ;;  %v501_v62 = vadd.f32 1e-05, %v469_v16 }
 0x1d6   :  { %v585_v34 = vmul.f32 %v6916_v36, %v11780_v26  ;;  %v586_v38 = vmul.f32 %v6916_v36, %v11781_v35  ;;  %v430_v56 = vpop.xlane.xlu1 %429  ;;  %v736_v4 = vadd.f32 %v8750_v51, %v660_v8  ;;  %v735_v12 = vadd.f32 %v8772_v3, %v659_v63 }
 0x1d7   :  { %6921 = vrsqrt.f32 %v501_v62  ;;  %v470_v15 = vmul.f32 0.00390625, %v430_v56 }
 0x1d8   :  { %v662_v33 = vmul.f32 %v8747_v50, %v586_v38  ;;  %v661_v13 = vmul.f32 %v8759_v24, %v585_v34  ;;  %v11785_v38 = vld [vmem:[#allocation12_spill] sm:$0xff] }
 0x1d9   :  { %v6918_v22 = vpop.eup %6917  ;;  %v502_v17 = vadd.f32 1e-05, %v470_v15  ;;  %v11786_v15 = vld [vmem:[#allocation13_spill] sm:$0xff] }
 0x1da   :  { %v587_v10 = vmul.f32 %v6918_v22, %v11782_v44  ;;  %v588_v31 = vmul.f32 %v6918_v22, %v11783_v45  ;;  %v738_v40 = vadd.f32 %v8750_v51, %v662_v33  ;;  %v737_v16 = vadd.f32 %v8772_v3, %v661_v13 }
 0x1db   :  { %v433_v0 = vpop.xlane.xlu0 %432  ;;  %6923 = vrsqrt.f32 %v502_v17 }
 0x1dc   :  { %v471_v36 = vmul.f32 0.00390625, %v433_v0  ;;  %v9333_v62 = vpack.c.bf16 %v738_v40, %v736_v4  ;;  %v9335_v26 = vpack.c.bf16 %v737_v16, %v735_v12  ;;  %v664_v8 = vmul.f32 %v8747_v50, %v588_v31 }
 0x1dd   :  { %v6920_v34 = vpop.eup %6919  ;;  %v663_v63 = vmul.f32 %v8759_v24, %v587_v10 }
 0x1de   :  { %11784 = vst [vmem:[#allocation18_spill] sm:$0xff] %v9333_v62  ;;  %v503_v35 = vadd.f32 1e-05, %v471_v36  ;;  %v589_v56 = vmul.f32 %v6920_v34, %v11785_v38  ;;  %v590_v22 = vmul.f32 %v6920_v34, %v11786_v15  ;;  %1739 = vmatprep.mubr.bf16.mxu1 %v9333_v62  ;;  %v740_v45 = vadd.f32 %v8750_v51, %v664_v8 }
 0x1df   :  { %v436_v44 = vpop.xlane.xlu1 %435  ;;  %1740 = vmatmul.mubr.bf16.gmra.mrb[44].mxu1 %v9335_v26  ;;  %v739_v10 = vadd.f32 %v8772_v3, %v663_v63 }
 0x1e0   :  { %6925 = vrsqrt.f32 %v503_v35  ;;  %v472_v33 = vmul.f32 0.00390625, %v436_v44  ;;  %v666_v13 = vmul.f32 %v8747_v50, %v590_v22  ;;  %v665_v17 = vmul.f32 %v8759_v24, %v589_v56 }
 0x1e1   :  { %v6922_v4 = vpop.eup %6921 }
 0x1e2   :  { %v504_v12 = vadd.f32 1e-05, %v472_v33  ;;  %v591_v31 = vmul.f32 %v6922_v4, %v8858_v11  ;;  %v592_v0 = vmul.f32 %v6922_v4, %v8861_v49  ;;  %v742_v16 = vadd.f32 %v8750_v51, %v666_v13 }
 0x1e3   :  { %v741_v36 = vadd.f32 %v8772_v3, %v665_v17 }
 0x1e4   :  { %v439_v40 = vpop.xlane.xlu0 %438  ;;  %6927 = vrsqrt.f32 %v504_v12  ;;  %v9351_v35 = vpack.c.bf16 %v742_v16, %v740_v45  ;;  %v668_v8 = vmul.f32 %v8747_v50, %v592_v0  ;;  %v667_v63 = vmul.f32 %v8759_v24, %v591_v31 }
 0x1e5   :  { %v473_v34 = vmul.f32 0.00390625, %v439_v40  ;;  %v9353_v38 = vpack.c.bf16 %v741_v36, %v739_v10  ;;  %v6924_v56 = vpop.eup %6923 }
 0x1e6   :  { %v593_v11 = vmul.f32 %v6924_v56, %v8876_v55  ;;  %v594_v49 = vmul.f32 %v6924_v56, %v8879_v28  ;;  %1749 = vmatprep.mubr.bf16.mxu1 %v9351_v35  ;;  %v744_v12 = vadd.f32 %v8750_v51, %v668_v8  ;;  %v743_v45 = vadd.f32 %v8772_v3, %v667_v63 }
 0x1e7   :  { %v505_v15 = vadd.f32 1e-05, %v473_v34  ;;  %1750 = vmatmul.mubr.bf16.gmra.mrb[48].mxu1 %v9353_v38 }
 0x1e8   :  { %v442_v22 = vpop.xlane.xlu1 %441  ;;  %v670_v33 = vmul.f32 %v8747_v50, %v594_v49  ;;  %v669_v13 = vmul.f32 %v8759_v24, %v593_v11 }
 0x1e9   :  { %6929 = vrsqrt.f32 %v505_v15  ;;  %v474_v44 = vmul.f32 0.00390625, %v442_v22 }
 0x1ea   :  { %v6926_v17 = vpop.eup %6925  ;;  %v746_v10 = vadd.f32 %v8750_v51, %v670_v33  ;;  %v745_v31 = vadd.f32 %v8772_v3, %v669_v13 }
 0x1eb   :  { %v506_v4 = vadd.f32 1e-05, %v474_v44  ;;  %v595_v55 = vmul.f32 %v6926_v17, %v8897_v53  ;;  %v596_v28 = vmul.f32 %v6926_v17, %v8900_v42 }
 0x1ec   :  { %v9369_v0 = vpack.c.bf16 %v746_v10, %v744_v12  ;;  %v9371_v40 = vpack.c.bf16 %v745_v31, %v743_v45 }
 0x1ed   :  { %6931 = vrsqrt.f32 %v506_v4  ;;  %v672_v36 = vmul.f32 %v8747_v50, %v596_v28  ;;  %v671_v34 = vmul.f32 %v8759_v24, %v595_v55 }
 0x1ee   :  { %v6928_v16 = vpop.eup %6927  ;;  %1759 = vmatprep.mubr.bf16.mxu1 %v9369_v0 }
 0x1ef   :  { %v597_v56 = vmul.f32 %v6928_v16, %v8921_v59  ;;  %v598_v53 = vmul.f32 %v6928_v16, %v8924_v61  ;;  %1760 = vmatmul.mubr.bf16.gmra.mrb[52].mxu1 %v9371_v40  ;;  %v748_v63 = vadd.f32 %v8750_v51, %v672_v36  ;;  %v747_v11 = vadd.f32 %v8772_v3, %v671_v34  ;;  %v809_v16 = vld [vmem:[%s11602_s3 + $0xb0] sm:$0xff] }
 0x1f1   :  { %v674_v42 = vmul.f32 %v8747_v50, %v598_v53  ;;  %v673_v15 = vmul.f32 %v8759_v24, %v597_v56  ;;  %v813_v56 = vld [vmem:[%s11602_s3 + $0xd0] sm:$0xff] }
 0x1f2   :  { %v817_v53 = vld [vmem:[%s11602_s3 + $0xf0] sm:$0xff] }
 0x1f3   :  { %v6930_v8 = vpop.eup %6929  ;;  %v750_v59 = vadd.f32 %v8750_v51, %v674_v42  ;;  %v749_v61 = vadd.f32 %v8772_v3, %v673_v15  ;;  %v5938_v15 = vcombine.high %v813_v56, %v817_v53 }
 0x1f4   :  { %v599_v49 = vmul.f32 %v6930_v8, %v8946_v46  ;;  %v600_v22 = vmul.f32 %v6930_v8, %v8949_v5  ;;  %v825_v8 = vld [vmem:[%s11602_s3 + $0x130] sm:$0xff] }
 0x1f5   :  { %v9387_v44 = vpack.c.bf16 %v750_v59, %v748_v63  ;;  %v9389_v33 = vpack.c.bf16 %v749_v61, %v747_v11  ;;  %v9450_v63 = vld [vmem:[%s11602_s3 + $0x38] sm:$0xff]  ;;  %v829_v61 = vld [vmem:[%s11602_s3 + $0x150] sm:$0xff] }
 0x1f6   :  { %v676_v12 = vmul.f32 %v8747_v50, %v600_v22  ;;  %v675_v46 = vmul.f32 %v8759_v24, %v599_v49  ;;  %v5937_v49 = vcombine.low %v813_v56, %v817_v53  ;;  %v915_v22 = vld [vmem:[%s11606_s4] sm:$0xff]  ;;  %v845_v53 = vld [vmem:[%s11602_s3 + $0x1d0] sm:$0xff] }
 0x1f7   :  { %v6932_v13 = vpop.eup %6931  ;;  %1769 = vmatprep.mubr.bf16.mxu1 %v9387_v44 }
 0x1f8   :  { %v601_v17 = vmul.f32 %v6932_v13, %v8970_v1  ;;  %v602_v4 = vmul.f32 %v6932_v13, %v8973_v20  ;;  %1770 = vmatmul.mubr.bf16.gmra.mrb[56].mxu1 %v9389_v33  ;;  %v752_v55 = vadd.f32 %v8750_v51, %v676_v12  ;;  %v751_v1 = vadd.f32 %v8772_v3, %v675_v46  ;;  %v833_v13 = vld [vmem:[%s11602_s3 + $0x170] sm:$0xff]  ;;  %v11788_v46 = vld [vmem:[#allocation34_spill] sm:$0xff] }
 0x1fa   :  { %v678_v5 = vmul.f32 %v8747_v50, %v602_v4  ;;  %v677_v45 = vmul.f32 %v8759_v24, %v601_v17  ;;  %v797_v50 = vld [vmem:[%s11602_s3 + $0x50] sm:$0xff]  ;;  %v11787_v17 = vld [vmem:[#allocation37_spill] sm:$0xff] }
 0x1fb   :  { %v9466_v4 = vrot.slane %v915_v22, %v11787_v17 }
 0x1fc   :  { %v754_v28 = vadd.f32 %v8750_v51, %v678_v5  ;;  %v753_v20 = vadd.f32 %v8772_v3, %v677_v45  ;;  %v801_v51 = vld [vmem:[%s11602_s3 + $0x70] sm:$0xff]  ;;  %v9469_v5 = vrot.slane %v915_v22, %v11788_v46  ;;  %v5954_v45 = vcombine.high %v829_v61, %v833_v13 }
 0x1fd   :  { %v5922_v24 = vcombine.high %v797_v50, %v801_v51  ;;  %v805_v3 = vld [vmem:[%s11602_s3 + $0x90] sm:$0xff]  ;;  %v5921_v36 = vcombine.low %v797_v50, %v801_v51  ;;  %v5953_v51 = vcombine.low %v829_v61, %v833_v13 }
 0x1fe   :  { %v9403_v10 = vpack.c.bf16 %v754_v28, %v752_v55  ;;  %v9405_v31 = vpack.c.bf16 %v753_v20, %v751_v1  ;;  %v5930_v34 = vcombine.high %v805_v3, %v809_v16  ;;  %v5929_v42 = vcombine.low %v805_v3, %v809_v16  ;;  %v837_v55 = vld [vmem:[%s11602_s3 + $0x190] sm:$0xff] }
 0x1ff   :  { %v841_v28 = vld [vmem:[%s11602_s3 + $0x1b0] sm:$0xff] }
 0x200   :  { %1779 = vmatprep.mubr.bf16.mxu1 %v9403_v10  ;;  %v5962_v16 = vcombine.high %v837_v55, %v841_v28  ;;  %v857_v61 = vld [vmem:[%s11602_s3 + $0x230] sm:$0xff] }
 0x201   :  { %1780 = vmatmul.mubr.bf16.gmra.mrb[60].mxu1 %v9405_v31 }
 0x202   :  { %1822 = vmatprep.mubr.bf16.mxu1 %v8868_v18 }
 0x209   :  { %1823 = vmatmul.mubr.bf16.vlgmr.msra.gmra.mrb[64].mxu1 %v8881_v57 }
 0x20a   :  { %1984 = vmatpush1.bf16.msra.mxu1 %v5913_v25  ;;  %1832 = vmatprep.mubr.bf16.mxu1 %v8913_v39  ;;  %v821_v25 = vld [vmem:[%s11602_s3 + $0x110] sm:$0xff] }
 0x20b   :  { %1985 = vmatprep.subr.bf16.mxu1 %v5922_v24  ;;  %v5946_v59 = vcombine.high %v821_v25, %v825_v8  ;;  %v5945_v12 = vcombine.low %v821_v25, %v825_v8  ;;  %v5961_v8 = vcombine.low %v837_v55, %v841_v28 }
 0x20e   :  { %1986 = vmatpush1.bf16.msra.mxu1 %v5921_v36 }
 0x20f   :  { %1987 = vmatprep.subr.bf16.mxu1 %v5930_v34 }
 0x211   :  { %1833 = vmatmul.mubr.bf16.gmra.mrb[68].mxu1 %v8933_v27 }
 0x212   :  { %1842 = vmatprep.mubr.bf16.mxu1 %v8962_v43  ;;  %1988 = vmatpush1.bf16.msra.mxu1 %v5929_v42  ;;  %v849_v42 = vld [vmem:[%s11602_s3 + $0x1f0] sm:$0xff] }
 0x213   :  { %1989 = vmatprep.subr.bf16.mxu1 %v5938_v15  ;;  %v5970_v22 = vcombine.high %v845_v53, %v849_v42 }
 0x216   :  { %1990 = vmatpush1.bf16.msra.mxu1 %v5937_v49 }
 0x217   :  { %1991 = vmatprep.subr.bf16.mxu1 %v5946_v59  ;;  %v1631_v1 = vpop.f32.mrb[0].mxu1  ;;  %v853_v59 = vld [vmem:[%s11602_s3 + $0x210] sm:$0xff] }
 0x218   :  { %v9479_v20 = vadd.f32 %v1631_v1, %v9466_v4  ;;  %v1633_v50 = vpop.f32.mrb[1].mxu1  ;;  %v5978_v28 = vcombine.high %v853_v59, %v857_v61 }
 0x219   :  { %1843 = vmatmul.mubr.bf16.gmra.mrb[72].mxu1 %v8993_v6  ;;  %v9483_v24 = vadd.f32 %v1633_v50, %v9469_v5  ;;  %v1635_v3 = vpop.f32.mrb[2].mxu1 }
 0x21a   :  { %1852 = vmatprep.mubr.bf16.mxu1 %v9018_v29  ;;  %1992 = vmatpush1.bf16.msra.mxu1 %v5945_v12  ;;  %v6037_v36 = vmul.f32 -1.442695, %v9479_v20  ;;  %v9487_v34 = vadd.f32 %v1635_v3, %v9466_v4  ;;  %v1637_v56 = vpop.f32.mrb[3].mxu1  ;;  %v5969_v12 = vcombine.low %v845_v53, %v849_v42  ;;  %v865_v3 = vld [vmem:[%s11602_s3 + $0x270] sm:$0xff] }
 0x21b   :  { %1993 = vmatprep.subr.bf16.mxu1 %v5954_v45  ;;  %v6038_v15 = vmul.f32 -1.442695, %v9483_v24  ;;  %v9497_v52 = vadd.f32 %v1637_v56, %v9469_v5 }
 0x21c   :  { %6933 = vpow2.f32 %v6037_v36  ;;  %v6045_v25 = vmul.f32 -1.442695, %v9487_v34 }
 0x21d   :  { %6935 = vpow2.f32 %v6038_v15  ;;  %v6046_v49 = vmul.f32 -1.442695, %v9497_v52  ;;  %v5977_v15 = vcombine.low %v853_v59, %v857_v61 }
 0x21e   :  { %1994 = vmatpush1.bf16.msra.mxu1 %v5953_v51  ;;  %6937 = vpow2.f32 %v6045_v25  ;;  %v861_v51 = vld [vmem:[%s11602_s3 + $0x250] sm:$0xff] }
 0x21f   :  { %1995 = vmatprep.subr.bf16.mxu1 %v5962_v16  ;;  %6939 = vpow2.f32 %v6046_v49 }
 0x221   :  { %1853 = vmatmul.mubr.bf16.gmra.mrb[76].mxu1 %v9031_v9  ;;  %v1641_v13 = vpop.f32.mrb[4].mxu1 }
 0x222   :  { %1862 = vmatprep.mubr.bf16.mxu1 %v9055_v60  ;;  %1996 = vmatpush1.bf16.msra.mxu1 %v5961_v8  ;;  %v9510_v45 = vadd.f32 %v1641_v13, %v9466_v4  ;;  %v1643_v55 = vpop.f32.mrb[5].mxu1  ;;  %v5986_v8 = vcombine.high %v861_v51, %v865_v3  ;;  %v869_v13 = vld [vmem:[%s11602_s3 + $0x290] sm:$0xff] }
 0x223   :  { %1997 = vmatprep.subr.bf16.mxu1 %v5970_v22  ;;  %v9513_v1 = vadd.f32 %v1643_v55, %v9469_v5  ;;  %v1645_v50 = vpop.f32.mrb[6].mxu1  ;;  %v873_v55 = vld [vmem:[%s11602_s3 + $0x2b0] sm:$0xff] }
 0x224   :  { %v6053_v16 = vmul.f32 -1.442695, %v9510_v45  ;;  %v9523_v36 = vadd.f32 %v1645_v50, %v9466_v4  ;;  %v1647_v56 = vpop.f32.mrb[7].mxu1  ;;  %v5994_v11 = vcombine.high %v869_v13, %v873_v55 }
 0x225   :  { %v6054_v53 = vmul.f32 -1.442695, %v9513_v1  ;;  %v9527_v42 = vadd.f32 %v1647_v56, %v9469_v5 }
 0x226   :  { %1998 = vmatpush1.bf16.msra.mxu1 %v5969_v12  ;;  %6941 = vpow2.f32 %v6053_v16  ;;  %v6061_v25 = vmul.f32 -1.442695, %v9523_v36  ;;  %v6934_v49 = vpop.eup %6933 }
 0x227   :  { %1999 = vmatprep.subr.bf16.mxu1 %v5978_v28  ;;  %6943 = vpow2.f32 %v6054_v53  ;;  %v6062_v22 = vmul.f32 -1.442695, %v9527_v42  ;;  %v6936_v50 = vpop.eup %6935  ;;  %v3137_v12 = vadd.f32 1.0, %v6934_v49  ;;  %v5985_v28 = vcombine.low %v861_v51, %v865_v3  ;;  %v881_v51 = vld [vmem:[%s11602_s3 + $0x2f0] sm:$0xff] }
 0x228   :  { %6945 = vpow2.f32 %v6061_v25  ;;  %v6938_v59 = vpop.eup %6937  ;;  %v3138_v61 = vadd.f32 1.0, %v6936_v50 }
 0x229   :  { %1863 = vmatmul.mubr.bf16.gmra.mrb[80].mxu1 %v9057_v47  ;;  %6947 = vpow2.f32 %v6062_v22  ;;  %v6940_v16 = vpop.eup %6939  ;;  %v3145_v56 = vadd.f32 1.0, %v6938_v59  ;;  %v877_v22 = vld [vmem:[%s11602_s3 + $0x2d0] sm:$0xff]  ;;  %v5993_v59 = vcombine.low %v869_v13, %v873_v55 }
 0x22a   :  { %1872 = vmatprep.mubr.bf16.mxu1 %v9079_v58  ;;  %2000 = vmatpush1.bf16.msra.mxu1 %v5977_v15  ;;  %6949 = vrcp.f32 %v3137_v12  ;;  %v3146_v46 = vadd.f32 1.0, %v6940_v16 }
 0x22b   :  { %v1651_v53 = vpop.f32.mrb[8].mxu1  ;;  %2001 = vmatprep.subr.bf16.mxu1 %v5986_v8  ;;  %6951 = vrcp.f32 %v3138_v61 }
 0x22c   :  { %v9540_v49 = vadd.f32 %v1651_v53, %v9466_v4  ;;  %v1653_v25 = vpop.f32.mrb[9].mxu1  ;;  %6953 = vrcp.f32 %v3145_v56  ;;  %v6002_v56 = vcombine.high %v877_v22, %v881_v51 }
 0x22d   :  { %v9549_v3 = vadd.f32 %v1653_v25, %v9469_v5  ;;  %v1655_v15 = vpop.f32.mrb[10].mxu1  ;;  %6955 = vrcp.f32 %v3146_v46  ;;  %v885_v46 = vld [vmem:[%s11602_s3 + $0x310] sm:$0xff] }
 0x22e   :  { %v6069_v8 = vmul.f32 -1.442695, %v9540_v49  ;;  %v9553_v50 = vadd.f32 %v1655_v15, %v9466_v4  ;;  %v1657_v12 = vpop.f32.mrb[11].mxu1  ;;  %2002 = vmatpush1.bf16.msra.mxu1 %v5985_v28  ;;  %v889_v25 = vld [vmem:[%s11602_s3 + $0x330] sm:$0xff]  ;;  %v6001_v15 = vcombine.low %v877_v22, %v881_v51 }
 0x22f   :  { %v6070_v61 = vmul.f32 -1.442695, %v9549_v3  ;;  %v9557_v16 = vadd.f32 %v1657_v12, %v9469_v5  ;;  %2003 = vmatprep.subr.bf16.mxu1 %v5994_v11  ;;  %v6010_v58 = vcombine.high %v885_v46, %v889_v25  ;;  %v9580_v22 = vld [vmem:[%s11602_s3 + $0x370] sm:$0xff] }
 0x230   :  { %6957 = vpow2.f32 %v6069_v8  ;;  %v6077_v53 = vmul.f32 -1.442695, %v9553_v50  ;;  %v6942_v28 = vpop.eup %6941 }
 0x231   :  { %6959 = vpow2.f32 %v6070_v61  ;;  %v6078_v13 = vmul.f32 -1.442695, %v9557_v16  ;;  %1873 = vmatmul.mubr.bf16.gmra.mrb[84].mxu1 %v9088_v2  ;;  %v6944_v55 = vpop.eup %6943  ;;  %v3153_v11 = vadd.f32 1.0, %v6942_v28 }
 0x232   :  { %6961 = vpow2.f32 %v6077_v53  ;;  %1882 = vmatprep.mubr.bf16.mxu1 %v9093_v14  ;;  %2004 = vmatpush1.bf16.msra.mxu1 %v5993_v59  ;;  %v6946_v8 = vpop.eup %6945  ;;  %v3154_v12 = vadd.f32 1.0, %v6944_v55  ;;  %v9575_v53 = vld [vmem:[%s11602_s3 + $0x350] sm:$0xff] }
 0x233   :  { %6963 = vpow2.f32 %v6078_v13  ;;  %2005 = vmatprep.subr.bf16.mxu1 %v6002_v56  ;;  %v6948_v47 = vpop.eup %6947  ;;  %v3161_v61 = vadd.f32 1.0, %v6946_v8  ;;  %v6009_v8 = vcombine.low %v885_v46, %v889_v25  ;;  %v9601_v46 = vld [vmem:[%s11602_s3 + $0x390] sm:$0xff] }
 0x234   :  { %v1661_v17 = vpop.f32.mrb[12].mxu1  ;;  %6965 = vrcp.f32 %v3153_v11  ;;  %v6950_v51 = vpop.eup %6949  ;;  %v3162_v59 = vadd.f32 1.0, %v6948_v47 }
 0x235   :  { %v9570_v60 = vadd.f32 %v1661_v17, %v9466_v4  ;;  %v1663_v2 = vpop.f32.mrb[13].mxu1  ;;  %6967 = vrcp.f32 %v3154_v12  ;;  %v6952_v17 = vpop.eup %6951 }
 0x236   :  { %v9583_v56 = vadd.f32 %v1663_v2, %v9469_v5  ;;  %v1665_v28 = vpop.f32.mrb[14].mxu1  ;;  %6969 = vrcp.f32 %v3161_v61  ;;  %2006 = vmatpush1.bf16.msra.mxu1 %v6001_v15  ;;  %v6954_v14 = vpop.eup %6953  ;;  %v6018_v2 = vcombine.high %v9575_v53, %v9580_v22  ;;  %v3905_v61 = vmul.f32 %v6950_v51, %v9479_v20 }
 0x237   :  { %v6085_v13 = vmul.f32 -1.442695, %v9570_v60  ;;  %v9587_v55 = vadd.f32 %v1665_v28, %v9466_v4  ;;  %v1667_v11 = vpop.f32.mrb[15].mxu1  ;;  %6971 = vrcp.f32 %v3162_v59  ;;  %2007 = vmatprep.subr.bf16.mxu1 %v6010_v58  ;;  %v6956_v12 = vpop.eup %6955  ;;  %v3913_v28 = vmul.f32 %v6954_v14, %v9487_v34  ;;  %v9606_v58 = vld [vmem:[%s11602_s3 + $0x3b0] sm:$0xff] }
 0x238   :  { %v6086_v9 = vmul.f32 -1.442695, %v9583_v56  ;;  %v9591_v47 = vadd.f32 %v1667_v11, %v9469_v5  ;;  %v3906_v14 = vmul.f32 %v6952_v17, %v9483_v24  ;;  %v3914_v20 = vmul.f32 %v6956_v12, %v9497_v52  ;;  %v6725_v52 = vld [vmem:[%s11605_s5 + $0x100] ss:$8 sps:$4 sm:$0xff]  }
 0x239   :  { %6973 = vpow2.f32 %v6085_v13  ;;  %v6093_v15 = vmul.f32 -1.442695, %v9587_v55  ;;  %1883 = vmatmul.mubr.bf16.gmra.mrb[88].mxu1 %v9114_v41  ;;  %v4161_v51 = vpack.c.bf16 %v3913_v28, %v3905_v61  ;;  %v6017_v59 = vcombine.low %v9575_v53, %v9580_v22  ;;  %v9626_v53 = vld [vmem:[%s11602_s3 + $0x3d0] sm:$0xff] }
 0x23a   :  { %6975 = vpow2.f32 %v6086_v9  ;;  %v6094_v25 = vmul.f32 -1.442695, %v9591_v47  ;;  %v6958_v34 = vpop.eup %6957  ;;  %1892 = vmatprep.mubr.bf16.mxu1 %v9117_v23  ;;  %2008 = vmatpush1.bf16.msra.mxu1 %v6009_v8  ;;  %v4162_v29 = vpack.c.bf16 %v3914_v20, %v3906_v14  ;;  %v6026_v24 = vcombine.high %v9601_v46, %v9606_v58  ;;  %v9631_v22 = vld [vmem:[%s11602_s3 + $0x3f0] sm:$0xff] }
 0x23b   :  { %6977 = vpow2.f32 %v6093_v15  ;;  %v6960_v13 = vpop.eup %6959  ;;  %v3169_v11 = vadd.f32 1.0, %v6958_v34  ;;  %2009 = vmatprep.subr.bf16.mxu1 %v6018_v2  ;;  %v6730_v2 = vld [vmem:[%s11605_s5 + $0x114] ss:$8 sps:$4 sm:$0xff]   ;;  %v6025_v20 = vcombine.low %v9601_v46, %v9606_v58  ;;  %v6034_v46 = vcombine.high %v9626_v53, %v9631_v22  ;;  %v6728_v58 = vld [vmem:[%s11605_s5 + $0x110] ss:$8 sps:$4 sm:$0xff]  }
 0x23c   :  { %6979 = vpow2.f32 %v6094_v25  ;;  %v1671_v9 = vpop.f32.mrb[16].mxu1  ;;  %v6962_v17 = vpop.eup %6961  ;;  %v3170_v12 = vadd.f32 1.0, %v6960_v13  ;;  %5101 = vmatprep.mubr.bf16.mxu0 %v4162_v29 }
 0x23d   :  { %v9621_v8 = vadd.f32 %v1671_v9, %v9466_v4  ;;  %v1673_v61 = vpop.f32.mrb[17].mxu1  ;;  %v6964_v28 = vpop.eup %6963  ;;  %6981 = vrcp.f32 %v3169_v11  ;;  %v3177_v15 = vadd.f32 1.0, %v6962_v17  ;;  %5102 = vmatmul.mubr.bf16.vlgmr.msra.gmra.mrb[0].mxu0 %v4161_v51 }
 0x23e   :  { %v9637_v25 = vadd.f32 %v1673_v61, %v9469_v5  ;;  %v1675_v14 = vpop.f32.mrb[18].mxu1  ;;  %v6966_v34 = vpop.eup %6965  ;;  %6983 = vrcp.f32 %v3170_v12  ;;  %v3178_v13 = vadd.f32 1.0, %v6964_v28  ;;  %2010 = vmatpush1.bf16.msra.mxu1 %v6017_v59  ;;  %5263 = vmatpush1.bf16.msra.mxu0 %v6725_v52  ;;  %v6733_v59 = vld [vmem:[%s11605_s5 + $0x124] ss:$8 sps:$4 sm:$0xff]  }
 0x23f   :  { %v6101_v9 = vmul.f32 -1.442695, %v9621_v8  ;;  %v9643_v23 = vadd.f32 %v1675_v14, %v9466_v4  ;;  %v1677_v41 = vpop.f32.mrb[19].mxu1  ;;  %v6968_v11 = vpop.eup %6967  ;;  %6985 = vrcp.f32 %v3177_v15  ;;  %2011 = vmatprep.subr.bf16.mxu1 %v6026_v24  ;;  %5264 = vmatprep.subr.bf16.mxu0 %v6730_v2  ;;  %v3921_v24 = vmul.f32 %v6966_v34, %v9510_v45 }
 0x240   :  { %v6102_v17 = vmul.f32 -1.442695, %v9637_v25  ;;  %v9647_v29 = vadd.f32 %v1677_v41, %v9469_v5  ;;  %v6970_v12 = vpop.eup %6969  ;;  %6987 = vrcp.f32 %v3178_v13  ;;  %v3922_v15 = vmul.f32 %v6968_v11, %v9513_v1 }
 0x241   :  { %v6109_v51 = vmul.f32 -1.442695, %v9643_v23  ;;  %v6972_v41 = vpop.eup %6971  ;;  %v3929_v61 = vmul.f32 %v6970_v12, %v9523_v36  ;;  %6989 = vpow2.f32 %v6101_v9  ;;  %1893 = vmatmul.mubr.bf16.gmra.mrb[92].mxu1 %v9153_v48  ;;  %v6033_v2 = vcombine.low %v9626_v53, %v9631_v22  ;;  %v6731_v53 = vld [vmem:[%s11605_s5 + $0x120] ss:$8 sps:$4 sm:$0xff]  }
 0x242   :  { %v6110_v52 = vmul.f32 -1.442695, %v9647_v29  ;;  %v3930_v14 = vmul.f32 %v6972_v41, %v9527_v42  ;;  %6991 = vpow2.f32 %v6102_v17  ;;  %1902 = vmatprep.mubr.bf16.mxu1 %v9156_v37  ;;  %2012 = vmatpush1.bf16.msra.mxu1 %v6025_v20  ;;  %v5916_v9 = vcombine.high %v9439_v32, %v9450_v63 }
 0x243   :  { %v6974_v28 = vpop.eup %6973  ;;  %6993 = vpow2.f32 %v6109_v51  ;;  %v4169_v13 = vpack.c.bf16 %v3929_v61, %v3921_v24  ;;  %2013 = vmatprep.subr.bf16.mxu1 %v6034_v46  ;;  %5265 = vmatpush1.bf16.msra.mxu0 %v6728_v58  ;;  %v6736_v51 = vld [vmem:[%s11605_s5 + $0x134] ss:$8 sps:$4 sm:$0xff]  }
 0x244   :  { %v6976_v45 = vpop.eup %6975  ;;  %v3185_v34 = vadd.f32 1.0, %v6974_v28  ;;  %v1681_v36 = vpop.f32.mrb[20].mxu1  ;;  %6995 = vpow2.f32 %v6110_v52  ;;  %v4170_v17 = vpack.c.bf16 %v3930_v14, %v3922_v15  ;;  %5266 = vmatprep.subr.bf16.mxu0 %v6733_v59 }
 0x245   :  { %v6978_v1 = vpop.eup %6977  ;;  %v3186_v11 = vadd.f32 1.0, %v6976_v45  ;;  %v9670_v42 = vadd.f32 %v1681_v36, %v9466_v4  ;;  %v1683_v20 = vpop.f32.mrb[21].mxu1 }
 0x246   :  { %v6980_v22 = vpop.eup %6979  ;;  %6997 = vrcp.f32 %v3185_v34  ;;  %v3193_v46 = vadd.f32 1.0, %v6978_v1  ;;  %v9676_v12 = vadd.f32 %v1683_v20, %v9469_v5  ;;  %v1685_v58 = vpop.f32.mrb[22].mxu1  ;;  %5111 = vmatprep.mubr.bf16.mxu0 %v4170_v17  ;;  %2014 = vmatpush1.bf16.msra.mxu1 %v6033_v2  ;;  %v6734_v34 = vld [vmem:[%s11605_s5 + $0x130] ss:$8 sps:$4 sm:$0xff]  }
 0x247   :  { %6999 = vrcp.f32 %v3186_v11  ;;  %v3194_v41 = vadd.f32 1.0, %v6980_v22  ;;  %v6117_v24 = vmul.f32 -1.442695, %v9670_v42  ;;  %v9683_v61 = vadd.f32 %v1685_v58, %v9466_v4  ;;  %v1687_v52 = vpop.f32.mrb[23].mxu1  ;;  %v6982_v59 = vpop.eup %6981  ;;  %5112 = vmatmul.mubr.bf16.gmra.mrb[4].mxu0 %v4169_v13  ;;  %2176 = vmatprep.subr.bf16.mxu1 %v5916_v9  ;;  %v6739_v13 = vld [vmem:[%s11605_s5 + $0x144] ss:$8 sps:$4 sm:$0xff]  }
 0x248   :  { %7001 = vrcp.f32 %v3193_v46  ;;  %v6118_v28 = vmul.f32 -1.442695, %v9676_v12  ;;  %v9687_v15 = vadd.f32 %v1687_v52, %v9469_v5  ;;  %v6984_v14 = vpop.eup %6983  ;;  %5267 = vmatpush1.bf16.msra.mxu0 %v6731_v53  ;;  %v3937_v1 = vmul.f32 %v6982_v59, %v9540_v49 }
 0x249   :  { %7003 = vrcp.f32 %v3194_v41  ;;  %v6125_v45 = vmul.f32 -1.442695, %v9683_v61  ;;  %v6986_v36 = vpop.eup %6985  ;;  %1903 = vmatmul.mubr.bf16.gmra.mrb[96].mxu1 %v9210_v54  ;;  %5268 = vmatprep.subr.bf16.mxu0 %v6736_v51  ;;  %v3938_v17 = vmul.f32 %v6984_v14, %v9549_v3 }
 0x24a   :  { %7005 = vpow2.f32 %v6117_v24  ;;  %v6126_v2 = vmul.f32 -1.442695, %v9687_v15  ;;  %v6988_v9 = vpop.eup %6987  ;;  %v3945_v11 = vmul.f32 %v6986_v36, %v9553_v50  ;;  %1912 = vmatprep.mubr.bf16.mxu1 %v9213_v30 }
 0x24b   :  { %7007 = vpow2.f32 %v6118_v28  ;;  %v6990_v20 = vpop.eup %6989  ;;  %v3946_v53 = vmul.f32 %v6988_v9, %v9557_v16  ;;  %v6737_v16 = vld [vmem:[%s11605_s5 + $0x140] ss:$8 sps:$4 sm:$0xff]  }
 0x24c   :  { %7009 = vpow2.f32 %v6125_v45  ;;  %v1691_v22 = vpop.f32.mrb[24].mxu1  ;;  %v6992_v46 = vpop.eup %6991  ;;  %v3201_v58 = vadd.f32 1.0, %v6990_v20  ;;  %v4177_v49 = vpack.c.bf16 %v3945_v11, %v3937_v1  ;;  %5269 = vmatpush1.bf16.msra.mxu0 %v6734_v34 }
 0x24d   :  { %7011 = vpow2.f32 %v6126_v2  ;;  %v9704_v51 = vadd.f32 %v1691_v22, %v9466_v4  ;;  %v1693_v41 = vpop.f32.mrb[25].mxu1  ;;  %v6994_v50 = vpop.eup %6993  ;;  %v3202_v24 = vadd.f32 1.0, %v6992_v46  ;;  %v4178_v3 = vpack.c.bf16 %v3946_v53, %v3938_v17  ;;  %5270 = vmatprep.subr.bf16.mxu0 %v6739_v13  ;;  %v6742_v2 = vld [vmem:[%s11605_s5 + $0x154] ss:$8 sps:$4 sm:$0xff]   ;;  %v6740_v46 = vld [vmem:[%s11605_s5 + $0x150] ss:$8 sps:$4 sm:$0xff]  }
 0x24e   :  { %v9707_v52 = vadd.f32 %v1693_v41, %v9469_v5  ;;  %v1695_v59 = vpop.f32.mrb[26].mxu1  ;;  %v6996_v28 = vpop.eup %6995  ;;  %7013 = vrcp.f32 %v3201_v58  ;;  %v3209_v14 = vadd.f32 1.0, %v6994_v50 }
 0x24f   :  { %v6133_v45 = vmul.f32 -1.442695, %v9704_v51  ;;  %v9714_v36 = vadd.f32 %v1695_v59, %v9466_v4  ;;  %v1697_v34 = vpop.f32.mrb[27].mxu1  ;;  %7015 = vrcp.f32 %v3202_v24  ;;  %v3210_v1 = vadd.f32 1.0, %v6996_v28  ;;  %5121 = vmatprep.mubr.bf16.mxu0 %v4178_v3 }
 0x250   :  { %v6998_v9 = vpop.eup %6997  ;;  %v6134_v11 = vmul.f32 -1.442695, %v9707_v52  ;;  %v9721_v13 = vadd.f32 %v1697_v34, %v9469_v5  ;;  %7017 = vrcp.f32 %v3209_v14  ;;  %5122 = vmatmul.mubr.bf16.gmra.mrb[8].mxu0 %v4177_v49  ;;  %v6745_v49 = vld [vmem:[%s11605_s5 + $0x164] ss:$8 sps:$4 sm:$0xff]  }
 0x251   :  { %v7000_v20 = vpop.eup %6999  ;;  %v6141_v17 = vmul.f32 -1.442695, %v9714_v36  ;;  %7019 = vrcp.f32 %v3210_v1  ;;  %1913 = vmatmul.mubr.bf16.gmra.mrb[100].mxu1 %v9240_v21  ;;  %5271 = vmatpush1.bf16.msra.mxu0 %v6737_v16  ;;  %v3953_v41 = vmul.f32 %v6998_v9, %v9570_v60 }
 0x252   :  { %v7002_v53 = vpop.eup %7001  ;;  %v6142_v22 = vmul.f32 -1.442695, %v9721_v13  ;;  %7021 = vpow2.f32 %v6133_v45  ;;  %1922 = vmatprep.mubr.bf16.mxu1 %v9243_v19  ;;  %5272 = vmatprep.subr.bf16.mxu0 %v6742_v2  ;;  %v3954_v59 = vmul.f32 %v7000_v20, %v9583_v56 }
 0x253   :  { %v7004_v58 = vpop.eup %7003  ;;  %v3961_v50 = vmul.f32 %v7002_v53, %v9587_v55  ;;  %7023 = vpow2.f32 %v6134_v11 }
 0x254   :  { %v7006_v24 = vpop.eup %7005  ;;  %v3962_v3 = vmul.f32 %v7004_v58, %v9591_v47  ;;  %v1701_v16 = vpop.f32.mrb[28].mxu1  ;;  %7025 = vpow2.f32 %v6141_v17  ;;  %v6743_v47 = vld [vmem:[%s11605_s5 + $0x160] ss:$8 sps:$4 sm:$0xff]  }
 0x255   :  { %v7008_v28 = vpop.eup %7007  ;;  %v3217_v14 = vadd.f32 1.0, %v7006_v24  ;;  %v9738_v60 = vadd.f32 %v1701_v16, %v9466_v4  ;;  %v1703_v55 = vpop.f32.mrb[29].mxu1  ;;  %v4185_v45 = vpack.c.bf16 %v3961_v50, %v3953_v41  ;;  %7027 = vpow2.f32 %v6142_v22  ;;  %5273 = vmatpush1.bf16.msra.mxu0 %v6740_v46  ;;  %v6748_v22 = vld [vmem:[%s11605_s5 + $0x174] ss:$8 sps:$4 sm:$0xff]   ;;  %v6746_v16 = vld [vmem:[%s11605_s5 + $0x170] ss:$8 sps:$4 sm:$0xff]  }
 0x256   :  { %v7010_v34 = vpop.eup %7009  ;;  %v3218_v2 = vadd.f32 1.0, %v7008_v28  ;;  %v9741_v9 = vadd.f32 %v1703_v55, %v9469_v5  ;;  %v1705_v1 = vpop.f32.mrb[30].mxu1  ;;  %v4186_v56 = vpack.c.bf16 %v3962_v3, %v3954_v59  ;;  %5274 = vmatprep.subr.bf16.mxu0 %v6745_v49 }
 0x257   :  { %v7012_v11 = vpop.eup %7011  ;;  %7029 = vrcp.f32 %v3217_v14  ;;  %v3225_v20 = vadd.f32 1.0, %v7010_v34  ;;  %v6149_v17 = vmul.f32 -1.442695, %v9738_v60  ;;  %v9748_v53 = vadd.f32 %v1705_v1, %v9466_v4  ;;  %v1707_v58 = vpop.f32.mrb[31].mxu1 }
 0x258   :  { %7031 = vrcp.f32 %v3218_v2  ;;  %v3226_v46 = vadd.f32 1.0, %v7012_v11  ;;  %v6150_v41 = vmul.f32 -1.442695, %v9741_v9  ;;  %v9755_v50 = vadd.f32 %v1707_v58, %v9469_v5  ;;  %5131 = vmatprep.mubr.bf16.mxu0 %v4186_v56  ;;  %v7014_v24 = vpop.eup %7013 }
 0x259   :  { %7033 = vrcp.f32 %v3225_v20  ;;  %v6157_v59 = vmul.f32 -1.442695, %v9748_v53  ;;  %5132 = vmatmul.mubr.bf16.gmra.mrb[12].mxu0 %v4185_v45  ;;  %v7016_v3 = vpop.eup %7015  ;;  %1923 = vmatmul.mubr.bf16.gmra.mrb[104].mxu1 %v9262_v7  ;;  %v3969_v55 = vmul.f32 %v7014_v24, %v9621_v8 }
 0x25a   :  { %7035 = vrcp.f32 %v3226_v46  ;;  %v6158_v49 = vmul.f32 -1.442695, %v9755_v50  ;;  %5275 = vmatpush1.bf16.msra.mxu0 %v6743_v47  ;;  %v7018_v28 = vpop.eup %7017  ;;  %1932 = vmatprep.mubr.bf16.mxu1 %v9333_v62  ;;  %v3970_v1 = vmul.f32 %v7016_v3, %v9637_v25  ;;  %v6751_v25 = vld [vmem:[%s11605_s5 + $0x184] ss:$8 sps:$4 sm:$0xff]  }
 0x25b   :  { %7037 = vpow2.f32 %v6149_v17  ;;  %5276 = vmatprep.subr.bf16.mxu0 %v6748_v22  ;;  %v7020_v14 = vpop.eup %7019  ;;  %v3977_v45 = vmul.f32 %v7018_v28, %v9643_v23 }
 0x25c   :  { %7039 = vpow2.f32 %v6150_v41  ;;  %v1711_v34 = vpop.f32.mrb[32].mxu1  ;;  %v7022_v2 = vpop.eup %7021  ;;  %v3978_v56 = vmul.f32 %v7020_v14, %v9647_v29 }
 0x25d   :  { %7041 = vpow2.f32 %v6157_v59  ;;  %v9769_v47 = vadd.f32 %v1711_v34, %v9466_v4  ;;  %v1713_v11 = vpop.f32.mrb[33].mxu1  ;;  %v7024_v20 = vpop.eup %7023  ;;  %v3233_v17 = vadd.f32 1.0, %v7022_v2  ;;  %v4193_v23 = vpack.c.bf16 %v3977_v45, %v3969_v55  ;;  %v6749_v59 = vld [vmem:[%s11605_s5 + $0x180] ss:$8 sps:$4 sm:$0xff]  }
 0x25e   :  { %7043 = vpow2.f32 %v6158_v49  ;;  %v9772_v58 = vadd.f32 %v1713_v11, %v9469_v5  ;;  %v1715_v8 = vpop.f32.mrb[34].mxu1  ;;  %5277 = vmatpush1.bf16.msra.mxu0 %v6746_v16  ;;  %v7026_v22 = vpop.eup %7025  ;;  %v3234_v29 = vadd.f32 1.0, %v7024_v20  ;;  %v4194_v24 = vpack.c.bf16 %v3978_v56, %v3970_v1 }
 0x25f   :  { %v9778_v46 = vadd.f32 %v1715_v8, %v9466_v4  ;;  %v1717_v41 = vpop.f32.mrb[35].mxu1  ;;  %v7028_v3 = vpop.eup %7027  ;;  %7045 = vrcp.f32 %v3233_v17  ;;  %v3241_v49 = vadd.f32 1.0, %v7026_v22  ;;  %v6165_v16 = vmul.f32 -1.442695, %v9769_v47  ;;  %5278 = vmatprep.subr.bf16.mxu0 %v6751_v25 }
 0x260   :  { %v9785_v28 = vadd.f32 %v1717_v41, %v9469_v5  ;;  %7047 = vrcp.f32 %v3234_v29  ;;  %v3242_v55 = vadd.f32 1.0, %v7028_v3  ;;  %v6166_v45 = vmul.f32 -1.442695, %v9772_v58  ;;  %5141 = vmatprep.mubr.bf16.mxu0 %v4194_v24 }
 0x261   :  { %v7030_v14 = vpop.eup %7029  ;;  %7049 = vrcp.f32 %v3241_v49  ;;  %v6173_v2 = vmul.f32 -1.442695, %v9778_v46  ;;  %5142 = vmatmul.mubr.bf16.gmra.mrb[16].mxu0 %v4193_v23  ;;  %1933 = vmatmul.mubr.bf16.gmra.mrb[108].mxu1 %v9335_v26 }
 0x262   :  { %v7032_v34 = vpop.eup %7031  ;;  %7051 = vrcp.f32 %v3242_v55  ;;  %v6174_v56 = vmul.f32 -1.442695, %v9785_v28  ;;  %1942 = vmatprep.mubr.bf16.mxu1 %v9351_v35  ;;  %5279 = vmatpush1.bf16.msra.mxu0 %v6749_v59  ;;  %v3985_v20 = vmul.f32 %v7030_v14, %v9670_v42 }
 0x263   :  { %v7034_v1 = vpop.eup %7033  ;;  %7053 = vpow2.f32 %v6165_v16 }
 0x264   :  { %v7036_v11 = vpop.eup %7035  ;;  %v3993_v17 = vmul.f32 %v7034_v1, %v9683_v61  ;;  %v1721_v8 = vpop.f32.mrb[36].mxu1  ;;  %7055 = vpow2.f32 %v6166_v45  ;;  %v6752_v61 = vld [vmem:[%s11605_s5 + $0x190] ss:$8 sps:$4 sm:$0xff]   ;;  %v6754_v45 = vld [vmem:[%s11605_s5 + $0x194] ss:$8 sps:$4 sm:$0xff]  }
 0x265   :  { %v7038_v25 = vpop.eup %7037  ;;  %v3994_v22 = vmul.f32 %v7036_v11, %v9687_v15  ;;  %v9796_v23 = vadd.f32 %v1721_v8, %v9466_v4  ;;  %v1723_v29 = vpop.f32.mrb[37].mxu1  ;;  %7057 = vpow2.f32 %v6173_v2  ;;  %v3986_v15 = vmul.f32 %v7032_v34, %v9676_v12  ;;  %5280 = vmatprep.subr.bf16.mxu0 %v6754_v45 }
 0x266   :  { %v7040_v41 = vpop.eup %7039  ;;  %v3249_v24 = vadd.f32 1.0, %v7038_v25  ;;  %v9799_v59 = vadd.f32 %v1723_v29, %v9469_v5  ;;  %v1725_v3 = vpop.f32.mrb[38].mxu1  ;;  %v4201_v42 = vpack.c.bf16 %v3993_v17, %v3985_v20  ;;  %7059 = vpow2.f32 %v6174_v56  ;;  %5281 = vmatpush1.bf16.msra.mxu0 %v6752_v61  ;;  %v6757_v61 = vld [vmem:[%s11605_s5 + $0x1a4] ss:$8 sps:$4 sm:$0xff]  }
 0x267   :  { %v7042_v49 = vpop.eup %7041  ;;  %v3250_v16 = vadd.f32 1.0, %v7040_v41  ;;  %v9806_v14 = vadd.f32 %v1725_v3, %v9466_v4  ;;  %v1727_v55 = vpop.f32.mrb[39].mxu1  ;;  %v6181_v11 = vmul.f32 -1.442695, %v9796_v23  ;;  %v4202_v56 = vpack.c.bf16 %v3994_v22, %v3986_v15  ;;  %5282 = vmatprep.subr.bf16.mxu0 %v6757_v61 }
 0x268   :  { %v7044_v2 = vpop.eup %7043  ;;  %7061 = vrcp.f32 %v3249_v24  ;;  %v3257_v1 = vadd.f32 1.0, %v7042_v49  ;;  %v9813_v20 = vadd.f32 %v1727_v55, %v9469_v5  ;;  %v6182_v34 = vmul.f32 -1.442695, %v9799_v59 }
 0x269   :  { %7063 = vrcp.f32 %v3250_v16  ;;  %v3258_v12 = vadd.f32 1.0, %v7044_v2  ;;  %v7046_v17 = vpop.eup %7045  ;;  %v6189_v8 = vmul.f32 -1.442695, %v9806_v14  ;;  %1943 = vmatmul.mubr.bf16.gmra.mrb[112].mxu1 %v9353_v38  ;;  %5151 = vmatprep.mubr.bf16.mxu0 %v4202_v56 }
 0x26a   :  { %7065 = vrcp.f32 %v3257_v1  ;;  %v7048_v25 = vpop.eup %7047  ;;  %v6190_v29 = vmul.f32 -1.442695, %v9813_v20  ;;  %1952 = vmatprep.mubr.bf16.mxu1 %v9369_v0  ;;  %5152 = vmatmul.mubr.bf16.gmra.mrb[20].mxu0 %v4201_v42 }
 0x26b   :  { %7067 = vrcp.f32 %v3258_v12  ;;  %v7050_v41 = vpop.eup %7049  ;;  %v4002_v55 = vmul.f32 %v7048_v25, %v9707_v52 }
 0x26c   :  { %7069 = vpow2.f32 %v6181_v11  ;;  %v1731_v24 = vpop.f32.mrb[40].mxu1  ;;  %v7052_v22 = vpop.eup %7051  ;;  %v4009_v3 = vmul.f32 %v7050_v41, %v9714_v36  ;;  %v6755_v36 = vld [vmem:[%s11605_s5 + $0x1a0] ss:$8 sps:$4 sm:$0xff]   ;;  %v4001_v11 = vmul.f32 %v7046_v17, %v9704_v51  ;;  %v6760_v17 = vld [vmem:[%s11605_s5 + $0x1b4] ss:$8 sps:$4 sm:$0xff]  }
 0x26d   :  { %7071 = vpow2.f32 %v6182_v34  ;;  %v9822_v49 = vadd.f32 %v1731_v24, %v9466_v4  ;;  %v1733_v15 = vpop.f32.mrb[41].mxu1  ;;  %v7054_v16 = vpop.eup %7053  ;;  %v4010_v45 = vmul.f32 %v7052_v22, %v9721_v13  ;;  %5283 = vmatpush1.bf16.msra.mxu0 %v6755_v36 }
 0x26e   :  { %7073 = vpow2.f32 %v6189_v8  ;;  %v9830_v42 = vadd.f32 %v1733_v15, %v9469_v5  ;;  %v1735_v2 = vpop.f32.mrb[42].mxu1  ;;  %v7056_v1 = vpop.eup %7055  ;;  %v3265_v12 = vadd.f32 1.0, %v7054_v16  ;;  %v4209_v51 = vpack.c.bf16 %v4009_v3, %v4001_v11  ;;  %v6758_v16 = vld [vmem:[%s11605_s5 + $0x1b0] ss:$8 sps:$4 sm:$0xff]   ;;  %5284 = vmatprep.subr.bf16.mxu0 %v6760_v17 }
 0x26f   :  { %7075 = vpow2.f32 %v6190_v29  ;;  %v9837_v34 = vadd.f32 %v1735_v2, %v9466_v4  ;;  %v1737_v52 = vpop.f32.mrb[43].mxu1  ;;  %v7058_v13 = vpop.eup %7057  ;;  %v3266_v56 = vadd.f32 1.0, %v7056_v1  ;;  %v4210_v25 = vpack.c.bf16 %v4010_v45, %v4002_v55 }
 0x270   :  { %v9840_v8 = vadd.f32 %v1737_v52, %v9469_v5  ;;  %v7060_v41 = vpop.eup %7059  ;;  %7077 = vrcp.f32 %v3265_v12  ;;  %v3273_v24 = vadd.f32 1.0, %v7058_v13  ;;  %v6197_v22 = vmul.f32 -1.442695, %v9822_v49  ;;  %v6763_v12 = vld [vmem:[%s11605_s5 + $0x1c4] ss:$8 sps:$4 sm:$0xff]  }
 0x271   :  { %7079 = vrcp.f32 %v3266_v56  ;;  %v3274_v15 = vadd.f32 1.0, %v7060_v41  ;;  %v6198_v61 = vmul.f32 -1.442695, %v9830_v42  ;;  %5161 = vmatprep.mubr.bf16.mxu0 %v4210_v25  ;;  %1953 = vmatmul.mubr.bf16.gmra.mrb[116].mxu1 %v9371_v40  ;;  %v6205_v3 = vmul.f32 -1.442695, %v9837_v34 }
 0x272   :  { %v7062_v29 = vpop.eup %7061  ;;  %7081 = vrcp.f32 %v3273_v24  ;;  %1962 = vmatprep.mubr.bf16.mxu1 %v9387_v44  ;;  %v6206_v2 = vmul.f32 -1.442695, %v9840_v8  ;;  %5162 = vmatmul.mubr.bf16.gmra.mrb[24].mxu0 %v4209_v51  ;;  %v6761_v25 = vld [vmem:[%s11605_s5 + $0x1c0] ss:$8 sps:$4 sm:$0xff]  }
 0x273   :  { %v7064_v55 = vpop.eup %7063  ;;  %7083 = vrcp.f32 %v3274_v15  ;;  %v4017_v1 = vmul.f32 %v7062_v29, %v9738_v60  ;;  %5285 = vmatpush1.bf16.msra.mxu0 %v6758_v16  ;;  %v6764_v15 = vld [vmem:[%s11605_s5 + $0x1d0] ss:$8 sps:$4 sm:$0xff]  }
 0x274   :  { %v7066_v45 = vpop.eup %7065  ;;  %7085 = vpow2.f32 %v6197_v22  ;;  %v4018_v13 = vmul.f32 %v7064_v55, %v9741_v9  ;;  %5286 = vmatprep.subr.bf16.mxu0 %v6763_v12  ;;  %v6766_v9 = vld [vmem:[%s11605_s5 + $0x1d4] ss:$8 sps:$4 sm:$0xff]  }
 0x275   :  { %v7068_v36 = vpop.eup %7067  ;;  %v4025_v11 = vmul.f32 %v7066_v45, %v9748_v53  ;;  %7087 = vpow2.f32 %v6198_v61 }
 0x276   :  { %v7070_v52 = vpop.eup %7069  ;;  %v4026_v56 = vmul.f32 %v7068_v36, %v9755_v50  ;;  %7089 = vpow2.f32 %v6205_v3  ;;  %v6769_v3 = vld [vmem:[%s11605_s5 + $0x1e4] ss:$8 sps:$4 sm:$0xff]  }
 0x277   :  { %v7072_v41 = vpop.eup %7071  ;;  %v3281_v60 = vadd.f32 1.0, %v7070_v52  ;;  %v4217_v53 = vpack.c.bf16 %v4025_v11, %v4017_v1  ;;  %7091 = vpow2.f32 %v6206_v2  ;;  %5287 = vmatpush1.bf16.msra.mxu0 %v6761_v25  ;;  %v6767_v1 = vld [vmem:[%s11605_s5 + $0x1e0] ss:$8 sps:$4 sm:$0xff]  }
 0x278   :  { %v7074_v24 = vpop.eup %7073  ;;  %v3282_v22 = vadd.f32 1.0, %v7072_v41  ;;  %v4218_v51 = vpack.c.bf16 %v4026_v56, %v4018_v13  ;;  %5288 = vmatprep.subr.bf16.mxu0 %v6766_v9 }
 0x279   :  { %v7076_v17 = vpop.eup %7075  ;;  %7093 = vrcp.f32 %v3281_v60  ;;  %v3289_v29 = vadd.f32 1.0, %v7074_v24  ;;  %1963 = vmatmul.mubr.bf16.gmra.mrb[120].mxu1 %v9389_v33 }
 0x27a   :  { %7095 = vrcp.f32 %v3282_v22  ;;  %v3290_v50 = vadd.f32 1.0, %v7076_v17  ;;  %5171 = vmatprep.mubr.bf16.mxu0 %v4218_v51  ;;  %v7078_v61 = vpop.eup %7077  ;;  %1972 = vmatprep.mubr.bf16.mxu1 %v9403_v10 }
 0x27b   :  { %7097 = vrcp.f32 %v3289_v29  ;;  %v7080_v16 = vpop.eup %7079  ;;  %5172 = vmatmul.mubr.bf16.gmra.mrb[28].mxu0 %v4217_v53  ;;  %v4033_v2 = vmul.f32 %v7078_v61, %v9769_v47  ;;  %v6772_v47 = vld [vmem:[%s11605_s5 + $0x1f4] ss:$8 sps:$4 sm:$0xff]  }
 0x27c   :  { %7099 = vrcp.f32 %v3290_v50  ;;  %v7082_v55 = vpop.eup %7081  ;;  %5289 = vmatpush1.bf16.msra.mxu0 %v6764_v15  ;;  %v4034_v12 = vmul.f32 %v7080_v16, %v9772_v58  ;;  %v6770_v58 = vld [vmem:[%s11605_s5 + $0x1f0] ss:$8 sps:$4 sm:$0xff]  }
 0x27d   :  { %v7084_v45 = vpop.eup %7083  ;;  %v4041_v36 = vmul.f32 %v7082_v55, %v9778_v46  ;;  %5290 = vmatprep.subr.bf16.mxu0 %v6769_v3  ;;  %v798_v15 = vld [vmem:[%s11602_s3 + $0x58] sm:$0xff] }
 0x27e   :  { %v7086_v11 = vpop.eup %7085  ;;  %v4042_v52 = vmul.f32 %v7084_v45, %v9785_v28  ;;  %v802_v61 = vld [vmem:[%s11602_s3 + $0x78] sm:$0xff] }
 0x27f   :  { %v7088_v13 = vpop.eup %7087  ;;  %v3297_v56 = vadd.f32 1.0, %v7086_v11  ;;  %v4225_v25 = vpack.c.bf16 %v4041_v36, %v4033_v2  ;;  %v5924_v2 = vcombine.high %v798_v15, %v802_v61  ;;  %v11789_v36 = vcombine.low %v9439_v32, %v9450_v63 }
 0x280   :  { %v7090_v41 = vpop.eup %7089  ;;  %v3298_v60 = vadd.f32 1.0, %v7088_v13  ;;  %v4226_v53 = vpack.c.bf16 %v4042_v52, %v4034_v12  ;;  %5291 = vmatpush1.bf16.msra.mxu0 %v6767_v1  ;;  %v814_v12 = vld [vmem:[%s11602_s3 + $0xd8] sm:$0xff] }
 0x281   :  { %v7092_v46 = vpop.eup %7091  ;;  %7101 = vrcp.f32 %v3297_v56  ;;  %v3305_v24 = vadd.f32 1.0, %v7090_v41  ;;  %1973 = vmatmul.mubr.bf16.gmra.mrb[124].mxu1 %v9405_v31  ;;  %5292 = vmatprep.subr.bf16.mxu0 %v6772_v47  ;;  %v818_v52 = vld [vmem:[%s11602_s3 + $0xf8] sm:$0xff] }
 0x282   :  { %7103 = vrcp.f32 %v3298_v60  ;;  %v3306_v22 = vadd.f32 1.0, %v7092_v46  ;;  %5181 = vmatprep.mubr.bf16.mxu0 %v4226_v53  ;;  %2015 = vmatprep.mubr.bf16.mxu1 %v8868_v18  ;;  %v5940_v53 = vcombine.high %v814_v12, %v818_v52  ;;  %v822_v46 = vld [vmem:[%s11602_s3 + $0x118] sm:$0xff] }
 0x283   :  { %v7094_v28 = vpop.eup %7093  ;;  %7105 = vrcp.f32 %v3305_v24  ;;  %5182 = vmatmul.mubr.bf16.gmra.mrb[32].mxu0 %v4225_v25  ;;  %v826_v24 = vld [vmem:[%s11602_s3 + $0x138] sm:$0xff] }
 0x284   :  { %v7096_v51 = vpop.eup %7095  ;;  %7107 = vrcp.f32 %v3306_v22  ;;  %5293 = vmatpush1.bf16.msra.mxu0 %v6770_v58  ;;  %v4049_v9 = vmul.f32 %v7094_v28, %v9796_v23  ;;  %v806_v23 = vld [vmem:[%s11602_s3 + $0x98] sm:$0xff]  ;;  %v5947_v28 = vcombine.low %v822_v46, %v826_v24 }
 0x285   :  { %v7098_v17 = vpop.eup %7097  ;;  %v4050_v16 = vmul.f32 %v7096_v51, %v9799_v59  ;;  %v5923_v59 = vcombine.low %v798_v15, %v802_v61  ;;  %v834_v58 = vld [vmem:[%s11602_s3 + $0x178] sm:$0xff] }
 0x286   :  { %v7100_v29 = vpop.eup %7099  ;;  %v4057_v50 = vmul.f32 %v7098_v17, %v9806_v14  ;;  %v810_v14 = vld [vmem:[%s11602_s3 + $0xb8] sm:$0xff] }
 0x287   :  { %v4058_v55 = vmul.f32 %v7100_v29, %v9813_v20  ;;  %v5932_v1 = vcombine.high %v806_v23, %v810_v14  ;;  %v5931_v25 = vcombine.low %v806_v23, %v810_v14  ;;  %v838_v51 = vld [vmem:[%s11602_s3 + $0x198] sm:$0xff]  ;;  %v11790_v29 = vld [vmem:[#allocation4_spill] sm:$0xff]  ;;  %v11792_v14 = vld [vmem:[#allocation2_spill] sm:$0xff] }
 0x288   :  { %v4233_v3 = vpack.c.bf16 %v4057_v50, %v4049_v9  ;;  %v842_v17 = vld [vmem:[%s11602_s3 + $0x1b8] sm:$0xff] }
 0x289   :  { %v4234_v45 = vpack.c.bf16 %v4058_v55, %v4050_v16  ;;  %2016 = vmatmul.mubr.bf16.vlgmr.msra.gmra.mrb[128].mxu1 %v8881_v57  ;;  %v5964_v50 = vcombine.high %v838_v51, %v842_v17  ;;  %v846_v15 = vld [vmem:[%s11602_s3 + $0x1d8] sm:$0xff]  ;;  %v5963_v16 = vcombine.low %v838_v51, %v842_v17 }
 0x28a   :  { %2177 = vmatpush1.bf16.msra.mxu1 %v11789_v36  ;;  %2025 = vmatprep.mubr.bf16.mxu1 %v8913_v39  ;;  %v850_v61 = vld [vmem:[%s11602_s3 + $0x1f8] sm:$0xff] }
 0x28b   :  { %5191 = vmatprep.mubr.bf16.mxu0 %v4234_v45  ;;  %v7102_v20 = vpop.eup %7101  ;;  %2178 = vmatprep.subr.bf16.mxu1 %v5924_v2  ;;  %v5972_v55 = vcombine.high %v846_v15, %v850_v61  ;;  %v858_v45 = vld [vmem:[%s11602_s3 + $0x238] sm:$0xff]  ;;  %v6775_v2 = vld [vmem:[%s11605_s5 + $0x204] ss:$8 sps:$4 sm:$0xff]   ;;  %v5971_v36 = vcombine.low %v846_v15, %v850_v61 }
 0x28c   :  { %5192 = vmatmul.mubr.bf16.gmra.mrb[36].mxu0 %v4233_v3  ;;  %v7104_v11 = vpop.eup %7103  ;;  %v4065_v32 = vmul.f32 %v7102_v20, %v9822_v49  ;;  %v854_v3 = vld [vmem:[%s11602_s3 + $0x218] sm:$0xff]  ;;  %5455 = vmatprep.subr.bf16.mxu0 %v6775_v2 }
 0x28d   :  { %v7106_v13 = vpop.eup %7105  ;;  %v4066_v41 = vmul.f32 %v7104_v11, %v9830_v42  ;;  %v5939_v42 = vcombine.low %v814_v12, %v818_v52  ;;  %v11791_v23 = vld [vmem:[#allocation5_spill] sm:$0xff]  ;;  %v5979_v11 = vcombine.low %v854_v3, %v858_v45 }
 0x28e   :  { %v7108_v56 = vpop.eup %7107  ;;  %v4073_v63 = vmul.f32 %v7106_v13, %v9837_v34  ;;  %2179 = vmatpush1.bf16.msra.mxu1 %v5923_v59  ;;  %v5948_v34 = vcombine.high %v822_v46, %v826_v24  ;;  %v5980_v59 = vcombine.high %v854_v3, %v858_v45  ;;  %v862_v20 = vld [vmem:[%s11602_s3 + $0x258] sm:$0xff] }
 0x28f   :  { %v4074_v60 = vmul.f32 %v7108_v56, %v9840_v8  ;;  %2180 = vmatprep.subr.bf16.mxu1 %v5932_v1  ;;  %v830_v8 = vld [vmem:[%s11602_s3 + $0x158] sm:$0xff]  ;;  %v11793_v56 = vld [vmem:[#allocation3_spill] sm:$0xff] }
 0x290   :  { %v4241_v47 = vpack.c.bf16 %v4073_v63, %v4065_v32  ;;  %v5956_v22 = vcombine.high %v830_v8, %v834_v58  ;;  %v5955_v9 = vcombine.low %v830_v8, %v834_v58  ;;  %v866_v1 = vld [vmem:[%s11602_s3 + $0x278] sm:$0xff]  ;;  %v11794_v32 = vld [vmem:[#allocation6_spill] sm:$0xff] }
 0x291   :  { %v4242_v49 = vpack.c.bf16 %v4074_v60, %v4066_v41  ;;  %2026 = vmatmul.mubr.bf16.gmra.mrb[132].mxu1 %v8933_v27  ;;  %v5988_v12 = vcombine.high %v862_v20, %v866_v1  ;;  %v870_v52 = vld [vmem:[%s11602_s3 + $0x298] sm:$0xff]  ;;  %v5987_v63 = vcombine.low %v862_v20, %v866_v1 }
 0x292   :  { %2035 = vmatprep.mubr.bf16.mxu1 %v8962_v43  ;;  %2181 = vmatpush1.bf16.msra.mxu1 %v5931_v25  ;;  %v874_v13 = vld [vmem:[%s11602_s3 + $0x2b8] sm:$0xff] }
 0x293   :  { %5201 = vmatprep.mubr.bf16.mxu0 %v4242_v49  ;;  %2182 = vmatprep.subr.bf16.mxu1 %v5940_v53  ;;  %v5996_v25 = vcombine.high %v870_v52, %v874_v13  ;;  %v878_v41 = vld [vmem:[%s11602_s3 + $0x2d8] sm:$0xff]  ;;  %v5995_v53 = vcombine.low %v870_v52, %v874_v13  ;;  %v11795_v49 = vld [vmem:[#allocation7_spill] sm:$0xff] }
 0x294   :  { %5202 = vmatmul.mubr.bf16.gmra.mrb[40].mxu0 %v4241_v47  ;;  %v882_v60 = vld [vmem:[%s11602_s3 + $0x2f8] sm:$0xff] }
 0x295   :  { %v6004_v47 = vcombine.high %v878_v41, %v882_v60  ;;  %v886_v46 = vld [vmem:[%s11602_s3 + $0x318] sm:$0xff] }
 0x296   :  { %2183 = vmatpush1.bf16.msra.mxu1 %v5939_v42  ;;  %v890_v24 = vld [vmem:[%s11602_s3 + $0x338] sm:$0xff]  ;;  %v11796_v42 = vld [vmem:[#allocation8_spill] sm:$0xff] }
 0x297   :  { %2184 = vmatprep.subr.bf16.mxu1 %v5948_v34  ;;  %v6003_v34 = vcombine.low %v878_v41, %v882_v60  ;;  %v6012_v8 = vcombine.high %v886_v46, %v890_v24  ;;  %v6011_v15 = vcombine.low %v886_v46, %v890_v24  ;;  %v11797_v1 = vld [vmem:[#allocation9_spill] sm:$0xff] }
 0x298   :  { %v914_v41 = vld [vmem:[%s11602_s3 + $0x3f8] sm:$0xff] }
 0x299   :  { %2036 = vmatmul.mubr.bf16.gmra.mrb[136].mxu1 %v8993_v6 }
 0x29a   :  { %2045 = vmatprep.mubr.bf16.mxu1 %v11790_v29  ;;  %2185 = vmatpush1.bf16.msra.mxu1 %v5947_v28  ;;  %v894_v28 = vld [vmem:[%s11602_s3 + $0x358] sm:$0xff] }
 0x29b   :  { %2186 = vmatprep.subr.bf16.mxu1 %v5956_v22  ;;  %v898_v22 = vld [vmem:[%s11602_s3 + $0x378] sm:$0xff] }
 0x29c   :  { %v6020_v3 = vcombine.high %v894_v28, %v898_v22  ;;  %v6019_v52 = vcombine.low %v894_v28, %v898_v22 }
 0x29e   :  { %2187 = vmatpush1.bf16.msra.mxu1 %v5955_v9 }
 0x29f   :  { %2188 = vmatprep.subr.bf16.mxu1 %v5964_v50 }
 0x2a1   :  { %2046 = vmatmul.mubr.bf16.gmra.mrb[140].mxu1 %v11791_v23 }
 0x2a2   :  { %2055 = vmatprep.mubr.bf16.mxu1 %v11792_v14  ;;  %2189 = vmatpush1.bf16.msra.mxu1 %v5963_v16 }
 0x2a3   :  { %2190 = vmatprep.subr.bf16.mxu1 %v5972_v55 }
 0x2a6   :  { %2191 = vmatpush1.bf16.msra.mxu1 %v5971_v36  ;;  %v902_v36 = vld [vmem:[%s11602_s3 + $0x398] sm:$0xff] }
 0x2a7   :  { %2192 = vmatprep.subr.bf16.mxu1 %v5980_v59  ;;  %v906_v59 = vld [vmem:[%s11602_s3 + $0x3b8] sm:$0xff] }
 0x2a8   :  { %v6028_v13 = vcombine.high %v902_v36, %v906_v59  ;;  %v6027_v24 = vcombine.low %v902_v36, %v906_v59 }
 0x2a9   :  { %2056 = vmatmul.mubr.bf16.gmra.mrb[144].mxu1 %v11793_v56 }
 0x2aa   :  { %2065 = vmatprep.mubr.bf16.mxu1 %v11794_v32  ;;  %2193 = vmatpush1.bf16.msra.mxu1 %v5979_v11 }
 0x2ab   :  { %2194 = vmatprep.subr.bf16.mxu1 %v5988_v12  ;;  %v11798_v12 = vld [vmem:[#allocation10_spill] sm:$0xff] }
 0x2ae   :  { %2195 = vmatpush1.bf16.msra.mxu1 %v5987_v63 }
 0x2af   :  { %2196 = vmatprep.subr.bf16.mxu1 %v5996_v25  ;;  %v910_v25 = vld [vmem:[%s11602_s3 + $0x3d8] sm:$0xff] }
 0x2b0   :  { %v6036_v28 = vcombine.high %v910_v25, %v914_v41 }
 0x2b1   :  { %2066 = vmatmul.mubr.bf16.gmra.mrb[148].mxu1 %v11795_v49 }
 0x2b2   :  { %2075 = vmatprep.mubr.bf16.mxu1 %v11796_v42  ;;  %2197 = vmatpush1.bf16.msra.mxu1 %v5995_v53  ;;  %v1741_v58 = vpop.f32.mrb[44].mxu1 }
 0x2b3   :  { %2198 = vmatprep.subr.bf16.mxu1 %v6004_v47  ;;  %v9995_v51 = vadd.f32 %v1741_v58, %v9466_v4  ;;  %v1743_v17 = vpop.f32.mrb[45].mxu1 }
 0x2b4   :  { %v9998_v9 = vadd.f32 %v1743_v17, %v9469_v5  ;;  %v1745_v50 = vpop.f32.mrb[46].mxu1 }
 0x2b5   :  { %v6213_v61 = vmul.f32 -1.442695, %v9995_v51  ;;  %v10002_v16 = vadd.f32 %v1745_v50, %v9466_v4  ;;  %v1747_v55 = vpop.f32.mrb[47].mxu1 }
 0x2b6   :  { %2199 = vmatpush1.bf16.msra.mxu1 %v6003_v34  ;;  %v6214_v45 = vmul.f32 -1.442695, %v9998_v9  ;;  %v10006_v2 = vadd.f32 %v1747_v55, %v9469_v5 }
 0x2b7   :  { %2200 = vmatprep.subr.bf16.mxu1 %v6012_v8  ;;  %7109 = vpow2.f32 %v6213_v61  ;;  %v6221_v20 = vmul.f32 -1.442695, %v10002_v16  ;;  %v6035_v61 = vcombine.low %v910_v25, %v914_v41 }
 0x2b8   :  { %7111 = vpow2.f32 %v6214_v45  ;;  %v6222_v11 = vmul.f32 -1.442695, %v10006_v2 }
 0x2b9   :  { %2076 = vmatmul.mubr.bf16.gmra.mrb[152].mxu1 %v11797_v1  ;;  %7113 = vpow2.f32 %v6221_v20 }
 0x2ba   :  { %2085 = vmatprep.mubr.bf16.mxu1 %v11798_v12  ;;  %2201 = vmatpush1.bf16.msra.mxu1 %v6011_v15  ;;  %7115 = vpow2.f32 %v6222_v11  ;;  %v1751_v63 = vpop.f32.mrb[48].mxu1 }
 0x2bb   :  { %2202 = vmatprep.subr.bf16.mxu1 %v6020_v3  ;;  %v10025_v60 = vadd.f32 %v1751_v63, %v9466_v4  ;;  %v1753_v53 = vpop.f32.mrb[49].mxu1 }
 0x2bc   :  { %v10028_v47 = vadd.f32 %v1753_v53, %v9469_v5  ;;  %v1755_v46 = vpop.f32.mrb[50].mxu1 }
 0x2bd   :  { %v6229_v34 = vmul.f32 -1.442695, %v10025_v60  ;;  %v10032_v8 = vadd.f32 %v1755_v46, %v9466_v4  ;;  %v1757_v58 = vpop.f32.mrb[51].mxu1 }
 0x2be   :  { %2203 = vmatpush1.bf16.msra.mxu1 %v6019_v52  ;;  %v6230_v22 = vmul.f32 -1.442695, %v10028_v47  ;;  %v10036_v17 = vadd.f32 %v1757_v58, %v9469_v5 }
 0x2bf   :  { %2204 = vmatprep.subr.bf16.mxu1 %v6028_v13  ;;  %7117 = vpow2.f32 %v6229_v34  ;;  %v6237_v50 = vmul.f32 -1.442695, %v10032_v8 }
 0x2c0   :  { %7119 = vpow2.f32 %v6230_v22  ;;  %v6238_v15 = vmul.f32 -1.442695, %v10036_v17 }
 0x2c1   :  { %2086 = vmatmul.mubr.bf16.gmra.mrb[156].mxu1 %v9153_v48  ;;  %v7110_v55 = vpop.eup %7109  ;;  %7121 = vpow2.f32 %v6237_v50 }
 0x2c2   :  { %2095 = vmatprep.mubr.bf16.mxu1 %v9156_v37  ;;  %2205 = vmatpush1.bf16.msra.mxu1 %v6027_v24  ;;  %v7112_v3 = vpop.eup %7111  ;;  %v3313_v45 = vadd.f32 1.0, %v7110_v55  ;;  %7123 = vpow2.f32 %v6238_v15  ;;  %v1761_v36 = vpop.f32.mrb[52].mxu1 }
 0x2c3   :  { %2206 = vmatprep.subr.bf16.mxu1 %v6036_v28  ;;  %v7114_v59 = vpop.eup %7113  ;;  %v3314_v20 = vadd.f32 1.0, %v7112_v3  ;;  %v10043_v11 = vadd.f32 %v1761_v36, %v9466_v4  ;;  %v1763_v52 = vpop.f32.mrb[53].mxu1 }
 0x2c4   :  { %v7116_v13 = vpop.eup %7115  ;;  %7125 = vrcp.f32 %v3313_v45  ;;  %v3321_v63 = vadd.f32 1.0, %v7114_v59  ;;  %v10046_v53 = vadd.f32 %v1763_v52, %v9469_v5  ;;  %v1765_v25 = vpop.f32.mrb[54].mxu1 }
 0x2c5   :  { %7127 = vrcp.f32 %v3314_v20  ;;  %v3322_v41 = vadd.f32 1.0, %v7116_v13  ;;  %v6245_v46 = vmul.f32 -1.442695, %v10043_v11  ;;  %v10050_v24 = vadd.f32 %v1765_v25, %v9466_v4  ;;  %v1767_v34 = vpop.f32.mrb[55].mxu1 }
 0x2c6   :  { %2207 = vmatpush1.bf16.msra.mxu1 %v6035_v61  ;;  %7129 = vrcp.f32 %v3321_v63  ;;  %v6246_v58 = vmul.f32 -1.442695, %v10046_v53  ;;  %v10054_v28 = vadd.f32 %v1767_v34, %v9469_v5 }
 0x2c7   :  { %7131 = vrcp.f32 %v3322_v41  ;;  %v6253_v22 = vmul.f32 -1.442695, %v10050_v24 }
 0x2c8   :  { %7133 = vpow2.f32 %v6245_v46  ;;  %v6254_v50 = vmul.f32 -1.442695, %v10054_v28 }
 0x2c9   :  { %2096 = vmatmul.mubr.bf16.gmra.mrb[160].mxu1 %v9210_v54  ;;  %v7118_v15 = vpop.eup %7117  ;;  %7135 = vpow2.f32 %v6246_v58 }
 0x2ca   :  { %2105 = vmatprep.mubr.bf16.mxu1 %v9213_v30  ;;  %v7120_v61 = vpop.eup %7119  ;;  %v3329_v55 = vadd.f32 1.0, %v7118_v15  ;;  %7137 = vpow2.f32 %v6253_v22 }
 0x2cb   :  { %v1771_v3 = vpop.f32.mrb[56].mxu1  ;;  %v7122_v45 = vpop.eup %7121  ;;  %v3330_v36 = vadd.f32 1.0, %v7120_v61  ;;  %7139 = vpow2.f32 %v6254_v50 }
 0x2cc   :  { %v10061_v59 = vadd.f32 %v1771_v3, %v9466_v4  ;;  %v1773_v20 = vpop.f32.mrb[57].mxu1  ;;  %v7124_v52 = vpop.eup %7123  ;;  %7141 = vrcp.f32 %v3329_v55  ;;  %v3337_v13 = vadd.f32 1.0, %v7122_v45 }
 0x2cd   :  { %v10064_v63 = vadd.f32 %v1773_v20, %v9469_v5  ;;  %v1775_v25 = vpop.f32.mrb[58].mxu1  ;;  %7143 = vrcp.f32 %v3330_v36  ;;  %v3338_v41 = vadd.f32 1.0, %v7124_v52 }
 0x2ce   :  { %v6261_v46 = vmul.f32 -1.442695, %v10061_v59  ;;  %v10068_v34 = vadd.f32 %v1775_v25, %v9466_v4  ;;  %v1777_v58 = vpop.f32.mrb[59].mxu1  ;;  %v7126_v22 = vpop.eup %7125  ;;  %7145 = vrcp.f32 %v3337_v13 }
 0x2cf   :  { %v6262_v50 = vmul.f32 -1.442695, %v10064_v63  ;;  %v10072_v15 = vadd.f32 %v1777_v58, %v9469_v5  ;;  %v7128_v61 = vpop.eup %7127  ;;  %7147 = vrcp.f32 %v3338_v41  ;;  %v4081_v20 = vmul.f32 %v7126_v22, %v9995_v51 }
 0x2d0   :  { %v6269_v55 = vmul.f32 -1.442695, %v10068_v34  ;;  %v7130_v3 = vpop.eup %7129  ;;  %7149 = vpow2.f32 %v6261_v46  ;;  %v4082_v25 = vmul.f32 %v7128_v61, %v9998_v9 }
 0x2d1   :  { %2106 = vmatmul.mubr.bf16.gmra.mrb[164].mxu1 %v9240_v21  ;;  %v6270_v45 = vmul.f32 -1.442695, %v10072_v15  ;;  %v7132_v36 = vpop.eup %7131  ;;  %v4089_v52 = vmul.f32 %v7130_v3, %v10002_v16  ;;  %7151 = vpow2.f32 %v6262_v50  ;;  %v11799_v21 = vld [vmem:[#allocation33_spill] sm:$0xff] }
 0x2d2   :  { %2115 = vmatprep.mubr.bf16.mxu1 %v9243_v19  ;;  %v7134_v13 = vpop.eup %7133  ;;  %v4090_v41 = vmul.f32 %v7132_v36, %v10006_v2  ;;  %7153 = vpow2.f32 %v6269_v55  ;;  %v927_v30 = vsub.s32 2, %v11799_v21  ;;  %v931_v2 = vsub.s32 3, %v11799_v21 }
 0x2d3   :  { %v7136_v46 = vpop.eup %7135  ;;  %v3345_v54 = vadd.f32 1.0, %v7134_v13  ;;  %7155 = vpow2.f32 %v6270_v45  ;;  %v4249_v51 = vpack.c.bf16 %v4089_v52, %v4081_v20 }
 0x2d4   :  { %v1781_v58 = vpop.f32.mrb[60].mxu1  ;;  %v7138_v22 = vpop.eup %7137  ;;  %v3346_v16 = vadd.f32 1.0, %v7136_v46  ;;  %v4250_v61 = vpack.c.bf16 %v4090_v41, %v4082_v25 }
 0x2d5   :  { %v10084_v19 = vadd.f32 %v1781_v58, %v9466_v4  ;;  %v1783_v37 = vpop.f32.mrb[61].mxu1  ;;  %v7140_v55 = vpop.eup %7139  ;;  %7157 = vrcp.f32 %v3345_v54  ;;  %v3353_v3 = vadd.f32 1.0, %v7138_v22 }
 0x2d6   :  { %v10087_v50 = vadd.f32 %v1783_v37, %v9469_v5  ;;  %v1785_v9 = vpop.f32.mrb[62].mxu1  ;;  %v7142_v58 = vpop.eup %7141  ;;  %7159 = vrcp.f32 %v3346_v16  ;;  %v3354_v20 = vadd.f32 1.0, %v7140_v55  ;;  %5211 = vmatprep.mubr.bf16.mxu0 %v4250_v61 }
 0x2d7   :  { %v6277_v36 = vmul.f32 -1.442695, %v10084_v19  ;;  %v10092_v45 = vadd.f32 %v1785_v9, %v9466_v4  ;;  %v1787_v13 = vpop.f32.mrb[63].mxu1  ;;  %v7144_v25 = vpop.eup %7143  ;;  %7161 = vrcp.f32 %v3353_v3  ;;  %5212 = vmatmul.mubr.bf16.gmra.mrb[44].mxu0 %v4249_v51  ;;  %v7957_v4 = vld [vmem:[%s11606_s4] sm:$0xff]  ;;  %v4097_v9 = vmul.f32 %v7142_v58, %v10025_v60 }
 0x2d8   :  { %v6278_v52 = vmul.f32 -1.442695, %v10087_v50  ;;  %v10096_v37 = vadd.f32 %v1787_v13, %v9469_v5  ;;  %v10103_v41 = vrot.slane %v7957_v4, %v927_v30  ;;  %v7146_v46 = vpop.eup %7145  ;;  %7163 = vrcp.f32 %v3354_v20 }
 0x2d9   :  { %v6285_v54 = vmul.f32 -1.442695, %v10092_v45  ;;  %2116 = vmatmul.mubr.bf16.gmra.mrb[168].mxu1 %v9262_v7  ;;  %v10107_v5 = vrot.slane %v7957_v4, %v931_v2  ;;  %v7148_v16 = vpop.eup %7147  ;;  %v4105_v61 = vmul.f32 %v7146_v46, %v10032_v8  ;;  %7165 = vpow2.f32 %v6277_v36 }
 0x2da   :  { %v6286_v22 = vmul.f32 -1.442695, %v10096_v37  ;;  %2125 = vmatprep.mubr.bf16.mxu1 %v9333_v62  ;;  %v7150_v51 = vpop.eup %7149  ;;  %v4098_v55 = vmul.f32 %v7144_v25, %v10028_v47  ;;  %v4106_v30 = vmul.f32 %v7148_v16, %v10036_v17  ;;  %7167 = vpow2.f32 %v6278_v52 }
 0x2db   :  { %v7152_v13 = vpop.eup %7151  ;;  %v3361_v20 = vadd.f32 1.0, %v7150_v51  ;;  %7169 = vpow2.f32 %v6285_v54  ;;  %v4257_v4 = vpack.c.bf16 %v4105_v61, %v4097_v9 }
 0x2dc   :  { %v1824_v3 = vpop.f32.mrb[64].mxu1  ;;  %v7154_v7 = vpop.eup %7153  ;;  %v3362_v60 = vadd.f32 1.0, %v7152_v13  ;;  %7171 = vpow2.f32 %v6286_v22  ;;  %v4258_v47 = vpack.c.bf16 %v4106_v30, %v4098_v55 }
 0x2dd   :  { %v10114_v62 = vadd.f32 %v1824_v3, %v10103_v41  ;;  %v1826_v2 = vpop.f32.mrb[65].mxu1  ;;  %v7156_v58 = vpop.eup %7155  ;;  %7173 = vrcp.f32 %v3361_v20  ;;  %v3369_v17 = vadd.f32 1.0, %v7154_v7 }
 0x2de   :  { %v10117_v8 = vadd.f32 %v1826_v2, %v10107_v5  ;;  %v1828_v36 = vpop.f32.mrb[66].mxu1  ;;  %7175 = vrcp.f32 %v3362_v60  ;;  %v3370_v46 = vadd.f32 1.0, %v7156_v58  ;;  %5221 = vmatprep.mubr.bf16.mxu0 %v4258_v47 }
 0x2df   :  { %v6039_v52 = vmul.f32 -1.442695, %v10114_v62  ;;  %v10121_v25 = vadd.f32 %v1828_v36, %v10103_v41  ;;  %v1830_v54 = vpop.f32.mrb[67].mxu1  ;;  %v7158_v9 = vpop.eup %7157  ;;  %7177 = vrcp.f32 %v3369_v17  ;;  %5222 = vmatmul.mubr.bf16.gmra.mrb[48].mxu0 %v4257_v4 }
 0x2e0   :  { %v6040_v16 = vmul.f32 -1.442695, %v10117_v8  ;;  %v10125_v22 = vadd.f32 %v1830_v54, %v10107_v5  ;;  %v7160_v7 = vpop.eup %7159  ;;  %7179 = vrcp.f32 %v3370_v46  ;;  %v4113_v3 = vmul.f32 %v7158_v9, %v10043_v11 }
 0x2e1   :  { %v6047_v61 = vmul.f32 -1.442695, %v10121_v25  ;;  %2126 = vmatmul.mubr.bf16.gmra.mrb[172].mxu1 %v9335_v26  ;;  %v7162_v55 = vpop.eup %7161  ;;  %7181 = vpow2.f32 %v6039_v52  ;;  %v4114_v60 = vmul.f32 %v7160_v7, %v10046_v53 }
 0x2e2   :  { %v6048_v51 = vmul.f32 -1.442695, %v10125_v22  ;;  %2135 = vmatprep.mubr.bf16.mxu1 %v9351_v35  ;;  %v7164_v30 = vpop.eup %7163  ;;  %v4121_v13 = vmul.f32 %v7162_v55, %v10050_v24  ;;  %7183 = vpow2.f32 %v6040_v16 }
 0x2e3   :  { %v7166_v2 = vpop.eup %7165  ;;  %v4122_v4 = vmul.f32 %v7164_v30, %v10054_v28  ;;  %7185 = vpow2.f32 %v6047_v61 }
 0x2e4   :  { %v1834_v20 = vpop.f32.mrb[68].mxu1  ;;  %v7168_v58 = vpop.eup %7167  ;;  %v3377_v17 = vadd.f32 1.0, %v7166_v2  ;;  %7187 = vpow2.f32 %v6048_v51  ;;  %v4265_v24 = vpack.c.bf16 %v4121_v13, %v4113_v3 }
 0x2e5   :  { %v10136_v36 = vadd.f32 %v1834_v20, %v10103_v41  ;;  %v1836_v47 = vpop.f32.mrb[69].mxu1  ;;  %v7170_v54 = vpop.eup %7169  ;;  %v3378_v46 = vadd.f32 1.0, %v7168_v58  ;;  %v4266_v28 = vpack.c.bf16 %v4122_v4, %v4114_v60 }
 0x2e6   :  { %v10139_v52 = vadd.f32 %v1836_v47, %v10107_v5  ;;  %v1838_v11 = vpop.f32.mrb[70].mxu1  ;;  %v7172_v9 = vpop.eup %7171  ;;  %7189 = vrcp.f32 %v3377_v17  ;;  %v3385_v61 = vadd.f32 1.0, %v7170_v54 }
 0x2e7   :  { %v10142_v16 = vadd.f32 %v1838_v11, %v10103_v41  ;;  %v1840_v53 = vpop.f32.mrb[71].mxu1  ;;  %v6055_v7 = vmul.f32 -1.442695, %v10136_v36  ;;  %v7174_v51 = vpop.eup %7173  ;;  %7191 = vrcp.f32 %v3378_v46  ;;  %v3386_v30 = vadd.f32 1.0, %v7172_v9  ;;  %5231 = vmatprep.mubr.bf16.mxu0 %v4266_v28 }
 0x2e8   :  { %v10146_v55 = vadd.f32 %v1840_v53, %v10107_v5  ;;  %v6056_v3 = vmul.f32 -1.442695, %v10139_v52  ;;  %v7176_v13 = vpop.eup %7175  ;;  %7193 = vrcp.f32 %v3385_v61  ;;  %5232 = vmatmul.mubr.bf16.gmra.mrb[52].mxu0 %v4265_v24  ;;  %v4129_v47 = vmul.f32 %v7174_v51, %v10061_v59 }
 0x2e9   :  { %2136 = vmatmul.mubr.bf16.gmra.mrb[176].mxu1 %v9353_v38  ;;  %v6063_v20 = vmul.f32 -1.442695, %v10142_v16  ;;  %v7178_v2 = vpop.eup %7177  ;;  %7195 = vrcp.f32 %v3386_v30 }
 0x2ea   :  { %2145 = vmatprep.mubr.bf16.mxu1 %v9369_v0  ;;  %v6064_v60 = vmul.f32 -1.442695, %v10146_v55  ;;  %v7180_v4 = vpop.eup %7179  ;;  %v4137_v58 = vmul.f32 %v7178_v2, %v10068_v34  ;;  %7197 = vpow2.f32 %v6055_v7  ;;  %v4130_v34 = vmul.f32 %v7176_v13, %v10064_v63 }
 0x2eb   :  { %v7182_v11 = vpop.eup %7181  ;;  %v4138_v54 = vmul.f32 %v7180_v4, %v10072_v15  ;;  %7199 = vpow2.f32 %v6056_v3 }
 0x2ec   :  { %v1844_v17 = vpop.f32.mrb[72].mxu1  ;;  %v7184_v53 = vpop.eup %7183  ;;  %v3139_v28 = vadd.f32 1.0, %v7182_v11  ;;  %7201 = vpow2.f32 %v6063_v20  ;;  %v4273_v59 = vpack.c.bf16 %v4137_v58, %v4129_v47 }
 0x2ed   :  { %v10157_v46 = vadd.f32 %v1844_v17, %v10103_v41  ;;  %v1846_v24 = vpop.f32.mrb[73].mxu1  ;;  %v7186_v51 = vpop.eup %7185  ;;  %v3140_v7 = vadd.f32 1.0, %v7184_v53  ;;  %7203 = vpow2.f32 %v6064_v60  ;;  %v4274_v58 = vpack.c.bf16 %v4138_v54, %v4130_v34 }
 0x2ee   :  { %v10160_v9 = vadd.f32 %v1846_v24, %v10107_v5  ;;  %v1848_v61 = vpop.f32.mrb[74].mxu1  ;;  %v7188_v3 = vpop.eup %7187  ;;  %7205 = vrcp.f32 %v3139_v28  ;;  %v3147_v2 = vadd.f32 1.0, %v7186_v51 }
 0x2ef   :  { %v10164_v15 = vadd.f32 %v1848_v61, %v10103_v41  ;;  %v1850_v30 = vpop.f32.mrb[75].mxu1  ;;  %v6071_v4 = vmul.f32 -1.442695, %v10157_v46  ;;  %7207 = vrcp.f32 %v3140_v7  ;;  %v3148_v17 = vadd.f32 1.0, %v7188_v3  ;;  %5241 = vmatprep.mubr.bf16.mxu0 %v4274_v58 }
 0x2f0   :  { %v10168_v20 = vadd.f32 %v1850_v30, %v10107_v5  ;;  %v6072_v47 = vmul.f32 -1.442695, %v10160_v9  ;;  %v7190_v63 = vpop.eup %7189  ;;  %7209 = vrcp.f32 %v3147_v2  ;;  %5242 = vmatmul.mubr.bf16.gmra.mrb[56].mxu0 %v4273_v59 }
 0x2f1   :  { %2146 = vmatmul.mubr.bf16.gmra.mrb[180].mxu1 %v9371_v40  ;;  %v6079_v13 = vmul.f32 -1.442695, %v10164_v15  ;;  %v7192_v60 = vpop.eup %7191  ;;  %7211 = vrcp.f32 %v3148_v17 }
 0x2f2   :  { %2155 = vmatprep.mubr.bf16.mxu1 %v9387_v44  ;;  %v6080_v11 = vmul.f32 -1.442695, %v10168_v20  ;;  %v7194_v24 = vpop.eup %7193  ;;  %7213 = vpow2.f32 %v6071_v4  ;;  %v4146_v7 = vmul.f32 %v7192_v60, %v10087_v50  ;;  %v4145_v4 = vmul.f32 %v7190_v63, %v10084_v19 }
 0x2f3   :  { %v7196_v28 = vpop.eup %7195  ;;  %v4153_v54 = vmul.f32 %v7194_v24, %v10092_v45  ;;  %7215 = vpow2.f32 %v6072_v47 }
 0x2f4   :  { %v1854_v53 = vpop.f32.mrb[76].mxu1  ;;  %v7198_v34 = vpop.eup %7197  ;;  %v4154_v30 = vmul.f32 %v7196_v28, %v10096_v37  ;;  %7217 = vpow2.f32 %v6079_v13 }
 0x2f5   :  { %v10177_v61 = vadd.f32 %v1854_v53, %v10103_v41  ;;  %v1856_v51 = vpop.f32.mrb[77].mxu1  ;;  %v7200_v59 = vpop.eup %7199  ;;  %v3155_v17 = vadd.f32 1.0, %v7198_v34  ;;  %7219 = vpow2.f32 %v6080_v11  ;;  %v4281_v19 = vpack.c.bf16 %v4153_v54, %v4145_v4 }
 0x2f6   :  { %v10182_v3 = vadd.f32 %v1856_v51, %v10107_v5  ;;  %v1858_v2 = vpop.f32.mrb[78].mxu1  ;;  %v7202_v58 = vpop.eup %7201  ;;  %v3156_v24 = vadd.f32 1.0, %v7200_v59  ;;  %v4282_v37 = vpack.c.bf16 %v4154_v30, %v4146_v7 }
 0x2f7   :  { %v10186_v45 = vadd.f32 %v1858_v2, %v10103_v41  ;;  %v1860_v47 = vpop.f32.mrb[79].mxu1  ;;  %v7204_v13 = vpop.eup %7203  ;;  %7221 = vrcp.f32 %v3155_v17  ;;  %v3163_v60 = vadd.f32 1.0, %v7202_v58  ;;  %v6087_v53 = vmul.f32 -1.442695, %v10177_v61 }
 0x2f8   :  { %v10189_v50 = vadd.f32 %v1860_v47, %v10107_v5  ;;  %v7206_v63 = vpop.eup %7205  ;;  %7223 = vrcp.f32 %v3156_v24  ;;  %v3164_v11 = vadd.f32 1.0, %v7204_v13  ;;  %v6088_v28 = vmul.f32 -1.442695, %v10182_v3  ;;  %5251 = vmatprep.mubr.bf16.mxu0 %v4282_v37 }
 0x2f9   :  { %2156 = vmatmul.mubr.bf16.gmra.mrb[184].mxu1 %v9389_v33  ;;  %v7208_v51 = vpop.eup %7207  ;;  %7225 = vrcp.f32 %v3163_v60  ;;  %v6095_v34 = vmul.f32 -1.442695, %v10186_v45  ;;  %5252 = vmatmul.mubr.bf16.gmra.mrb[60].mxu0 %v4281_v19  ;;  %v3907_v54 = vmul.f32 %v7206_v63, %v10114_v62 }
 0x2fa   :  { %2165 = vmatprep.mubr.bf16.mxu1 %v9403_v10  ;;  %v7210_v7 = vpop.eup %7209  ;;  %7227 = vrcp.f32 %v3164_v11  ;;  %v6096_v30 = vmul.f32 -1.442695, %v10189_v50  ;;  %v3908_v19 = vmul.f32 %v7208_v51, %v10117_v8  ;;  %v6773_v8 = vld [vmem:[%s11605_s5 + $0x200] ss:$8 sps:$4 sm:$0xff]  }
 0x2fb   :  { %v7212_v59 = vpop.eup %7211  ;;  %v3915_v4 = vmul.f32 %v7210_v7, %v10121_v25  ;;  %7229 = vpow2.f32 %v6087_v53 }
 0x2fc   :  { %v1864_v2 = vpop.f32.mrb[80].mxu1  ;;  %v7214_v58 = vpop.eup %7213  ;;  %v3916_v24 = vmul.f32 %v7212_v59, %v10125_v22  ;;  %7231 = vpow2.f32 %v6088_v28 }
 0x2fd   :  { %v10200_v17 = vadd.f32 %v1864_v2, %v10103_v41  ;;  %v1866_v47 = vpop.f32.mrb[81].mxu1  ;;  %v7216_v60 = vpop.eup %7215  ;;  %v4163_v11 = vpack.c.bf16 %v3915_v4, %v3907_v54  ;;  %v3171_v62 = vadd.f32 1.0, %v7214_v58  ;;  %7233 = vpow2.f32 %v6095_v34 }
 0x2fe   :  { %v10204_v37 = vadd.f32 %v1866_v47, %v10107_v5  ;;  %v1868_v13 = vpop.f32.mrb[82].mxu1  ;;  %v7218_v53 = vpop.eup %7217  ;;  %v3172_v63 = vadd.f32 1.0, %v7216_v60  ;;  %7235 = vpow2.f32 %v6096_v30  ;;  %v4164_v47 = vpack.c.bf16 %v3916_v24, %v3908_v19  ;;  %v6778_v30 = vld [vmem:[%s11605_s5 + $0x214] ss:$8 sps:$4 sm:$0xff]  }
 0x2ff   :  { %v1870_v25 = vpop.f32.mrb[83].mxu1  ;;  %v6103_v7 = vmul.f32 -1.442695, %v10200_v17  ;;  %v10209_v2 = vadd.f32 %v1868_v13, %v10103_v41  ;;  %v7220_v22 = vpop.eup %7219  ;;  %7237 = vrcp.f32 %v3171_v62  ;;  %v3179_v28 = vadd.f32 1.0, %v7218_v53  ;;  %v6776_v62 = vld [vmem:[%s11605_s5 + $0x210] ss:$8 sps:$4 sm:$0xff]  }
 0x300   :  { %v10212_v59 = vadd.f32 %v1870_v25, %v10107_v5  ;;  %7239 = vrcp.f32 %v3172_v63  ;;  %v3180_v51 = vadd.f32 1.0, %v7220_v22  ;;  %v6104_v34 = vmul.f32 -1.442695, %v10204_v37  ;;  %5294 = vmatprep.mubr.bf16.mxu0 %v4164_v47 }
 0x301   :  { %2166 = vmatmul.mubr.bf16.gmra.mrb[188].mxu1 %v9405_v31  ;;  %v7222_v54 = vpop.eup %7221  ;;  %7241 = vrcp.f32 %v3179_v28  ;;  %v6111_v4 = vmul.f32 -1.442695, %v10209_v2  ;;  %5295 = vmatmul.mubr.bf16.vlgmr.msra.gmra.mrb[0].mxu0 %v4163_v11 }
 0x302   :  { %2208 = vmatprep.mubr.bf16.mxu1 %v8868_v18  ;;  %v7224_v58 = vpop.eup %7223  ;;  %7243 = vrcp.f32 %v3180_v51  ;;  %v6112_v24 = vmul.f32 -1.442695, %v10212_v59  ;;  %5456 = vmatpush1.bf16.msra.mxu0 %v6773_v8 }
 0x303   :  { %v7226_v60 = vpop.eup %7225  ;;  %7245 = vpow2.f32 %v6103_v7  ;;  %v3924_v53 = vmul.f32 %v7224_v58, %v10139_v52  ;;  %5457 = vmatprep.subr.bf16.mxu0 %v6778_v30  ;;  %v6781_v7 = vld [vmem:[%s11605_s5 + $0x224] ss:$8 sps:$4 sm:$0xff]  }
 0x304   :  { %v1874_v13 = vpop.f32.mrb[84].mxu1  ;;  %v7228_v25 = vpop.eup %7227  ;;  %v3931_v63 = vmul.f32 %v7226_v60, %v10142_v16  ;;  %7247 = vpow2.f32 %v6104_v34  ;;  %v3923_v34 = vmul.f32 %v7222_v54, %v10136_v36 }
 0x305   :  { %v10226_v18 = vadd.f32 %v1874_v13, %v10103_v41  ;;  %v1876_v19 = vpop.f32.mrb[85].mxu1  ;;  %v7230_v28 = vpop.eup %7229  ;;  %v3932_v47 = vmul.f32 %v7228_v25, %v10146_v55  ;;  %7249 = vpow2.f32 %v6111_v4  ;;  %v6779_v55 = vld [vmem:[%s11605_s5 + $0x220] ss:$8 sps:$4 sm:$0xff]  }
 0x306   :  { %v10234_v11 = vadd.f32 %v1876_v19, %v10107_v5  ;;  %v1878_v22 = vpop.f32.mrb[86].mxu1  ;;  %v7232_v51 = vpop.eup %7231  ;;  %v3187_v58 = vadd.f32 1.0, %v7230_v28  ;;  %7251 = vpow2.f32 %v6112_v24  ;;  %5458 = vmatpush1.bf16.msra.mxu0 %v6776_v62  ;;  %v4171_v54 = vpack.c.bf16 %v3931_v63, %v3923_v34  ;;  %v6784_v24 = vld [vmem:[%s11605_s5 + $0x234] ss:$8 sps:$4 sm:$0xff]  }
 0x307   :  { %v6119_v8 = vmul.f32 -1.442695, %v10226_v18  ;;  %v10242_v52 = vadd.f32 %v1878_v22, %v10103_v41  ;;  %v1880_v16 = vpop.f32.mrb[87].mxu1  ;;  %v7234_v13 = vpop.eup %7233  ;;  %v3188_v60 = vadd.f32 1.0, %v7232_v51  ;;  %v4172_v19 = vpack.c.bf16 %v3932_v47, %v3924_v53  ;;  %5459 = vmatprep.subr.bf16.mxu0 %v6781_v7 }
 0x308   :  { %v10246_v30 = vadd.f32 %v1880_v16, %v10107_v5  ;;  %v7236_v4 = vpop.eup %7235  ;;  %v3195_v25 = vadd.f32 1.0, %v7234_v13  ;;  %v6120_v36 = vmul.f32 -1.442695, %v10234_v11  ;;  %v6787_v13 = vld [vmem:[%s11605_s5 + $0x244] ss:$8 sps:$4 sm:$0xff]  }
 0x309   :  { %7253 = vpow2.f32 %v6119_v8  ;;  %2209 = vmatmul.mubr.bf16.vlgmr.msra.gmra.mrb[192].mxu1 %v8881_v57  ;;  %v7238_v53 = vpop.eup %7237  ;;  %v3196_v57 = vadd.f32 1.0, %v7236_v4  ;;  %v6127_v62 = vmul.f32 -1.442695, %v10242_v52  ;;  %5304 = vmatprep.mubr.bf16.mxu0 %v4172_v19  ;;  %v6782_v8 = vld [vmem:[%s11605_s5 + $0x230] ss:$8 sps:$4 sm:$0xff]  }
 0x30a   :  { %7255 = vrcp.f32 %v3187_v58  ;;  %2218 = vmatprep.mubr.bf16.mxu1 %v8913_v39  ;;  %v7240_v22 = vpop.eup %7239  ;;  %v6128_v28 = vmul.f32 -1.442695, %v10246_v30  ;;  %5305 = vmatmul.mubr.bf16.gmra.mrb[4].mxu0 %v4171_v54 }
 0x30b   :  { %7257 = vrcp.f32 %v3188_v60  ;;  %v7242_v63 = vpop.eup %7241  ;;  %5460 = vmatpush1.bf16.msra.mxu0 %v6779_v55  ;;  %v3940_v51 = vmul.f32 %v7240_v22, %v10160_v9  ;;  %v6785_v22 = vld [vmem:[%s11605_s5 + $0x240] ss:$8 sps:$4 sm:$0xff]  }
 0x30c   :  { %7259 = vrcp.f32 %v3195_v25  ;;  %v1884_v47 = vpop.f32.mrb[88].mxu1  ;;  %v7244_v16 = vpop.eup %7243  ;;  %v3947_v34 = vmul.f32 %v7242_v63, %v10164_v15  ;;  %5461 = vmatprep.subr.bf16.mxu0 %v6784_v24  ;;  %v3939_v15 = vmul.f32 %v7238_v53, %v10157_v46 }
 0x30d   :  { %7261 = vrcp.f32 %v3196_v57  ;;  %v10260_v39 = vadd.f32 %v1884_v47, %v10103_v41  ;;  %v1886_v7 = vpop.f32.mrb[89].mxu1  ;;  %v7246_v60 = vpop.eup %7245  ;;  %v3948_v19 = vmul.f32 %v7244_v16, %v10168_v20  ;;  %v6790_v47 = vld [vmem:[%s11605_s5 + $0x254] ss:$8 sps:$4 sm:$0xff]  }
 0x30e   :  { %7263 = vpow2.f32 %v6120_v36  ;;  %v1888_v58 = vpop.f32.mrb[90].mxu1  ;;  %v10273_v4 = vadd.f32 %v1886_v7, %v10107_v5  ;;  %v7248_v9 = vpop.eup %7247  ;;  %v3203_v36 = vadd.f32 1.0, %v7246_v60 }
 0x30f   :  { %7265 = vpow2.f32 %v6127_v62  ;;  %v6135_v55 = vmul.f32 -1.442695, %v10260_v39  ;;  %v1890_v25 = vpop.f32.mrb[91].mxu1  ;;  %v10277_v54 = vadd.f32 %v1888_v58, %v10103_v41  ;;  %v7250_v24 = vpop.eup %7249  ;;  %v3204_v57 = vadd.f32 1.0, %v7248_v9  ;;  %5462 = vmatpush1.bf16.msra.mxu0 %v6782_v8 }
 0x310   :  { %7267 = vpow2.f32 %v6128_v28  ;;  %v10280_v20 = vadd.f32 %v1890_v25, %v10107_v5  ;;  %v4180_v62 = vpack.c.bf16 %v3948_v19, %v3940_v51  ;;  %v7252_v46 = vpop.eup %7251  ;;  %v3211_v53 = vadd.f32 1.0, %v7250_v24  ;;  %5463 = vmatprep.subr.bf16.mxu0 %v6787_v13  ;;  %v6788_v19 = vld [vmem:[%s11605_s5 + $0x250] ss:$8 sps:$4 sm:$0xff]  }
 0x311   :  { %7269 = vpow2.f32 %v6135_v55  ;;  %2219 = vmatmul.mubr.bf16.gmra.mrb[196].mxu1 %v8933_v27  ;;  %v4179_v28 = vpack.c.bf16 %v3947_v34, %v3939_v15  ;;  %v3212_v7 = vadd.f32 1.0, %v7252_v46  ;;  %v6136_v27 = vmul.f32 -1.442695, %v10273_v4  ;;  %v6793_v15 = vld [vmem:[%s11605_s5 + $0x264] ss:$8 sps:$4 sm:$0xff]  }
 0x312   :  { %7271 = vrcp.f32 %v3203_v36  ;;  %2228 = vmatprep.mubr.bf16.mxu1 %v8962_v43  ;;  %5314 = vmatprep.mubr.bf16.mxu0 %v4180_v62  ;;  %v6143_v51 = vmul.f32 -1.442695, %v10277_v54  ;;  %v6144_v43 = vmul.f32 -1.442695, %v10280_v20 }
 0x313   :  { %v7254_v63 = vpop.eup %7253  ;;  %7273 = vrcp.f32 %v3204_v57  ;;  %5315 = vmatmul.mubr.bf16.gmra.mrb[8].mxu0 %v4179_v28 }
 0x314   :  { %v7256_v8 = vpop.eup %7255  ;;  %7275 = vrcp.f32 %v3211_v53  ;;  %v3219_v16 = vadd.f32 1.0, %v7254_v63  ;;  %v1894_v34 = vpop.f32.mrb[92].mxu1  ;;  %5464 = vmatpush1.bf16.msra.mxu0 %v6785_v22 }
 0x315   :  { %v7258_v58 = vpop.eup %7257  ;;  %7277 = vrcp.f32 %v3212_v7  ;;  %v10294_v13 = vadd.f32 %v1894_v34, %v10103_v41  ;;  %v1896_v60 = vpop.f32.mrb[93].mxu1  ;;  %v3955_v25 = vmul.f32 %v7256_v8, %v10177_v61  ;;  %5465 = vmatprep.subr.bf16.mxu0 %v6790_v47 }
 0x316   :  { %v7260_v55 = vpop.eup %7259  ;;  %7279 = vrcp.f32 %v3219_v16  ;;  %v1898_v9 = vpop.f32.mrb[94].mxu1  ;;  %v10306_v62 = vadd.f32 %v1896_v60, %v10107_v5  ;;  %v3956_v61 = vmul.f32 %v7258_v58, %v10182_v3 }
 0x317   :  { %v7262_v36 = vpop.eup %7261  ;;  %v3963_v24 = vmul.f32 %v7260_v55, %v10186_v45  ;;  %7281 = vpow2.f32 %v6136_v27  ;;  %v6151_v57 = vmul.f32 -1.442695, %v10294_v13  ;;  %v1900_v22 = vpop.f32.mrb[95].mxu1  ;;  %v10311_v28 = vadd.f32 %v1898_v9, %v10103_v41 }
 0x318   :  { %v7264_v46 = vpop.eup %7263  ;;  %v3964_v53 = vmul.f32 %v7262_v36, %v10189_v50  ;;  %7283 = vpow2.f32 %v6143_v51  ;;  %v10314_v45 = vadd.f32 %v1900_v22, %v10107_v5  ;;  %5466 = vmatpush1.bf16.msra.mxu0 %v6788_v19  ;;  %v6791_v50 = vld [vmem:[%s11605_s5 + $0x260] ss:$8 sps:$4 sm:$0xff]   ;;  %v6152_v34 = vmul.f32 -1.442695, %v10306_v62  ;;  %v6794_v22 = vld [vmem:[%s11605_s5 + $0x270] ss:$8 sps:$4 sm:$0xff]  }
 0x319   :  { %v7266_v47 = vpop.eup %7265  ;;  %v3220_v63 = vadd.f32 1.0, %v7264_v46  ;;  %7285 = vpow2.f32 %v6144_v43  ;;  %2229 = vmatmul.mubr.bf16.gmra.mrb[200].mxu1 %v8993_v6  ;;  %v4187_v7 = vpack.c.bf16 %v3963_v24, %v3955_v25  ;;  %5467 = vmatprep.subr.bf16.mxu0 %v6793_v15  ;;  %v6796_v6 = vld [vmem:[%s11605_s5 + $0x274] ss:$8 sps:$4 sm:$0xff]   ;;  %v6159_v60 = vmul.f32 -1.442695, %v10311_v28 }
 0x31a   :  { %v7268_v27 = vpop.eup %7267  ;;  %v3227_v8 = vadd.f32 1.0, %v7266_v47  ;;  %7287 = vpow2.f32 %v6151_v57  ;;  %v4188_v3 = vpack.c.bf16 %v3964_v53, %v3956_v61  ;;  %2238 = vmatprep.mubr.bf16.mxu1 %v11790_v29  ;;  %v6160_v55 = vmul.f32 -1.442695, %v10314_v45 }
 0x31b   :  { %v7270_v16 = vpop.eup %7269  ;;  %7289 = vrcp.f32 %v3220_v63  ;;  %v3228_v51 = vadd.f32 1.0, %v7268_v27 }
 0x31c   :  { %v7272_v58 = vpop.eup %7271  ;;  %7291 = vrcp.f32 %v3227_v8  ;;  %v3235_v43 = vadd.f32 1.0, %v7270_v16  ;;  %5324 = vmatprep.mubr.bf16.mxu0 %v4188_v3  ;;  %v1904_v29 = vpop.f32.mrb[96].mxu1  ;;  %5468 = vmatpush1.bf16.msra.mxu0 %v6791_v50 }
 0x31d   :  { %v7274_v19 = vpop.eup %7273  ;;  %7293 = vrcp.f32 %v3228_v51  ;;  %5325 = vmatmul.mubr.bf16.gmra.mrb[12].mxu0 %v4187_v7  ;;  %v10328_v25 = vadd.f32 %v1904_v29, %v10103_v41  ;;  %v1906_v9 = vpop.f32.mrb[97].mxu1  ;;  %v3971_v36 = vmul.f32 %v7272_v58, %v10200_v17  ;;  %5469 = vmatprep.subr.bf16.mxu0 %v6796_v6  ;;  %v6799_v17 = vld [vmem:[%s11605_s5 + $0x284] ss:$8 sps:$4 sm:$0xff]  }
 0x31e   :  { %v7276_v15 = vpop.eup %7275  ;;  %7295 = vrcp.f32 %v3235_v43  ;;  %v10332_v24 = vadd.f32 %v1906_v9, %v10107_v5  ;;  %v1908_v57 = vpop.f32.mrb[98].mxu1  ;;  %v3972_v61 = vmul.f32 %v7274_v19, %v10204_v37 }
 0x31f   :  { %v7278_v46 = vpop.eup %7277  ;;  %v3979_v53 = vmul.f32 %v7276_v15, %v10209_v2  ;;  %7297 = vpow2.f32 %v6152_v34  ;;  %v6167_v47 = vmul.f32 -1.442695, %v10328_v25  ;;  %v1910_v63 = vpop.f32.mrb[99].mxu1  ;;  %v10346_v3 = vadd.f32 %v1908_v57, %v10103_v41 }
 0x320   :  { %v7280_v7 = vpop.eup %7279  ;;  %v3980_v27 = vmul.f32 %v7278_v46, %v10212_v59  ;;  %7299 = vpow2.f32 %v6159_v60  ;;  %v6168_v8 = vmul.f32 -1.442695, %v10332_v24  ;;  %v10349_v2 = vadd.f32 %v1910_v63, %v10107_v5  ;;  %5470 = vmatpush1.bf16.msra.mxu0 %v6794_v22  ;;  %v6797_v59 = vld [vmem:[%s11605_s5 + $0x280] ss:$8 sps:$4 sm:$0xff]  }
 0x321   :  { %v7282_v37 = vpop.eup %7281  ;;  %7301 = vpow2.f32 %v6160_v55  ;;  %2239 = vmatmul.mubr.bf16.gmra.mrb[204].mxu1 %v11791_v23  ;;  %v4195_v50 = vpack.c.bf16 %v3979_v53, %v3971_v36  ;;  %5471 = vmatprep.subr.bf16.mxu0 %v6799_v17  ;;  %v6802_v23 = vld [vmem:[%s11605_s5 + $0x294] ss:$8 sps:$4 sm:$0xff]   ;;  %v6175_v29 = vmul.f32 -1.442695, %v10346_v3 }
 0x322   :  { %v7284_v16 = vpop.eup %7283  ;;  %v3236_v51 = vadd.f32 1.0, %v7282_v37  ;;  %7303 = vpow2.f32 %v6167_v47  ;;  %v4196_v34 = vpack.c.bf16 %v3980_v27, %v3972_v61  ;;  %2248 = vmatprep.mubr.bf16.mxu1 %v11792_v14  ;;  %v6176_v9 = vmul.f32 -1.442695, %v10349_v2  ;;  %v6800_v61 = vld [vmem:[%s11605_s5 + $0x290] ss:$8 sps:$4 sm:$0xff]  }
 0x323   :  { %v7286_v6 = vpop.eup %7285  ;;  %v3243_v58 = vadd.f32 1.0, %v7284_v16  ;;  %7305 = vpow2.f32 %v6168_v8  ;;  %v3987_v47 = vmul.f32 %v7280_v7, %v10226_v18  ;;  %v6805_v8 = vld [vmem:[%s11605_s5 + $0x2a4] ss:$8 sps:$4 sm:$0xff]  }
 0x324   :  { %v7288_v43 = vpop.eup %7287  ;;  %7307 = vrcp.f32 %v3236_v51  ;;  %v3244_v60 = vadd.f32 1.0, %v7286_v6  ;;  %5334 = vmatprep.mubr.bf16.mxu0 %v4196_v34  ;;  %v1914_v14 = vpop.f32.mrb[100].mxu1  ;;  %5472 = vmatpush1.bf16.msra.mxu0 %v6797_v59 }
 0x325   :  { %v7290_v19 = vpop.eup %7289  ;;  %7309 = vrcp.f32 %v3243_v58  ;;  %v3251_v55 = vadd.f32 1.0, %v7288_v43  ;;  %5335 = vmatmul.mubr.bf16.gmra.mrb[16].mxu0 %v4195_v50  ;;  %v10362_v15 = vadd.f32 %v1914_v14, %v10103_v41  ;;  %v1916_v36 = vpop.f32.mrb[101].mxu1  ;;  %5473 = vmatprep.subr.bf16.mxu0 %v6802_v23 }
 0x326   :  { %v7292_v57 = vpop.eup %7291  ;;  %7311 = vrcp.f32 %v3244_v60  ;;  %v10365_v22 = vadd.f32 %v1916_v36, %v10107_v5  ;;  %v1918_v46 = vpop.f32.mrb[102].mxu1  ;;  %v3988_v50 = vmul.f32 %v7290_v19, %v10234_v11 }
 0x327   :  { %v7294_v53 = vpop.eup %7293  ;;  %v3995_v63 = vmul.f32 %v7292_v57, %v10242_v52  ;;  %7313 = vrcp.f32 %v3251_v55  ;;  %v6183_v17 = vmul.f32 -1.442695, %v10362_v15  ;;  %v1920_v27 = vpop.f32.mrb[103].mxu1  ;;  %v10380_v52 = vadd.f32 %v1918_v46, %v10103_v41 }
 0x328   :  { %v7296_v37 = vpop.eup %7295  ;;  %v3996_v16 = vmul.f32 %v7294_v53, %v10246_v30  ;;  %7315 = vpow2.f32 %v6175_v29  ;;  %v6184_v51 = vmul.f32 -1.442695, %v10365_v22  ;;  %v10384_v6 = vadd.f32 %v1920_v27, %v10107_v5  ;;  %5474 = vmatpush1.bf16.msra.mxu0 %v6800_v61  ;;  %v6803_v30 = vld [vmem:[%s11605_s5 + $0x2a0] ss:$8 sps:$4 sm:$0xff]  }
 0x329   :  { %v7298_v18 = vpop.eup %7297  ;;  %7317 = vpow2.f32 %v6176_v9  ;;  %2249 = vmatmul.mubr.bf16.gmra.mrb[208].mxu1 %v11793_v56  ;;  %v4203_v7 = vpack.c.bf16 %v3995_v63, %v3987_v47  ;;  %5475 = vmatprep.subr.bf16.mxu0 %v6805_v8  ;;  %v6808_v56 = vld [vmem:[%s11605_s5 + $0x2b4] ss:$8 sps:$4 sm:$0xff]   ;;  %v6191_v19 = vmul.f32 -1.442695, %v10380_v52  ;;  %v6806_v47 = vld [vmem:[%s11605_s5 + $0x2b0] ss:$8 sps:$4 sm:$0xff]  }
 0x32a   :  { %v7300_v34 = vpop.eup %7299  ;;  %v3252_v59 = vadd.f32 1.0, %v7298_v18  ;;  %7319 = vpow2.f32 %v6183_v17  ;;  %v4204_v11 = vpack.c.bf16 %v3996_v16, %v3988_v50  ;;  %2258 = vmatprep.mubr.bf16.mxu1 %v11794_v32  ;;  %v6192_v46 = vmul.f32 -1.442695, %v10384_v6  ;;  %v6811_v8 = vld [vmem:[%s11605_s5 + $0x2c4] ss:$8 sps:$4 sm:$0xff]  }
 0x32b   :  { %v7302_v58 = vpop.eup %7301  ;;  %v3259_v23 = vadd.f32 1.0, %v7300_v34  ;;  %7321 = vpow2.f32 %v6184_v51  ;;  %v4003_v16 = vmul.f32 %v7296_v37, %v10260_v39 }
 0x32c   :  { %v7304_v43 = vpop.eup %7303  ;;  %7323 = vrcp.f32 %v3252_v59  ;;  %v3260_v60 = vadd.f32 1.0, %v7302_v58  ;;  %5344 = vmatprep.mubr.bf16.mxu0 %v4204_v11  ;;  %v1924_v29 = vpop.f32.mrb[104].mxu1  ;;  %5476 = vmatpush1.bf16.msra.mxu0 %v6803_v30 }
 0x32d   :  { %v7306_v14 = vpop.eup %7305  ;;  %7325 = vrcp.f32 %v3259_v23  ;;  %v3267_v32 = vadd.f32 1.0, %v7304_v43  ;;  %5345 = vmatmul.mubr.bf16.gmra.mrb[20].mxu0 %v4203_v7  ;;  %v10395_v55 = vadd.f32 %v1924_v29, %v10103_v41  ;;  %v1926_v9 = vpop.f32.mrb[105].mxu1  ;;  %5477 = vmatprep.subr.bf16.mxu0 %v6808_v56  ;;  %v6814_v43 = vld [vmem:[%s11605_s5 + $0x2d4] ss:$8 sps:$4 sm:$0xff]  }
 0x32e   :  { %v7308_v36 = vpop.eup %7307  ;;  %7327 = vrcp.f32 %v3260_v60  ;;  %v3268_v57 = vadd.f32 1.0, %v7306_v14  ;;  %v10399_v61 = vadd.f32 %v1926_v9, %v10107_v5  ;;  %v1928_v53 = vpop.f32.mrb[106].mxu1 }
 0x32f   :  { %v7310_v63 = vpop.eup %7309  ;;  %7329 = vrcp.f32 %v3267_v32  ;;  %v6199_v17 = vmul.f32 -1.442695, %v10395_v55  ;;  %v1930_v27 = vpop.f32.mrb[107].mxu1  ;;  %v4004_v34 = vmul.f32 %v7308_v36, %v10273_v4  ;;  %v10414_v11 = vadd.f32 %v1928_v53, %v10103_v41 }
 0x330   :  { %v7312_v50 = vpop.eup %7311  ;;  %v4011_v51 = vmul.f32 %v7310_v63, %v10277_v54  ;;  %7331 = vrcp.f32 %v3268_v57  ;;  %v6200_v18 = vmul.f32 -1.442695, %v10399_v61  ;;  %v10418_v39 = vadd.f32 %v1930_v27, %v10107_v5  ;;  %5478 = vmatpush1.bf16.msra.mxu0 %v6806_v47  ;;  %v6812_v27 = vld [vmem:[%s11605_s5 + $0x2d0] ss:$8 sps:$4 sm:$0xff]  }
 0x331   :  { %v7314_v7 = vpop.eup %7313  ;;  %v4012_v59 = vmul.f32 %v7312_v50, %v10280_v20  ;;  %7333 = vpow2.f32 %v6191_v19  ;;  %2259 = vmatmul.mubr.bf16.gmra.mrb[212].mxu1 %v11795_v49  ;;  %v6809_v20 = vld [vmem:[%s11605_s5 + $0x2c0] ss:$8 sps:$4 sm:$0xff]   ;;  %5479 = vmatprep.subr.bf16.mxu0 %v6811_v8  ;;  %v6207_v29 = vmul.f32 -1.442695, %v10414_v11 }
 0x332   :  { %v7316_v30 = vpop.eup %7315  ;;  %7335 = vpow2.f32 %v6192_v46  ;;  %v4211_v54 = vpack.c.bf16 %v4011_v51, %v4003_v16  ;;  %2268 = vmatprep.mubr.bf16.mxu1 %v11796_v42  ;;  %v6208_v36 = vmul.f32 -1.442695, %v10418_v39  ;;  %v4019_v50 = vmul.f32 %v7314_v7, %v10294_v13 }
 0x333   :  { %v7318_v37 = vpop.eup %7317  ;;  %v3275_v58 = vadd.f32 1.0, %v7316_v30  ;;  %7337 = vpow2.f32 %v6199_v17  ;;  %v4212_v4 = vpack.c.bf16 %v4012_v59, %v4004_v34 }
 0x334   :  { %v7320_v23 = vpop.eup %7319  ;;  %v3276_v49 = vadd.f32 1.0, %v7318_v37  ;;  %7339 = vpow2.f32 %v6200_v18  ;;  %v1934_v56 = vpop.f32.mrb[108].mxu1  ;;  %5480 = vmatpush1.bf16.msra.mxu0 %v6809_v20  ;;  %v6817_v18 = vld [vmem:[%s11605_s5 + $0x2e4] ss:$8 sps:$4 sm:$0xff]   ;;  %v6820_v20 = vld [vmem:[%s11605_s5 + $0x2f4] ss:$8 sps:$4 sm:$0xff]  }
 0x335   :  { %v7322_v60 = vpop.eup %7321  ;;  %7341 = vrcp.f32 %v3275_v58  ;;  %v3283_v42 = vadd.f32 1.0, %v7320_v23  ;;  %5354 = vmatprep.mubr.bf16.mxu0 %v4212_v4  ;;  %v10429_v14 = vadd.f32 %v1934_v56, %v10103_v41  ;;  %v1936_v32 = vpop.f32.mrb[109].mxu1  ;;  %5481 = vmatprep.subr.bf16.mxu0 %v6814_v43 }
 0x336   :  { %v7324_v19 = vpop.eup %7323  ;;  %7343 = vrcp.f32 %v3276_v49  ;;  %v3284_v9 = vadd.f32 1.0, %v7322_v60  ;;  %5355 = vmatmul.mubr.bf16.gmra.mrb[24].mxu0 %v4211_v54  ;;  %v10433_v57 = vadd.f32 %v1936_v32, %v10107_v5  ;;  %v1938_v46 = vpop.f32.mrb[110].mxu1 }
 0x337   :  { %v7326_v53 = vpop.eup %7325  ;;  %7345 = vrcp.f32 %v3283_v42  ;;  %v6215_v47 = vmul.f32 -1.442695, %v10429_v14  ;;  %v10437_v63 = vadd.f32 %v1938_v46, %v10103_v41  ;;  %v1940_v17 = vpop.f32.mrb[111].mxu1  ;;  %v4020_v59 = vmul.f32 %v7324_v19, %v10306_v62  ;;  %v6815_v62 = vld [vmem:[%s11605_s5 + $0x2e0] ss:$8 sps:$4 sm:$0xff]  }
 0x338   :  { %v7328_v8 = vpop.eup %7327  ;;  %v4027_v16 = vmul.f32 %v7326_v53, %v10311_v28  ;;  %7347 = vrcp.f32 %v3284_v9  ;;  %v6216_v51 = vmul.f32 -1.442695, %v10433_v57  ;;  %v10453_v28 = vadd.f32 %v1940_v17, %v10107_v5  ;;  %5482 = vmatpush1.bf16.msra.mxu0 %v6812_v27 }
 0x339   :  { %v7330_v34 = vpop.eup %7329  ;;  %v4028_v30 = vmul.f32 %v7328_v8, %v10314_v45  ;;  %7349 = vpow2.f32 %v6207_v29  ;;  %v6223_v54 = vmul.f32 -1.442695, %v10437_v63  ;;  %2269 = vmatmul.mubr.bf16.gmra.mrb[216].mxu1 %v11797_v1  ;;  %5483 = vmatprep.subr.bf16.mxu0 %v6817_v18 }
 0x33a   :  { %v7332_v13 = vpop.eup %7331  ;;  %7351 = vpow2.f32 %v6208_v36  ;;  %v4219_v7 = vpack.c.bf16 %v4027_v16, %v4019_v50  ;;  %2278 = vmatprep.mubr.bf16.mxu1 %v11798_v12  ;;  %v6224_v42 = vmul.f32 -1.442695, %v10453_v28  ;;  %v4035_v27 = vmul.f32 %v7330_v34, %v10328_v25  ;;  %v6823_v16 = vld [vmem:[%s11605_s5 + $0x304] ss:$8 sps:$4 sm:$0xff]  }
 0x33b   :  { %v7334_v37 = vpop.eup %7333  ;;  %7353 = vpow2.f32 %v6215_v47  ;;  %v4220_v58 = vpack.c.bf16 %v4028_v30, %v4020_v59  ;;  %v6818_v47 = vld [vmem:[%s11605_s5 + $0x2f0] ss:$8 sps:$4 sm:$0xff]   ;;  %v4036_v18 = vmul.f32 %v7332_v13, %v10332_v24  ;;  %v11800_v34 = vld [vmem:[#allocation11_spill] sm:$0xff] }
 0x33c   :  { %v7336_v45 = vpop.eup %7335  ;;  %v3291_v4 = vadd.f32 1.0, %v7334_v37  ;;  %7355 = vpow2.f32 %v6216_v51  ;;  %v1944_v1 = vpop.f32.mrb[112].mxu1  ;;  %5484 = vmatpush1.bf16.msra.mxu0 %v6815_v62 }
 0x33d   :  { %v7338_v23 = vpop.eup %7337  ;;  %v3292_v49 = vadd.f32 1.0, %v7336_v45  ;;  %7357 = vpow2.f32 %v6223_v54  ;;  %5364 = vmatprep.mubr.bf16.mxu0 %v4220_v58  ;;  %v10463_v12 = vadd.f32 %v1944_v1, %v10103_v41  ;;  %v1946_v56 = vpop.f32.mrb[113].mxu1  ;;  %5485 = vmatprep.subr.bf16.mxu0 %v6820_v20 }
 0x33e   :  { %v7340_v43 = vpop.eup %7339  ;;  %7359 = vrcp.f32 %v3291_v4  ;;  %v3299_v60 = vadd.f32 1.0, %v7338_v23  ;;  %5365 = vmatmul.mubr.bf16.gmra.mrb[28].mxu0 %v4219_v7  ;;  %v10467_v29 = vadd.f32 %v1946_v56, %v10107_v5  ;;  %v1948_v32 = vpop.f32.mrb[114].mxu1 }
 0x33f   :  { %v7342_v19 = vpop.eup %7341  ;;  %7361 = vrcp.f32 %v3292_v49  ;;  %v3300_v9 = vadd.f32 1.0, %v7340_v43  ;;  %v6231_v36 = vmul.f32 -1.442695, %v10463_v12  ;;  %v10471_v46 = vadd.f32 %v1948_v32, %v10103_v41  ;;  %v1950_v53 = vpop.f32.mrb[115].mxu1 }
 0x340   :  { %v7344_v17 = vpop.eup %7343  ;;  %v4043_v8 = vmul.f32 %v7342_v19, %v10346_v3  ;;  %7363 = vrcp.f32 %v3299_v60  ;;  %v6232_v50 = vmul.f32 -1.442695, %v10467_v29  ;;  %v10488_v7 = vadd.f32 %v1950_v53, %v10107_v5  ;;  %5486 = vmatpush1.bf16.msra.mxu0 %v6818_v47 }
 0x341   :  { %v7346_v51 = vpop.eup %7345  ;;  %v4044_v59 = vmul.f32 %v7344_v17, %v10349_v2  ;;  %7365 = vrcp.f32 %v3300_v9  ;;  %v6239_v30 = vmul.f32 -1.442695, %v10471_v46  ;;  %2279 = vmatmul.mubr.bf16.gmra.mrb[220].mxu1 %v9153_v48  ;;  %5648 = vmatprep.subr.bf16.mxu0 %v6823_v16 }
 0x342   :  { %v7348_v25 = vpop.eup %7347  ;;  %7367 = vpow2.f32 %v6224_v42  ;;  %v4227_v3 = vpack.c.bf16 %v4043_v8, %v4035_v27  ;;  %2288 = vmatprep.mubr.bf16.mxu1 %v11800_v34  ;;  %v6240_v43 = vmul.f32 -1.442695, %v10488_v7  ;;  %v4051_v53 = vmul.f32 %v7346_v51, %v10362_v15  ;;  %v11801_v27 = vld [vmem:[#allocation14_spill] sm:$0xff] }
 0x343   :  { %v7350_v54 = vpop.eup %7349  ;;  %7369 = vpow2.f32 %v6231_v36  ;;  %v4228_v37 = vpack.c.bf16 %v4044_v59, %v4036_v18  ;;  %v11802_v59 = vld [vmem:[#allocation15_spill] sm:$0xff] }
 0x344   :  { %v7352_v24 = vpop.eup %7351  ;;  %v3307_v13 = vadd.f32 1.0, %v7350_v54  ;;  %7371 = vpow2.f32 %v6232_v50  ;;  %v1954_v2 = vpop.f32.mrb[116].mxu1  ;;  %v4052_v50 = vmul.f32 %v7348_v25, %v10365_v22  ;;  %v935_v25 = vsub.s32 4, %v11799_v21 }
 0x345   :  { %v7354_v58 = vpop.eup %7353  ;;  %v3308_v62 = vadd.f32 1.0, %v7352_v24  ;;  %7373 = vpow2.f32 %v6239_v30  ;;  %5374 = vmatprep.mubr.bf16.mxu0 %v4228_v37  ;;  %v10491_v48 = vadd.f32 %v1954_v2, %v10103_v41  ;;  %v1956_v45 = vpop.f32.mrb[117].mxu1 }
 0x346   :  { %v7356_v4 = vpop.eup %7355  ;;  %7375 = vrcp.f32 %v3307_v13  ;;  %v3315_v1 = vadd.f32 1.0, %v7354_v58  ;;  %5375 = vmatmul.mubr.bf16.gmra.mrb[32].mxu0 %v4227_v3  ;;  %v10494_v20 = vadd.f32 %v1956_v45, %v10107_v5  ;;  %v1958_v23 = vpop.f32.mrb[118].mxu1 }
 0x347   :  { %v7358_v49 = vpop.eup %7357  ;;  %7377 = vrcp.f32 %v3308_v62  ;;  %v3316_v56 = vadd.f32 1.0, %v7356_v4  ;;  %v10498_v60 = vadd.f32 %v1958_v23, %v10103_v41  ;;  %v1960_v42 = vpop.f32.mrb[119].mxu1  ;;  %v6247_v9 = vmul.f32 -1.442695, %v10491_v48 }
 0x348   :  { %v7360_v32 = vpop.eup %7359  ;;  %7379 = vrcp.f32 %v3315_v1  ;;  %v3323_v19 = vadd.f32 1.0, %v7358_v49  ;;  %v6248_v17 = vmul.f32 -1.442695, %v10494_v20  ;;  %v10510_v15 = vadd.f32 %v1960_v42, %v10107_v5 }
 0x349   :  { %v7362_v36 = vpop.eup %7361  ;;  %v4059_v47 = vmul.f32 %v7360_v32, %v10380_v52  ;;  %7381 = vrcp.f32 %v3316_v56  ;;  %2289 = vmatmul.mubr.bf16.gmra.mrb[224].mxu1 %v11801_v27  ;;  %v6255_v18 = vmul.f32 -1.442695, %v10498_v60  ;;  %v939_v62 = vsub.s32 5, %v11799_v21 }
 0x34a   :  { %v7364_v8 = vpop.eup %7363  ;;  %v4060_v16 = vmul.f32 %v7362_v36, %v10384_v6  ;;  %7383 = vrcp.f32 %v3323_v19  ;;  %2298 = vmatprep.mubr.bf16.mxu1 %v11802_v59  ;;  %v6256_v1 = vmul.f32 -1.442695, %v10510_v15 }
 0x34b   :  { %v7366_v30 = vpop.eup %7365  ;;  %7385 = vpow2.f32 %v6240_v43  ;;  %v4235_v52 = vpack.c.bf16 %v4059_v47, %v4051_v53  ;;  %v11803_v47 = vld [vmem:[#allocation16_spill] sm:$0xff] }
 0x34c   :  { %v7368_v51 = vpop.eup %7367  ;;  %7387 = vpow2.f32 %v6247_v9  ;;  %v4236_v3 = vpack.c.bf16 %v4060_v16, %v4052_v50  ;;  %v1964_v34 = vpop.f32.mrb[120].mxu1  ;;  %v4067_v9 = vmul.f32 %v7364_v8, %v10395_v55  ;;  %v4068_v27 = vmul.f32 %v7366_v30, %v10399_v61  ;;  %v7958_v30 = vld [vmem:[%s11606_s4] sm:$0xff] }
 0x34d   :  { %v7370_v54 = vpop.eup %7369  ;;  %v3324_v37 = vadd.f32 1.0, %v7368_v51  ;;  %7389 = vpow2.f32 %v6248_v17  ;;  %v10513_v22 = vadd.f32 %v1964_v34, %v10103_v41  ;;  %v1966_v6 = vpop.f32.mrb[121].mxu1 }
 0x34e   :  { %v7372_v24 = vpop.eup %7371  ;;  %v3331_v13 = vadd.f32 1.0, %v7370_v54  ;;  %7391 = vpow2.f32 %v6255_v18  ;;  %5384 = vmatprep.mubr.bf16.mxu0 %v4236_v3  ;;  %v10517_v2 = vadd.f32 %v1966_v6, %v10107_v5  ;;  %v1968_v58 = vpop.f32.mrb[122].mxu1  ;;  %v11804_v18 = vld [vmem:[#allocation17_spill] sm:$0xff]  ;;  %v10544_v54 = vrot.slane %v7958_v30, %v935_v25 }
 0x34f   :  { %v7374_v45 = vpop.eup %7373  ;;  %7393 = vrcp.f32 %v3324_v37  ;;  %v3332_v4 = vadd.f32 1.0, %v7372_v24  ;;  %5385 = vmatmul.mubr.bf16.gmra.mrb[36].mxu0 %v4235_v52  ;;  %v10522_v23 = vadd.f32 %v1968_v58, %v10103_v41  ;;  %v1970_v49 = vpop.f32.mrb[123].mxu1  ;;  %v6263_v42 = vmul.f32 -1.442695, %v10513_v22 }
 0x350   :  { %v7376_v56 = vpop.eup %7375  ;;  %7395 = vrcp.f32 %v3331_v13  ;;  %v3339_v43 = vadd.f32 1.0, %v7374_v45  ;;  %v10526_v32 = vadd.f32 %v1970_v49, %v10107_v5  ;;  %v6264_v53 = vmul.f32 -1.442695, %v10517_v2 }
 0x351   :  { %v7378_v19 = vpop.eup %7377  ;;  %v4075_v36 = vmul.f32 %v7376_v56, %v10414_v11  ;;  %7397 = vrcp.f32 %v3332_v4  ;;  %2299 = vmatmul.mubr.bf16.gmra.mrb[228].mxu1 %v11803_v47  ;;  %v6271_v16 = vmul.f32 -1.442695, %v10522_v23 }
 0x352   :  { %v7380_v17 = vpop.eup %7379  ;;  %v4076_v50 = vmul.f32 %v7378_v19, %v10418_v39  ;;  %7399 = vrcp.f32 %v3339_v43  ;;  %2308 = vmatprep.mubr.bf16.mxu1 %v11804_v18  ;;  %v6272_v55 = vmul.f32 -1.442695, %v10526_v32 }
 0x353   :  { %v7382_v59 = vpop.eup %7381  ;;  %7401 = vpow2.f32 %v6256_v1  ;;  %v4243_v11 = vpack.c.bf16 %v4075_v36, %v4067_v9  ;;  %v4083_v45 = vmul.f32 %v7380_v17, %v10429_v14  ;;  %v11805_v9 = vld [vmem:[#allocation19_spill] sm:$0xff] }
 0x354   :  { %v7384_v8 = vpop.eup %7383  ;;  %7403 = vpow2.f32 %v6263_v42  ;;  %v4244_v52 = vpack.c.bf16 %v4076_v50, %v4068_v27  ;;  %v1974_v51 = vpop.f32.mrb[124].mxu1  ;;  %v11806_v27 = vld [vmem:[#allocation18_spill] sm:$0xff] }
 0x355   :  { %v7386_v3 = vpop.eup %7385  ;;  %v4091_v34 = vmul.f32 %v7384_v8, %v10437_v63  ;;  %7405 = vpow2.f32 %v6264_v53  ;;  %v10539_v61 = vadd.f32 %v1974_v51, %v10103_v41  ;;  %v1976_v39 = vpop.f32.mrb[125].mxu1  ;;  %v10549_v63 = vrot.slane %v7958_v30, %v939_v62 }
 0x356   :  { %v7388_v37 = vpop.eup %7387  ;;  %v3340_v6 = vadd.f32 1.0, %v7386_v3  ;;  %7407 = vpow2.f32 %v6271_v16  ;;  %5394 = vmatprep.mubr.bf16.mxu0 %v4244_v52  ;;  %v10547_v24 = vadd.f32 %v1976_v39, %v10107_v5  ;;  %v1978_v13 = vpop.f32.mrb[126].mxu1 }
 0x357   :  { %v7390_v58 = vpop.eup %7389  ;;  %v3347_v4 = vadd.f32 1.0, %v7388_v37  ;;  %7409 = vpow2.f32 %v6272_v55  ;;  %5395 = vmatmul.mubr.bf16.gmra.mrb[40].mxu0 %v4243_v11  ;;  %v10553_v1 = vadd.f32 %v1978_v13, %v10103_v41  ;;  %v1980_v25 = vpop.f32.mrb[127].mxu1  ;;  %v6279_v43 = vmul.f32 -1.442695, %v10539_v61 }
 0x358   :  { %v7392_v49 = vpop.eup %7391  ;;  %7411 = vrcp.f32 %v3340_v6  ;;  %v3348_v56 = vadd.f32 1.0, %v7390_v58  ;;  %v10557_v42 = vadd.f32 %v1980_v25, %v10107_v5  ;;  %v6280_v14 = vmul.f32 -1.442695, %v10547_v24 }
 0x359   :  { %v7394_v62 = vpop.eup %7393  ;;  %7413 = vrcp.f32 %v3347_v4  ;;  %v3355_v19 = vadd.f32 1.0, %v7392_v49  ;;  %2309 = vmatmul.mubr.bf16.gmra.mrb[232].mxu1 %v11805_v9  ;;  %v4251_v36 = vpack.c.bf16 %v4091_v34, %v4083_v45  ;;  %v4084_v41 = vmul.f32 %v7382_v59, %v10433_v57 }
 0x35a   :  { %v7396_v53 = vpop.eup %7395  ;;  %v4092_v47 = vmul.f32 %v7394_v62, %v10453_v28  ;;  %7415 = vrcp.f32 %v3348_v56  ;;  %v6287_v17 = vmul.f32 -1.442695, %v10553_v1  ;;  %2318 = vmatprep.mubr.bf16.mxu1 %v11806_v27  ;;  %v6288_v50 = vmul.f32 -1.442695, %v10557_v42 }
 0x35b   :  { %v7398_v5 = vpop.eup %7397  ;;  %7417 = vrcp.f32 %v3355_v19  ;;  %v4099_v39 = vmul.f32 %v7396_v53, %v10463_v12 }
 0x35c   :  { %v7400_v16 = vpop.eup %7399  ;;  %7419 = vpow2.f32 %v6279_v43  ;;  %v4252_v18 = vpack.c.bf16 %v4092_v47, %v4084_v41  ;;  %v2017_v55 = vpop.f32.mrb[128].mxu1  ;;  %v4100_v19 = vmul.f32 %v7398_v5, %v10467_v29 }
 0x35d   :  { %v7402_v11 = vpop.eup %7401  ;;  %v4107_v8 = vmul.f32 %v7400_v16, %v10471_v46  ;;  %7421 = vpow2.f32 %v6280_v14  ;;  %v10568_v57 = vadd.f32 %v2017_v55, %v10544_v54  ;;  %v2019_v28 = vpop.f32.mrb[129].mxu1 }
 0x35e   :  { %v7404_v59 = vpop.eup %7403  ;;  %v3356_v52 = vadd.f32 1.0, %v7402_v11  ;;  %7423 = vpow2.f32 %v6287_v17  ;;  %5404 = vmatprep.mubr.bf16.mxu0 %v4252_v18  ;;  %v10571_v51 = vadd.f32 %v2019_v28, %v10549_v63  ;;  %v2021_v3 = vpop.f32.mrb[130].mxu1 }
 0x35f   :  { %v7406_v34 = vpop.eup %7405  ;;  %v3363_v30 = vadd.f32 1.0, %v7404_v59  ;;  %7425 = vpow2.f32 %v6288_v50  ;;  %5405 = vmatmul.mubr.bf16.gmra.mrb[44].mxu0 %v4251_v36  ;;  %v10575_v46 = vadd.f32 %v2021_v3, %v10544_v54  ;;  %v2023_v37 = vpop.f32.mrb[131].mxu1  ;;  %v6041_v25 = vmul.f32 -1.442695, %v10568_v57 }
 0x360   :  { %v7408_v6 = vpop.eup %7407  ;;  %7427 = vrcp.f32 %v3356_v52  ;;  %v3364_v13 = vadd.f32 1.0, %v7406_v34  ;;  %v10578_v58 = vadd.f32 %v2023_v37, %v10549_v63  ;;  %v4259_v12 = vpack.c.bf16 %v4107_v8, %v4099_v39 }
 0x361   :  { %v7410_v45 = vpop.eup %7409  ;;  %7429 = vrcp.f32 %v3363_v30  ;;  %v3371_v4 = vadd.f32 1.0, %v7408_v6  ;;  %2319 = vmatmul.mubr.bf16.gmra.mrb[236].mxu1 %v9335_v26  ;;  %v6042_v43 = vmul.f32 -1.442695, %v10571_v51  ;;  %v6049_v9 = vmul.f32 -1.442695, %v10575_v46 }
 0x362   :  { %v7412_v49 = vpop.eup %7411  ;;  %7431 = vrcp.f32 %v3364_v13  ;;  %v3372_v56 = vadd.f32 1.0, %v7410_v45  ;;  %2328 = vmatprep.mubr.bf16.mxu1 %v9351_v35  ;;  %v6050_v26 = vmul.f32 -1.442695, %v10578_v58 }
 0x363   :  { %v7414_v62 = vpop.eup %7413  ;;  %v4108_v14 = vmul.f32 %v7412_v49, %v10488_v7  ;;  %7433 = vrcp.f32 %v3371_v4 }
 0x364   :  { %v7416_v36 = vpop.eup %7415  ;;  %7435 = vrcp.f32 %v3372_v56  ;;  %v2027_v53 = vpop.f32.mrb[132].mxu1  ;;  %v4115_v16 = vmul.f32 %v7414_v62, %v10491_v48 }
 0x365   :  { %v7418_v41 = vpop.eup %7417  ;;  %7437 = vpow2.f32 %v6041_v25  ;;  %v4260_v47 = vpack.c.bf16 %v4108_v14, %v4100_v19  ;;  %v10589_v17 = vadd.f32 %v2027_v53, %v10544_v54  ;;  %v2029_v35 = vpop.f32.mrb[133].mxu1  ;;  %v4116_v6 = vmul.f32 %v7416_v36, %v10494_v20 }
 0x366   :  { %v7420_v27 = vpop.eup %7419  ;;  %v4123_v29 = vmul.f32 %v7418_v41, %v10498_v60  ;;  %7439 = vpow2.f32 %v6042_v43  ;;  %v10593_v7 = vadd.f32 %v2029_v35, %v10549_v63  ;;  %v2031_v5 = vpop.f32.mrb[134].mxu1 }
 0x367   :  { %v7422_v50 = vpop.eup %7421  ;;  %v3379_v18 = vadd.f32 1.0, %v7420_v27  ;;  %7441 = vpow2.f32 %v6049_v9  ;;  %5414 = vmatprep.mubr.bf16.mxu0 %v4260_v47  ;;  %v10597_v55 = vadd.f32 %v2031_v5, %v10544_v54  ;;  %v2033_v11 = vpop.f32.mrb[135].mxu1  ;;  %v6057_v3 = vmul.f32 -1.442695, %v10589_v17 }
 0x368   :  { %v7424_v8 = vpop.eup %7423  ;;  %v3380_v28 = vadd.f32 1.0, %v7422_v50  ;;  %7443 = vpow2.f32 %v6050_v26  ;;  %5415 = vmatmul.mubr.bf16.gmra.mrb[48].mxu0 %v4259_v12  ;;  %v10600_v60 = vadd.f32 %v2033_v11, %v10549_v63  ;;  %v4267_v48 = vpack.c.bf16 %v4123_v29, %v4115_v16 }
 0x369   :  { %v7426_v59 = vpop.eup %7425  ;;  %7445 = vrcp.f32 %v3379_v18  ;;  %v3387_v52 = vadd.f32 1.0, %v7424_v8  ;;  %2329 = vmatmul.mubr.bf16.gmra.mrb[240].mxu1 %v9353_v38  ;;  %v6058_v30 = vmul.f32 -1.442695, %v10593_v7  ;;  %v6065_v45 = vmul.f32 -1.442695, %v10597_v55 }
 0x36a   :  { %v7428_v34 = vpop.eup %7427  ;;  %7447 = vrcp.f32 %v3380_v28  ;;  %v3388_v39 = vadd.f32 1.0, %v7426_v59  ;;  %2338 = vmatprep.mubr.bf16.mxu1 %v9369_v0  ;;  %v6066_v38 = vmul.f32 -1.442695, %v10600_v60 }
 0x36b   :  { %v7430_v37 = vpop.eup %7429  ;;  %v4124_v13 = vmul.f32 %v7428_v34, %v10510_v15  ;;  %7449 = vrcp.f32 %v3387_v52 }
 0x36c   :  { %v7432_v4 = vpop.eup %7431  ;;  %7451 = vrcp.f32 %v3388_v39  ;;  %v2037_v25 = vpop.f32.mrb[136].mxu1 }
 0x36d   :  { %v7434_v12 = vpop.eup %7433  ;;  %7453 = vpow2.f32 %v6057_v3  ;;  %v4268_v49 = vpack.c.bf16 %v4124_v13, %v4116_v6  ;;  %v10611_v56 = vadd.f32 %v2037_v25, %v10544_v54  ;;  %v2039_v0 = vpop.f32.mrb[137].mxu1  ;;  %v4132_v20 = vmul.f32 %v7432_v4, %v10517_v2 }
 0x36e   :  { %v7436_v43 = vpop.eup %7435  ;;  %v4139_v15 = vmul.f32 %v7434_v12, %v10522_v23  ;;  %7455 = vpow2.f32 %v6058_v30  ;;  %v10616_v62 = vadd.f32 %v2039_v0, %v10549_v63  ;;  %v2041_v19 = vpop.f32.mrb[138].mxu1  ;;  %v4131_v2 = vmul.f32 %v7430_v37, %v10513_v22 }
 0x36f   :  { %v7438_v14 = vpop.eup %7437  ;;  %v4140_v9 = vmul.f32 %v7436_v43, %v10526_v32  ;;  %7457 = vpow2.f32 %v6065_v45  ;;  %5424 = vmatprep.mubr.bf16.mxu0 %v4268_v49  ;;  %v6073_v36 = vmul.f32 -1.442695, %v10611_v56  ;;  %v10621_v26 = vadd.f32 %v2041_v19, %v10544_v54  ;;  %v2043_v53 = vpop.f32.mrb[139].mxu1 }
 0x370   :  { %v7440_v41 = vpop.eup %7439  ;;  %v3141_v23 = vadd.f32 1.0, %v7438_v14  ;;  %7459 = vpow2.f32 %v6066_v38  ;;  %5425 = vmatmul.mubr.bf16.gmra.mrb[52].mxu0 %v4267_v48  ;;  %v10625_v47 = vadd.f32 %v2043_v53, %v10549_v63  ;;  %v6074_v50 = vmul.f32 -1.442695, %v10616_v62 }
 0x371   :  { %v7442_v35 = vpop.eup %7441  ;;  %v3142_v27 = vadd.f32 1.0, %v7440_v41  ;;  %7461 = vpow2.f32 %v6073_v36  ;;  %v4276_v32 = vpack.c.bf16 %v4140_v9, %v4132_v20  ;;  %2339 = vmatmul.mubr.bf16.gmra.mrb[244].mxu1 %v9371_v40  ;;  %v4275_v16 = vpack.c.bf16 %v4139_v15, %v4131_v2 }
 0x372   :  { %v7444_v29 = vpop.eup %7443  ;;  %7463 = vrcp.f32 %v3141_v23  ;;  %v3149_v5 = vadd.f32 1.0, %v7442_v35  ;;  %2348 = vmatprep.mubr.bf16.mxu1 %v9387_v44  ;;  %v6081_v11 = vmul.f32 -1.442695, %v10621_v26  ;;  %v6082_v28 = vmul.f32 -1.442695, %v10625_v47 }
 0x373   :  { %v7446_v22 = vpop.eup %7445  ;;  %7465 = vrcp.f32 %v3142_v27  ;;  %v3150_v18 = vadd.f32 1.0, %v7444_v29  ;;  %5434 = vmatprep.mubr.bf16.mxu0 %v4276_v32 }
 0x374   :  { %v7448_v8 = vpop.eup %7447  ;;  %7467 = vrcp.f32 %v3149_v5  ;;  %v2047_v59 = vpop.f32.mrb[140].mxu1  ;;  %v4147_v38 = vmul.f32 %v7446_v22, %v10539_v61 }
 0x375   :  { %v7450_v40 = vpop.eup %7449  ;;  %7469 = vrcp.f32 %v3150_v18  ;;  %v10633_v52 = vadd.f32 %v2047_v59, %v10544_v54  ;;  %v2049_v3 = vpop.f32.mrb[141].mxu1  ;;  %v4148_v44 = vmul.f32 %v7448_v8, %v10547_v24 }
 0x376   :  { %v7452_v48 = vpop.eup %7451  ;;  %v4155_v34 = vmul.f32 %v7450_v40, %v10553_v1  ;;  %7471 = vpow2.f32 %v6074_v50  ;;  %v2051_v39 = vpop.f32.mrb[142].mxu1  ;;  %v10640_v13 = vadd.f32 %v2049_v3, %v10549_v63 }
 0x377   :  { %v7454_v30 = vpop.eup %7453  ;;  %v4156_v37 = vmul.f32 %v7452_v48, %v10557_v42  ;;  %7473 = vpow2.f32 %v6081_v11  ;;  %v6089_v6 = vmul.f32 -1.442695, %v10633_v52  ;;  %v2053_v45 = vpop.f32.mrb[143].mxu1  ;;  %v10644_v24 = vadd.f32 %v2051_v39, %v10544_v54 }
 0x378   :  { %v7456_v4 = vpop.eup %7455  ;;  %v3157_v25 = vadd.f32 1.0, %v7454_v30  ;;  %7475 = vpow2.f32 %v6082_v28  ;;  %5435 = vmatmul.mubr.bf16.gmra.mrb[56].mxu0 %v4275_v16  ;;  %v10647_v42 = vadd.f32 %v2053_v45, %v10549_v63  ;;  %v4283_v20 = vpack.c.bf16 %v4155_v34, %v4147_v38  ;;  %v6821_v45 = vld [vmem:[%s11605_s5 + $0x300] ss:$8 sps:$4 sm:$0xff]  }
 0x379   :  { %v7458_v1 = vpop.eup %7457  ;;  %v3158_v12 = vadd.f32 1.0, %v7456_v4  ;;  %7477 = vpow2.f32 %v6089_v6  ;;  %v4284_v49 = vpack.c.bf16 %v4156_v37, %v4148_v44  ;;  %2349 = vmatmul.mubr.bf16.gmra.mrb[248].mxu1 %v9389_v33  ;;  %v6090_v19 = vmul.f32 -1.442695, %v10640_v13 }
 0x37a   :  { %v7460_v0 = vpop.eup %7459  ;;  %7479 = vrcp.f32 %v3157_v25  ;;  %v3165_v43 = vadd.f32 1.0, %v7458_v1  ;;  %2358 = vmatprep.mubr.bf16.mxu1 %v9403_v10  ;;  %v6097_v36 = vmul.f32 -1.442695, %v10644_v24  ;;  %v6098_v33 = vmul.f32 -1.442695, %v10647_v42 }
 0x37b   :  { %v7462_v61 = vpop.eup %7461  ;;  %7481 = vrcp.f32 %v3158_v12  ;;  %v3166_v15 = vadd.f32 1.0, %v7460_v0  ;;  %5444 = vmatprep.mubr.bf16.mxu0 %v4284_v49  ;;  %v6826_v0 = vld [vmem:[%s11605_s5 + $0x314] ss:$8 sps:$4 sm:$0xff]  }
 0x37c   :  { %v7464_v14 = vpop.eup %7463  ;;  %7483 = vrcp.f32 %v3165_v43  ;;  %v3173_v9 = vadd.f32 1.0, %v7462_v61  ;;  %v2057_v53 = vpop.f32.mrb[144].mxu1 }
 0x37d   :  { %v7466_v41 = vpop.eup %7465  ;;  %7485 = vrcp.f32 %v3166_v15  ;;  %v10655_v2 = vadd.f32 %v2057_v53, %v10544_v54  ;;  %v2059_v10 = vpop.f32.mrb[145].mxu1  ;;  %v3909_v35 = vmul.f32 %v7464_v14, %v10568_v57 }
 0x37e   :  { %v7468_v23 = vpop.eup %7467  ;;  %7487 = vrcp.f32 %v3173_v9  ;;  %v2061_v27 = vpop.f32.mrb[146].mxu1  ;;  %v10661_v50 = vadd.f32 %v2059_v10, %v10549_v63  ;;  %v3910_v18 = vmul.f32 %v7466_v41, %v10571_v51 }
 0x37f   :  { %v7470_v32 = vpop.eup %7469  ;;  %v3917_v29 = vmul.f32 %v7468_v23, %v10575_v46  ;;  %7489 = vpow2.f32 %v6090_v19  ;;  %v6105_v5 = vmul.f32 -1.442695, %v10655_v2  ;;  %v2063_v16 = vpop.f32.mrb[147].mxu1  ;;  %v10666_v57 = vadd.f32 %v2061_v27, %v10544_v54  ;;  %v6829_v23 = vld [vmem:[%s11605_s5 + $0x324] ss:$8 sps:$4 sm:$0xff]  }
 0x380   :  { %v7472_v22 = vpop.eup %7471  ;;  %v3918_v11 = vmul.f32 %v7470_v32, %v10578_v58  ;;  %7491 = vpow2.f32 %v6097_v36  ;;  %5445 = vmatmul.mubr.bf16.gmra.mrb[60].mxu0 %v4283_v20  ;;  %v10669_v59 = vadd.f32 %v2063_v16, %v10549_v63  ;;  %v6106_v44 = vmul.f32 -1.442695, %v10661_v50 }
 0x381   :  { %v7474_v8 = vpop.eup %7473  ;;  %v4165_v28 = vpack.c.bf16 %v3917_v29, %v3909_v35  ;;  %v3174_v46 = vadd.f32 1.0, %v7472_v22  ;;  %7493 = vpow2.f32 %v6098_v33  ;;  %2359 = vmatmul.mubr.bf16.gmra.mrb[252].mxu1 %v9405_v31  ;;  %v6113_v30 = vmul.f32 -1.442695, %v10666_v57 }
 0x382   :  { %v7476_v40 = vpop.eup %7475  ;;  %v3181_v3 = vadd.f32 1.0, %v7474_v8  ;;  %7495 = vpow2.f32 %v6105_v5  ;;  %v4166_v51 = vpack.c.bf16 %v3918_v11, %v3910_v18  ;;  %v6114_v31 = vmul.f32 -1.442695, %v10669_v59 }
 0x383   :  { %v7478_v48 = vpop.eup %7477  ;;  %7497 = vrcp.f32 %v3174_v46  ;;  %v3182_v58 = vadd.f32 1.0, %v7476_v40  ;;  %v6827_v46 = vld [vmem:[%s11605_s5 + $0x320] ss:$8 sps:$4 sm:$0xff]  }
 0x384   :  { %v7480_v34 = vpop.eup %7479  ;;  %7499 = vrcp.f32 %v3181_v3  ;;  %v3189_v39 = vadd.f32 1.0, %v7478_v48  ;;  %5487 = vmatprep.mubr.bf16.mxu0 %v4166_v51  ;;  %v2067_v37 = vpop.f32.mrb[148].mxu1  ;;  %v6832_v48 = vld [vmem:[%s11605_s5 + $0x334] ss:$8 sps:$4 sm:$0xff]  }
 0x385   :  { %v7482_v6 = vpop.eup %7481  ;;  %7501 = vrcp.f32 %v3182_v58  ;;  %v10679_v4 = vadd.f32 %v2067_v37, %v10544_v54  ;;  %v2069_v38 = vpop.f32.mrb[149].mxu1  ;;  %v3925_v1 = vmul.f32 %v7480_v34, %v10589_v17 }
 0x386   :  { %v7484_v25 = vpop.eup %7483  ;;  %7503 = vrcp.f32 %v3189_v39  ;;  %v10683_v12 = vadd.f32 %v2069_v38, %v10549_v63  ;;  %v2071_v49 = vpop.f32.mrb[150].mxu1  ;;  %v3926_v20 = vmul.f32 %v7482_v6, %v10593_v7 }
 0x387   :  { %v7486_v43 = vpop.eup %7485  ;;  %v3933_v61 = vmul.f32 %v7484_v25, %v10597_v55  ;;  %7505 = vpow2.f32 %v6106_v44  ;;  %v6121_v15 = vmul.f32 -1.442695, %v10679_v4  ;;  %v2073_v19 = vpop.f32.mrb[151].mxu1  ;;  %v10694_v36 = vadd.f32 %v2071_v49, %v10544_v54  ;;  %v6824_v55 = vld [vmem:[%s11605_s5 + $0x310] ss:$8 sps:$4 sm:$0xff]  }
 0x388   :  { %v7488_v14 = vpop.eup %7487  ;;  %v3934_v17 = vmul.f32 %v7486_v43, %v10600_v60  ;;  %7507 = vpow2.f32 %v6113_v30  ;;  %5488 = vmatmul.mubr.bf16.vlgmr.msra.gmra.mrb[0].mxu0 %v4165_v28  ;;  %v6122_v9 = vmul.f32 -1.442695, %v10683_v12  ;;  %v10697_v7 = vadd.f32 %v2073_v19, %v10549_v63 }
 0x389   :  { %v7490_v53 = vpop.eup %7489  ;;  %7509 = vpow2.f32 %v6114_v31  ;;  %5649 = vmatpush1.bf16.msra.mxu0 %v6821_v45  ;;  %v4173_v41 = vpack.c.bf16 %v3933_v61, %v3925_v1  ;;  %v6129_v5 = vmul.f32 -1.442695, %v10694_v36  ;;  %v3941_v44 = vmul.f32 %v7488_v14, %v10611_v56 }
 0x38a   :  { %v7492_v33 = vpop.eup %7491  ;;  %v3190_v60 = vadd.f32 1.0, %v7490_v53  ;;  %7511 = vpow2.f32 %v6121_v15  ;;  %v4174_v10 = vpack.c.bf16 %v3934_v17, %v3926_v20  ;;  %5650 = vmatprep.subr.bf16.mxu0 %v6826_v0  ;;  %v6130_v11 = vmul.f32 -1.442695, %v10697_v7  ;;  %v6835_v0 = vld [vmem:[%s11605_s5 + $0x344] ss:$8 sps:$4 sm:$0xff]  }
 0x38b   :  { %v7494_v35 = vpop.eup %7493  ;;  %v3197_v27 = vadd.f32 1.0, %v7492_v33  ;;  %7513 = vpow2.f32 %v6122_v9 }
 0x38c   :  { %v7496_v32 = vpop.eup %7495  ;;  %7515 = vrcp.f32 %v3190_v60  ;;  %v3198_v29 = vadd.f32 1.0, %v7494_v35  ;;  %5497 = vmatprep.mubr.bf16.mxu0 %v4174_v10  ;;  %v2077_v16 = vpop.f32.mrb[152].mxu1 }
 0x38d   :  { %v7498_v22 = vpop.eup %7497  ;;  %7517 = vrcp.f32 %v3197_v27  ;;  %v3205_v18 = vadd.f32 1.0, %v7496_v32  ;;  %5651 = vmatpush1.bf16.msra.mxu0 %v6824_v55  ;;  %v10708_v8 = vadd.f32 %v2077_v16, %v10544_v54  ;;  %v2079_v28 = vpop.f32.mrb[153].mxu1  ;;  %v6838_v27 = vld [vmem:[%s11605_s5 + $0x354] ss:$8 sps:$4 sm:$0xff]  }
 0x38e   :  { %v7500_v40 = vpop.eup %7499  ;;  %7519 = vrcp.f32 %v3198_v29  ;;  %v10714_v3 = vadd.f32 %v2079_v28, %v10549_v63  ;;  %v2081_v51 = vpop.f32.mrb[154].mxu1  ;;  %5652 = vmatprep.subr.bf16.mxu0 %v6829_v23  ;;  %v3942_v6 = vmul.f32 %v7498_v22, %v10616_v62 }
 0x38f   :  { %v7502_v58 = vpop.eup %7501  ;;  %v3949_v34 = vmul.f32 %v7500_v40, %v10621_v26  ;;  %7521 = vrcp.f32 %v3205_v18  ;;  %v6137_v39 = vmul.f32 -1.442695, %v10708_v8  ;;  %v2083_v30 = vpop.f32.mrb[155].mxu1  ;;  %v10726_v25 = vadd.f32 %v2081_v51, %v10544_v54  ;;  %v6830_v26 = vld [vmem:[%s11605_s5 + $0x330] ss:$8 sps:$4 sm:$0xff]  }
 0x390   :  { %v7504_v37 = vpop.eup %7503  ;;  %v3950_v31 = vmul.f32 %v7502_v58, %v10625_v47  ;;  %7523 = vpow2.f32 %v6129_v5  ;;  %5498 = vmatmul.mubr.bf16.gmra.mrb[4].mxu0 %v4173_v41  ;;  %v6138_v45 = vmul.f32 -1.442695, %v10714_v3  ;;  %v10732_v62 = vadd.f32 %v2083_v30, %v10549_v63  ;;  %v6833_v41 = vld [vmem:[%s11605_s5 + $0x340] ss:$8 sps:$4 sm:$0xff]  }
 0x391   :  { %v7506_v38 = vpop.eup %7505  ;;  %7525 = vpow2.f32 %v6130_v11  ;;  %v4181_v56 = vpack.c.bf16 %v3949_v34, %v3941_v44  ;;  %5653 = vmatpush1.bf16.msra.mxu0 %v6827_v46  ;;  %v6145_v9 = vmul.f32 -1.442695, %v10726_v25  ;;  %v3957_v22 = vmul.f32 %v7504_v37, %v10633_v52  ;;  %v6836_v52 = vld [vmem:[%s11605_s5 + $0x350] ss:$8 sps:$4 sm:$0xff]  }
 0x392   :  { %v7508_v1 = vpop.eup %7507  ;;  %v3206_v49 = vadd.f32 1.0, %v7506_v38  ;;  %7527 = vpow2.f32 %v6137_v39  ;;  %v4182_v47 = vpack.c.bf16 %v3950_v31, %v3942_v6  ;;  %5654 = vmatprep.subr.bf16.mxu0 %v6832_v48  ;;  %v6146_v10 = vmul.f32 -1.442695, %v10732_v62 }
 0x393   :  { %v7510_v43 = vpop.eup %7509  ;;  %v3213_v20 = vadd.f32 1.0, %v7508_v1  ;;  %7529 = vpow2.f32 %v6138_v45 }
 0x394   :  { %v7512_v61 = vpop.eup %7511  ;;  %7531 = vrcp.f32 %v3206_v49  ;;  %v3214_v15 = vadd.f32 1.0, %v7510_v43  ;;  %5507 = vmatprep.mubr.bf16.mxu0 %v4182_v47  ;;  %v2087_v19 = vpop.f32.mrb[156].mxu1 }
 0x395   :  { %v7514_v14 = vpop.eup %7513  ;;  %7533 = vrcp.f32 %v3213_v20  ;;  %v3221_v17 = vadd.f32 1.0, %v7512_v61  ;;  %v10739_v53 = vadd.f32 %v2087_v19, %v10544_v54  ;;  %v2089_v55 = vpop.f32.mrb[157].mxu1  ;;  %5655 = vmatpush1.bf16.msra.mxu0 %v6830_v26  ;;  %v6839_v26 = vld [vmem:[%s11605_s5 + $0x360] ss:$8 sps:$4 sm:$0xff]   ;;  %v6844_v20 = vld [vmem:[%s11605_s5 + $0x374] ss:$8 sps:$4 sm:$0xff]  }
 0x396   :  { %v7516_v33 = vpop.eup %7515  ;;  %7535 = vrcp.f32 %v3214_v15  ;;  %v3222_v60 = vadd.f32 1.0, %v7514_v14  ;;  %v10746_v23 = vadd.f32 %v2089_v55, %v10549_v63  ;;  %v2091_v35 = vpop.f32.mrb[158].mxu1  ;;  %5656 = vmatprep.subr.bf16.mxu0 %v6835_v0 }
 0x397   :  { %v7518_v32 = vpop.eup %7517  ;;  %7537 = vrcp.f32 %v3221_v17  ;;  %v6153_v29 = vmul.f32 -1.442695, %v10739_v53  ;;  %v2093_v5 = vpop.f32.mrb[159].mxu1  ;;  %v3958_v46 = vmul.f32 %v7516_v33, %v10640_v13  ;;  %v10758_v51 = vadd.f32 %v2091_v35, %v10544_v54  ;;  %v6841_v13 = vld [vmem:[%s11605_s5 + $0x364] ss:$8 sps:$4 sm:$0xff]  }
 0x398   :  { %v7520_v16 = vpop.eup %7519  ;;  %v3965_v18 = vmul.f32 %v7518_v32, %v10644_v24  ;;  %7539 = vrcp.f32 %v3222_v60  ;;  %5508 = vmatmul.mubr.bf16.gmra.mrb[8].mxu0 %v4181_v56  ;;  %v6154_v11 = vmul.f32 -1.442695, %v10746_v23  ;;  %v10764_v24 = vadd.f32 %v2093_v5, %v10549_v63 }
 0x399   :  { %v7522_v28 = vpop.eup %7521  ;;  %v3966_v40 = vmul.f32 %v7520_v16, %v10647_v42  ;;  %7541 = vpow2.f32 %v6145_v9  ;;  %5657 = vmatpush1.bf16.msra.mxu0 %v6833_v41  ;;  %v6161_v45 = vmul.f32 -1.442695, %v10758_v51 }
 0x39a   :  { %v7524_v48 = vpop.eup %7523  ;;  %7543 = vpow2.f32 %v6146_v10  ;;  %v4189_v58 = vpack.c.bf16 %v3965_v18, %v3957_v22  ;;  %5658 = vmatprep.subr.bf16.mxu0 %v6838_v27  ;;  %v6162_v47 = vmul.f32 -1.442695, %v10764_v24  ;;  %v3973_v9 = vmul.f32 %v7522_v28, %v10655_v2  ;;  %v6842_v27 = vld [vmem:[%s11605_s5 + $0x370] ss:$8 sps:$4 sm:$0xff]  }
 0x39b   :  { %v7526_v42 = vpop.eup %7525  ;;  %v3229_v44 = vadd.f32 1.0, %v7524_v48  ;;  %7545 = vpow2.f32 %v6153_v29  ;;  %v4190_v34 = vpack.c.bf16 %v3966_v40, %v3958_v46  ;;  %v6845_v40 = vld [vmem:[%s11605_s5 + $0x380] ss:$8 sps:$4 sm:$0xff]  }
 0x39c   :  { %v7528_v39 = vpop.eup %7527  ;;  %v3230_v30 = vadd.f32 1.0, %v7526_v42  ;;  %7547 = vpow2.f32 %v6154_v11  ;;  %v2097_v37 = vpop.f32.mrb[160].mxu1 }
 0x39d   :  { %v7530_v6 = vpop.eup %7529  ;;  %7549 = vrcp.f32 %v3229_v44  ;;  %v3237_v31 = vadd.f32 1.0, %v7528_v39  ;;  %5517 = vmatprep.mubr.bf16.mxu0 %v4190_v34  ;;  %v10771_v38 = vadd.f32 %v2097_v37, %v10544_v54  ;;  %v2099_v56 = vpop.f32.mrb[161].mxu1  ;;  %5659 = vmatpush1.bf16.msra.mxu0 %v6836_v52  ;;  %v6850_v44 = vld [vmem:[%s11605_s5 + $0x394] ss:$8 sps:$4 sm:$0xff]  }
 0x39e   :  { %v7532_v1 = vpop.eup %7531  ;;  %7551 = vrcp.f32 %v3230_v30  ;;  %v3238_v49 = vadd.f32 1.0, %v7530_v6  ;;  %v10778_v0 = vadd.f32 %v2099_v56, %v10549_v63  ;;  %v2101_v43 = vpop.f32.mrb[162].mxu1  ;;  %5660 = vmatprep.subr.bf16.mxu0 %v6841_v13 }
 0x39f   :  { %v7534_v61 = vpop.eup %7533  ;;  %7553 = vrcp.f32 %v3237_v31  ;;  %v6169_v15 = vmul.f32 -1.442695, %v10771_v38  ;;  %v10785_v19 = vadd.f32 %v2101_v43, %v10544_v54  ;;  %v2103_v14 = vpop.f32.mrb[163].mxu1  ;;  %v3974_v60 = vmul.f32 %v7532_v1, %v10661_v50  ;;  %v6847_v50 = vld [vmem:[%s11605_s5 + $0x384] ss:$8 sps:$4 sm:$0xff]  }
 0x3a0   :  { %v7536_v17 = vpop.eup %7535  ;;  %v3981_v55 = vmul.f32 %v7534_v61, %v10666_v57  ;;  %7555 = vrcp.f32 %v3238_v49  ;;  %5518 = vmatmul.mubr.bf16.gmra.mrb[12].mxu0 %v4189_v58  ;;  %v6170_v41 = vmul.f32 -1.442695, %v10778_v0  ;;  %v10797_v57 = vadd.f32 %v2103_v14, %v10549_v63  ;;  %v6853_v61 = vld [vmem:[%s11605_s5 + $0x3a4] ss:$8 sps:$4 sm:$0xff]  }
 0x3a1   :  { %v7538_v33 = vpop.eup %7537  ;;  %v3982_v10 = vmul.f32 %v7536_v17, %v10669_v59  ;;  %7557 = vpow2.f32 %v6161_v45  ;;  %v6177_v35 = vmul.f32 -1.442695, %v10785_v19  ;;  %5661 = vmatpush1.bf16.msra.mxu0 %v6839_v26 }
 0x3a2   :  { %v7540_v2 = vpop.eup %7539  ;;  %7559 = vpow2.f32 %v6162_v47  ;;  %v4197_v32 = vpack.c.bf16 %v3981_v55, %v3973_v9  ;;  %5662 = vmatprep.subr.bf16.mxu0 %v6844_v20  ;;  %v6178_v58 = vmul.f32 -1.442695, %v10797_v57  ;;  %v3989_v45 = vmul.f32 %v7538_v33, %v10679_v4  ;;  %v6848_v20 = vld [vmem:[%s11605_s5 + $0x390] ss:$8 sps:$4 sm:$0xff]  }
 0x3a3   :  { %v7542_v59 = vpop.eup %7541  ;;  %7561 = vpow2.f32 %v6169_v15  ;;  %v4198_v29 = vpack.c.bf16 %v3982_v10, %v3974_v60  ;;  %v3990_v49 = vmul.f32 %v7540_v2, %v10683_v12  ;;  %v6851_v10 = vld [vmem:[%s11605_s5 + $0x3a0] ss:$8 sps:$4 sm:$0xff]  }
 0x3a4   :  { %v7544_v5 = vpop.eup %7543  ;;  %v3245_v16 = vadd.f32 1.0, %v7542_v59  ;;  %7563 = vpow2.f32 %v6170_v41  ;;  %v2107_v22 = vpop.f32.mrb[164].mxu1 }
 0x3a5   :  { %v7546_v18 = vpop.eup %7545  ;;  %v3246_v11 = vadd.f32 1.0, %v7544_v5  ;;  %7565 = vpow2.f32 %v6177_v35  ;;  %5527 = vmatprep.mubr.bf16.mxu0 %v4198_v29  ;;  %v10803_v28 = vadd.f32 %v2107_v22, %v10544_v54  ;;  %v2109_v46 = vpop.f32.mrb[165].mxu1  ;;  %5663 = vmatpush1.bf16.msra.mxu0 %v6842_v27 }
 0x3a6   :  { %v7548_v52 = vpop.eup %7547  ;;  %7567 = vrcp.f32 %v3245_v16  ;;  %v3253_v48 = vadd.f32 1.0, %v7546_v18  ;;  %v10810_v13 = vadd.f32 %v2109_v46, %v10549_v63  ;;  %v2111_v42 = vpop.f32.mrb[166].mxu1  ;;  %5664 = vmatprep.subr.bf16.mxu0 %v6847_v50  ;;  %v6856_v50 = vld [vmem:[%s11605_s5 + $0x3b4] ss:$8 sps:$4 sm:$0xff]  }
 0x3a7   :  { %v7550_v34 = vpop.eup %7549  ;;  %7569 = vrcp.f32 %v3246_v11  ;;  %v3254_v39 = vadd.f32 1.0, %v7548_v52  ;;  %v6185_v30 = vmul.f32 -1.442695, %v10803_v28  ;;  %v10817_v37 = vadd.f32 %v2111_v42, %v10544_v54  ;;  %v2113_v6 = vpop.f32.mrb[167].mxu1  ;;  %v6854_v42 = vld [vmem:[%s11605_s5 + $0x3b0] ss:$8 sps:$4 sm:$0xff]  }
 0x3a8   :  { %v7552_v31 = vpop.eup %7551  ;;  %v3997_v56 = vmul.f32 %v7550_v34, %v10694_v36  ;;  %7571 = vrcp.f32 %v3253_v48  ;;  %5528 = vmatmul.mubr.bf16.gmra.mrb[16].mxu0 %v4197_v32  ;;  %v6186_v26 = vmul.f32 -1.442695, %v10810_v13  ;;  %v10832_v12 = vadd.f32 %v2113_v6, %v10549_v63 }
 0x3a9   :  { %v7554_v1 = vpop.eup %7553  ;;  %v3998_v47 = vmul.f32 %v7552_v31, %v10697_v7  ;;  %7573 = vrcp.f32 %v3254_v39  ;;  %v6193_v43 = vmul.f32 -1.442695, %v10817_v37  ;;  %5665 = vmatpush1.bf16.msra.mxu0 %v6845_v40 }
 0x3aa   :  { %v7556_v4 = vpop.eup %7555  ;;  %7575 = vpow2.f32 %v6178_v58  ;;  %v4205_v36 = vpack.c.bf16 %v3997_v56, %v3989_v45  ;;  %5666 = vmatprep.subr.bf16.mxu0 %v6850_v44  ;;  %v6194_v5 = vmul.f32 -1.442695, %v10832_v12  ;;  %v4005_v52 = vmul.f32 %v7554_v1, %v10708_v8  ;;  %v6859_v8 = vld [vmem:[%s11605_s5 + $0x3c4] ss:$8 sps:$4 sm:$0xff]  }
 0x3ab   :  { %v7558_v15 = vpop.eup %7557  ;;  %7577 = vpow2.f32 %v6185_v30  ;;  %v4206_v7 = vpack.c.bf16 %v3998_v47, %v3990_v49  ;;  %v4006_v34 = vmul.f32 %v7556_v4, %v10714_v3  ;;  %v6857_v47 = vld [vmem:[%s11605_s5 + $0x3c0] ss:$8 sps:$4 sm:$0xff]  }
 0x3ac   :  { %v7560_v14 = vpop.eup %7559  ;;  %v3261_v17 = vadd.f32 1.0, %v7558_v15  ;;  %7579 = vpow2.f32 %v6186_v26  ;;  %v2117_v9 = vpop.f32.mrb[168].mxu1 }
 0x3ad   :  { %v7562_v55 = vpop.eup %7561  ;;  %v3262_v41 = vadd.f32 1.0, %v7560_v14  ;;  %7581 = vpow2.f32 %v6193_v43  ;;  %5537 = vmatprep.mubr.bf16.mxu0 %v4206_v7  ;;  %v10835_v33 = vadd.f32 %v2117_v9, %v10544_v54  ;;  %v2119_v60 = vpop.f32.mrb[169].mxu1  ;;  %5667 = vmatpush1.bf16.msra.mxu0 %v6848_v20 }
 0x3ae   :  { %v7564_v35 = vpop.eup %7563  ;;  %7583 = vrcp.f32 %v3261_v17  ;;  %v3269_v27 = vadd.f32 1.0, %v7562_v55  ;;  %v10841_v2 = vadd.f32 %v2119_v60, %v10549_v63  ;;  %v2121_v32 = vpop.f32.mrb[170].mxu1  ;;  %5668 = vmatprep.subr.bf16.mxu0 %v6853_v61  ;;  %v6862_v61 = vld [vmem:[%s11605_s5 + $0x3d4] ss:$8 sps:$4 sm:$0xff]  }
 0x3af   :  { %v7566_v59 = vpop.eup %7565  ;;  %7585 = vrcp.f32 %v3262_v41  ;;  %v3270_v29 = vadd.f32 1.0, %v7564_v35  ;;  %v10848_v16 = vadd.f32 %v2121_v32, %v10544_v54  ;;  %v2123_v22 = vpop.f32.mrb[171].mxu1  ;;  %v6201_v46 = vmul.f32 -1.442695, %v10835_v33 }
 0x3b0   :  { %v7568_v18 = vpop.eup %7567  ;;  %7587 = vrcp.f32 %v3269_v27  ;;  %v3277_v11 = vadd.f32 1.0, %v7566_v59  ;;  %5538 = vmatmul.mubr.bf16.gmra.mrb[20].mxu0 %v4205_v36  ;;  %v6202_v58 = vmul.f32 -1.442695, %v10841_v2  ;;  %v10864_v6 = vadd.f32 %v2123_v22, %v10549_v63  ;;  %v6860_v59 = vld [vmem:[%s11605_s5 + $0x3d0] ss:$8 sps:$4 sm:$0xff]  }
 0x3b1   :  { %v7570_v40 = vpop.eup %7569  ;;  %v4013_v48 = vmul.f32 %v7568_v18, %v10726_v25  ;;  %7589 = vrcp.f32 %v3270_v29  ;;  %5669 = vmatpush1.bf16.msra.mxu0 %v6851_v10  ;;  %v6209_v30 = vmul.f32 -1.442695, %v10848_v16 }
 0x3b2   :  { %v7572_v44 = vpop.eup %7571  ;;  %v4014_v39 = vmul.f32 %v7570_v40, %v10732_v62  ;;  %7591 = vrcp.f32 %v3277_v11  ;;  %5670 = vmatprep.subr.bf16.mxu0 %v6856_v50  ;;  %v6210_v14 = vmul.f32 -1.442695, %v10864_v6 }
 0x3b3   :  { %v7574_v25 = vpop.eup %7573  ;;  %7593 = vpow2.f32 %v6194_v5  ;;  %v4213_v31 = vpack.c.bf16 %v4013_v48, %v4005_v52  ;;  %v4021_v27 = vmul.f32 %v7572_v44, %v10739_v53  ;;  %v6865_v53 = vld [vmem:[%s11605_s5 + $0x3e4] ss:$8 sps:$4 sm:$0xff]   ;;  %v6863_v44 = vld [vmem:[%s11605_s5 + $0x3e0] ss:$8 sps:$4 sm:$0xff]  }
 0x3b4   :  { %v7576_v45 = vpop.eup %7575  ;;  %7595 = vpow2.f32 %v6201_v46  ;;  %v4214_v56 = vpack.c.bf16 %v4014_v39, %v4006_v34  ;;  %v2127_v3 = vpop.f32.mrb[172].mxu1  ;;  %v4022_v5 = vmul.f32 %v7574_v25, %v10746_v23 }
 0x3b5   :  { %v7578_v26 = vpop.eup %7577  ;;  %v3278_v62 = vadd.f32 1.0, %v7576_v45  ;;  %7597 = vpow2.f32 %v6202_v58  ;;  %v10867_v1 = vadd.f32 %v2127_v3, %v10544_v54  ;;  %v2129_v49 = vpop.f32.mrb[173].mxu1  ;;  %5671 = vmatpush1.bf16.msra.mxu0 %v6854_v42 }
 0x3b6   :  { %v7580_v43 = vpop.eup %7579  ;;  %v3285_v20 = vadd.f32 1.0, %v7578_v26  ;;  %7599 = vpow2.f32 %v6209_v30  ;;  %5547 = vmatprep.mubr.bf16.mxu0 %v4214_v56  ;;  %v10873_v4 = vadd.f32 %v2129_v49, %v10549_v63  ;;  %v2131_v36 = vpop.f32.mrb[174].mxu1  ;;  %5672 = vmatprep.subr.bf16.mxu0 %v6859_v8 }
 0x3b7   :  { %v7582_v15 = vpop.eup %7581  ;;  %7601 = vrcp.f32 %v3278_v62  ;;  %v3286_v7 = vadd.f32 1.0, %v7580_v43  ;;  %v10880_v17 = vadd.f32 %v2131_v36, %v10544_v54  ;;  %v2133_v9 = vpop.f32.mrb[175].mxu1  ;;  %v6217_v60 = vmul.f32 -1.442695, %v10867_v1 }
 0x3b8   :  { %v7584_v55 = vpop.eup %7583  ;;  %7603 = vrcp.f32 %v3285_v20  ;;  %v3293_v41 = vadd.f32 1.0, %v7582_v15  ;;  %5548 = vmatmul.mubr.bf16.gmra.mrb[24].mxu0 %v4213_v31  ;;  %v10884_v10 = vadd.f32 %v2133_v9, %v10549_v63  ;;  %v6218_v50 = vmul.f32 -1.442695, %v10873_v4 }
 0x3b9   :  { %v7586_v35 = vpop.eup %7585  ;;  %v4029_v32 = vmul.f32 %v7584_v55, %v10758_v51  ;;  %7605 = vrcp.f32 %v3286_v7  ;;  %5673 = vmatpush1.bf16.msra.mxu0 %v6857_v47  ;;  %v6225_v18 = vmul.f32 -1.442695, %v10880_v17 }
 0x3ba   :  { %v7588_v29 = vpop.eup %7587  ;;  %v4030_v22 = vmul.f32 %v7586_v35, %v10764_v24  ;;  %7607 = vrcp.f32 %v3293_v41  ;;  %5674 = vmatprep.subr.bf16.mxu0 %v6862_v61  ;;  %v6226_v11 = vmul.f32 -1.442695, %v10884_v10  ;;  %v6866_v61 = vld [vmem:[%s11605_s5 + $0x3f0] ss:$8 sps:$4 sm:$0xff]  }
 0x3bb   :  { %v7590_v51 = vpop.eup %7589  ;;  %7609 = vpow2.f32 %v6210_v14  ;;  %v4221_v46 = vpack.c.bf16 %v4029_v32, %v4021_v27  ;;  %v4037_v31 = vmul.f32 %v7588_v29, %v10771_v38 }
 0x3bc   :  { %v7592_v40 = vpop.eup %7591  ;;  %7611 = vpow2.f32 %v6217_v60  ;;  %v4222_v52 = vpack.c.bf16 %v4030_v22, %v4022_v5  ;;  %v2137_v48 = vpop.f32.mrb[176].mxu1  ;;  %v4038_v7 = vmul.f32 %v7590_v51, %v10778_v0 }
 0x3bd   :  { %v7594_v23 = vpop.eup %7593  ;;  %v10900_v24 = vmul.f32 %v7592_v40, %v10785_v19  ;;  %7613 = vpow2.f32 %v6218_v50  ;;  %v10903_v58 = vadd.f32 %v2137_v48, %v10544_v54  ;;  %v2139_v42 = vpop.f32.mrb[177].mxu1  ;;  %5675 = vmatpush1.bf16.msra.mxu0 %v6860_v59  ;;  %v6868_v19 = vld [vmem:[%s11605_s5 + $0x3f4] ss:$8 sps:$4 sm:$0xff]  }
 0x3be   :  { %v7596_v34 = vpop.eup %7595  ;;  %v3294_v39 = vadd.f32 1.0, %v7594_v23  ;;  %7615 = vpow2.f32 %v6225_v18  ;;  %5557 = vmatprep.mubr.bf16.mxu0 %v4222_v52  ;;  %v10909_v30 = vadd.f32 %v2139_v42, %v10549_v63  ;;  %v2141_v8 = vpop.f32.mrb[178].mxu1  ;;  %5676 = vmatprep.subr.bf16.mxu0 %v6865_v53 }
 0x3bf   :  { %v7598_v25 = vpop.eup %7597  ;;  %v3301_v45 = vadd.f32 1.0, %v7596_v34  ;;  %7617 = vpow2.f32 %v6226_v11  ;;  %v10916_v56 = vadd.f32 %v2141_v8, %v10544_v54  ;;  %v2143_v3 = vpop.f32.mrb[179].mxu1  ;;  %v6233_v49 = vmul.f32 -1.442695, %v10903_v58 }
 0x3c0   :  { %v7600_v26 = vpop.eup %7599  ;;  %7619 = vrcp.f32 %v3294_v39  ;;  %v3302_v62 = vadd.f32 1.0, %v7598_v25  ;;  %5558 = vmatmul.mubr.bf16.gmra.mrb[28].mxu0 %v4221_v46  ;;  %v10920_v47 = vadd.f32 %v2143_v3, %v10549_v63  ;;  %v6234_v38 = vmul.f32 -1.442695, %v10909_v30 }
 0x3c1   :  { %v7602_v43 = vpop.eup %7601  ;;  %7621 = vrcp.f32 %v3301_v45  ;;  %v3309_v20 = vadd.f32 1.0, %v7600_v26  ;;  %v4229_v36 = vpack.c.bf16 %v10900_v24, %v4037_v31  ;;  %5677 = vmatpush1.bf16.msra.mxu0 %v6863_v44  ;;  %v6241_v9 = vmul.f32 -1.442695, %v10916_v56 }
 0x3c2   :  { %v7604_v15 = vpop.eup %7603  ;;  %v4046_v14 = vmul.f32 %v7602_v43, %v10797_v57  ;;  %7623 = vrcp.f32 %v3302_v62  ;;  %5678 = vmatprep.subr.bf16.mxu0 %v6868_v19  ;;  %v6242_v41 = vmul.f32 -1.442695, %v10920_v47 }
 0x3c3   :  { %v7606_v55 = vpop.eup %7605  ;;  %7625 = vrcp.f32 %v3309_v20  ;;  %v4053_v53 = vmul.f32 %v7604_v15, %v10803_v28 }
 0x3c4   :  { %v7608_v60 = vpop.eup %7607  ;;  %7627 = vpow2.f32 %v6233_v49  ;;  %v4230_v35 = vpack.c.bf16 %v4046_v14, %v4038_v7  ;;  %v2147_v27 = vpop.f32.mrb[180].mxu1  ;;  %v4054_v8 = vmul.f32 %v7606_v55, %v10810_v13 }
 0x3c5   :  { %v7610_v32 = vpop.eup %7609  ;;  %v4061_v50 = vmul.f32 %v7608_v60, %v10817_v37  ;;  %7629 = vpow2.f32 %v6234_v38  ;;  %v10933_v0 = vadd.f32 %v2147_v27, %v10544_v54  ;;  %v2149_v57 = vpop.f32.mrb[181].mxu1  ;;  %5679 = vmatpush1.bf16.msra.mxu0 %v6866_v61 }
 0x3c6   :  { %v7612_v59 = vpop.eup %7611  ;;  %v3310_v29 = vadd.f32 1.0, %v7610_v32  ;;  %7631 = vpow2.f32 %v6241_v9  ;;  %5567 = vmatprep.mubr.bf16.mxu0 %v4230_v35  ;;  %v10936_v5 = vadd.f32 %v2149_v57, %v10549_v63  ;;  %v2151_v22 = vpop.f32.mrb[182].mxu1 }
 0x3c7   :  { %v7614_v18 = vpop.eup %7613  ;;  %v3317_v51 = vadd.f32 1.0, %v7612_v59  ;;  %7633 = vpow2.f32 %v6242_v41  ;;  %v10940_v37 = vadd.f32 %v2151_v22, %v10544_v54  ;;  %v2153_v11 = vpop.f32.mrb[183].mxu1  ;;  %v6249_v24 = vmul.f32 -1.442695, %v10933_v0 }
 0x3c8   :  { %v7616_v46 = vpop.eup %7615  ;;  %7635 = vrcp.f32 %v3310_v29  ;;  %v3318_v40 = vadd.f32 1.0, %v7614_v18  ;;  %5568 = vmatmul.mubr.bf16.gmra.mrb[32].mxu0 %v4229_v36  ;;  %v10943_v52 = vadd.f32 %v2153_v11, %v10549_v63  ;;  %v4237_v42 = vpack.c.bf16 %v4061_v50, %v4053_v53 }
 0x3c9   :  { %v7618_v48 = vpop.eup %7617  ;;  %7637 = vrcp.f32 %v3317_v51  ;;  %v3325_v23 = vadd.f32 1.0, %v7616_v46  ;;  %v6250_v34 = vmul.f32 -1.442695, %v10936_v5  ;;  %v6257_v25 = vmul.f32 -1.442695, %v10940_v37 }
 0x3ca   :  { %v7620_v28 = vpop.eup %7619  ;;  %7639 = vrcp.f32 %v3318_v40  ;;  %v3326_v44 = vadd.f32 1.0, %v7618_v48  ;;  %v6258_v45 = vmul.f32 -1.442695, %v10943_v52  ;;  %v943_v11 = vsub.s32 6, %v11799_v21 }
 0x3cb   :  { %v7622_v39 = vpop.eup %7621  ;;  %v4062_v19 = vmul.f32 %v7620_v28, %v10832_v12  ;;  %7641 = vrcp.f32 %v3325_v23 }
 0x3cc   :  { %v7624_v31 = vpop.eup %7623  ;;  %7643 = vrcp.f32 %v3326_v44  ;;  %v2157_v3 = vpop.f32.mrb[184].mxu1  ;;  %v4069_v61 = vmul.f32 %v7622_v39, %v10835_v33 }
 0x3cd   :  { %v7626_v26 = vpop.eup %7625  ;;  %7645 = vpow2.f32 %v6249_v24  ;;  %v4238_v62 = vpack.c.bf16 %v4062_v19, %v4054_v8  ;;  %v10952_v49 = vadd.f32 %v2157_v3, %v10544_v54  ;;  %v2159_v43 = vpop.f32.mrb[185].mxu1  ;;  %v4070_v59 = vmul.f32 %v7624_v31, %v10841_v2 }
 0x3ce   :  { %v7628_v20 = vpop.eup %7627  ;;  %v4077_v13 = vmul.f32 %v7626_v26, %v10848_v16  ;;  %7647 = vpow2.f32 %v6250_v34  ;;  %v10956_v12 = vadd.f32 %v2159_v43, %v10549_v63  ;;  %v2161_v38 = vpop.f32.mrb[186].mxu1  ;;  %v947_v2 = vsub.s32 7, %v11799_v21  ;;  %v7959_v26 = vld [vmem:[%s11606_s4] sm:$0xff] }
 0x3cf   :  { %v7630_v36 = vpop.eup %7629  ;;  %v3333_v15 = vadd.f32 1.0, %v7628_v20  ;;  %7649 = vpow2.f32 %v6257_v25  ;;  %5577 = vmatprep.mubr.bf16.mxu0 %v4238_v62  ;;  %v10960_v7 = vadd.f32 %v2161_v38, %v10544_v54  ;;  %v2163_v14 = vpop.f32.mrb[187].mxu1  ;;  %v6265_v35 = vmul.f32 -1.442695, %v10952_v49 }
 0x3d0   :  { %v7632_v9 = vpop.eup %7631  ;;  %v3334_v55 = vadd.f32 1.0, %v7630_v36  ;;  %7651 = vpow2.f32 %v6258_v45  ;;  %5578 = vmatmul.mubr.bf16.gmra.mrb[36].mxu0 %v4237_v42  ;;  %v10963_v16 = vadd.f32 %v2163_v14, %v10549_v63  ;;  %v4245_v33 = vpack.c.bf16 %v4077_v13, %v4069_v61 }
 0x3d1   :  { %v7634_v41 = vpop.eup %7633  ;;  %7653 = vrcp.f32 %v3333_v15  ;;  %v3341_v60 = vadd.f32 1.0, %v7632_v9  ;;  %v6266_v50 = vmul.f32 -1.442695, %v10956_v12  ;;  %v6273_v22 = vmul.f32 -1.442695, %v10960_v7 }
 0x3d2   :  { %v7636_v27 = vpop.eup %7635  ;;  %7655 = vrcp.f32 %v3334_v55  ;;  %v3342_v32 = vadd.f32 1.0, %v7634_v41  ;;  %v6274_v53 = vmul.f32 -1.442695, %v10963_v16  ;;  %v10997_v36 = vrot.slane %v7959_v26, %v947_v2 }
 0x3d3   :  { %v7638_v57 = vpop.eup %7637  ;;  %v4078_v29 = vmul.f32 %v7636_v27, %v10864_v6  ;;  %7657 = vrcp.f32 %v3341_v60 }
 0x3d4   :  { %v7640_v18 = vpop.eup %7639  ;;  %7659 = vrcp.f32 %v3342_v32  ;;  %v2167_v51 = vpop.f32.mrb[188].mxu1 }
 0x3d5   :  { %v7642_v46 = vpop.eup %7641  ;;  %7661 = vpow2.f32 %v6265_v35  ;;  %v4246_v40 = vpack.c.bf16 %v4078_v29, %v4070_v59  ;;  %v10973_v48 = vadd.f32 %v2167_v51, %v10544_v54  ;;  %v2169_v23 = vpop.f32.mrb[189].mxu1  ;;  %v4086_v24 = vmul.f32 %v7640_v18, %v10873_v4 }
 0x3d6   :  { %v7644_v6 = vpop.eup %7643  ;;  %v4093_v42 = vmul.f32 %v7642_v46, %v10880_v17  ;;  %7663 = vpow2.f32 %v6266_v50  ;;  %v10979_v28 = vadd.f32 %v2169_v23, %v10549_v63  ;;  %v2171_v44 = vpop.f32.mrb[190].mxu1  ;;  %v4085_v4 = vmul.f32 %v7638_v57, %v10867_v1 }
 0x3d7   :  { %v7646_v34 = vpop.eup %7645  ;;  %v4094_v39 = vmul.f32 %v7644_v6, %v10884_v10  ;;  %7665 = vpow2.f32 %v6273_v22  ;;  %5587 = vmatprep.mubr.bf16.mxu0 %v4246_v40  ;;  %v6281_v8 = vmul.f32 -1.442695, %v10973_v48  ;;  %v10984_v19 = vadd.f32 %v2171_v44, %v10544_v54  ;;  %v2173_v21 = vpop.f32.mrb[191].mxu1 }
 0x3d8   :  { %v7648_v25 = vpop.eup %7647  ;;  %v3349_v17 = vadd.f32 1.0, %v7646_v34  ;;  %7667 = vpow2.f32 %v6274_v53  ;;  %5588 = vmatmul.mubr.bf16.gmra.mrb[40].mxu0 %v4245_v33  ;;  %v10988_v31 = vadd.f32 %v2173_v21, %v10549_v63  ;;  %v10993_v54 = vrot.slane %v7959_v26, %v943_v11 }
 0x3d9   :  { %v7650_v45 = vpop.eup %7649  ;;  %v3350_v3 = vadd.f32 1.0, %v7648_v25  ;;  %7669 = vpow2.f32 %v6281_v8  ;;  %v4254_v10 = vpack.c.bf16 %v4094_v39, %v4086_v24  ;;  %v6282_v1 = vmul.f32 -1.442695, %v10979_v28 }
 0x3da   :  { %v7652_v62 = vpop.eup %7651  ;;  %7671 = vrcp.f32 %v3349_v17  ;;  %v3357_v43 = vadd.f32 1.0, %v7650_v45  ;;  %v4253_v20 = vpack.c.bf16 %v4093_v42, %v4085_v4  ;;  %v6289_v38 = vmul.f32 -1.442695, %v10984_v19 }
 0x3db   :  { %v7654_v13 = vpop.eup %7653  ;;  %7673 = vrcp.f32 %v3350_v3  ;;  %v3358_v63 = vadd.f32 1.0, %v7652_v62  ;;  %5597 = vmatprep.mubr.bf16.mxu0 %v4254_v10  ;;  %v6290_v15 = vmul.f32 -1.442695, %v10988_v31 }
 0x3dc   :  { %v7656_v61 = vpop.eup %7655  ;;  %7675 = vrcp.f32 %v3357_v43  ;;  %v2210_v14 = vpop.f32.mrb[192].mxu1  ;;  %v4101_v18 = vmul.f32 %v7654_v13, %v10903_v58 }
 0x3dd   :  { %v7658_v9 = vpop.eup %7657  ;;  %7677 = vrcp.f32 %v3358_v63  ;;  %v11001_v55 = vadd.f32 %v2210_v14, %v10993_v54  ;;  %v2212_v41 = vpop.f32.mrb[193].mxu1  ;;  %v4102_v35 = vmul.f32 %v7656_v61, %v10909_v30 }
 0x3de   :  { %v7660_v60 = vpop.eup %7659  ;;  %v4109_v33 = vmul.f32 %v7658_v9, %v10916_v56  ;;  %7679 = vpow2.f32 %v6282_v1  ;;  %v2214_v27 = vpop.f32.mrb[194].mxu1  ;;  %v11008_v59 = vadd.f32 %v2212_v41, %v10997_v36 }
 0x3df   :  { %v7662_v32 = vpop.eup %7661  ;;  %v4110_v50 = vmul.f32 %v7660_v60, %v10920_v47  ;;  %7681 = vpow2.f32 %v6289_v38  ;;  %v6043_v57 = vmul.f32 -1.442695, %v11001_v55  ;;  %v2216_v29 = vpop.f32.mrb[195].mxu1  ;;  %v11012_v30 = vadd.f32 %v2214_v27, %v10993_v54 }
 0x3e0   :  { %v7664_v22 = vpop.eup %7663  ;;  %v3365_v53 = vadd.f32 1.0, %v7662_v32  ;;  %7683 = vpow2.f32 %v6290_v15  ;;  %5598 = vmatmul.mubr.bf16.gmra.mrb[44].mxu0 %v4253_v20  ;;  %v11015_v47 = vadd.f32 %v2216_v29, %v10997_v36  ;;  %v4261_v23 = vpack.c.bf16 %v4109_v33, %v4101_v18 }
 0x3e1   :  { %v7666_v56 = vpop.eup %7665  ;;  %v3366_v51 = vadd.f32 1.0, %v7664_v22  ;;  %7685 = vpow2.f32 %v6043_v57  ;;  %v4262_v11 = vpack.c.bf16 %v4110_v50, %v4102_v35  ;;  %v6044_v6 = vmul.f32 -1.442695, %v11008_v59 }
 0x3e2   :  { %v7668_v46 = vpop.eup %7667  ;;  %7687 = vrcp.f32 %v3365_v53  ;;  %v3373_v40 = vadd.f32 1.0, %v7666_v56  ;;  %v6051_v44 = vmul.f32 -1.442695, %v11012_v30  ;;  %v6052_v8 = vmul.f32 -1.442695, %v11015_v47 }
 0x3e3   :  { %v7670_v2 = vpop.eup %7669  ;;  %7689 = vrcp.f32 %v3366_v51  ;;  %v3374_v58 = vadd.f32 1.0, %v7668_v46  ;;  %5607 = vmatprep.mubr.bf16.mxu0 %v4262_v11 }
 0x3e4   :  { %v7672_v24 = vpop.eup %7671  ;;  %7691 = vrcp.f32 %v3373_v40  ;;  %v3381_v42 = vadd.f32 1.0, %v7670_v2  ;;  %v2220_v34 = vpop.f32.mrb[196].mxu1 }
 0x3e5   :  { %v7674_v39 = vpop.eup %7673  ;;  %7693 = vrcp.f32 %v3374_v58  ;;  %v11021_v21 = vadd.f32 %v2220_v34, %v10993_v54  ;;  %v2222_v25 = vpop.f32.mrb[197].mxu1  ;;  %v4117_v17 = vmul.f32 %v7672_v24, %v10933_v0 }
 0x3e6   :  { %v7676_v4 = vpop.eup %7675  ;;  %7695 = vrcp.f32 %v3381_v42  ;;  %v2224_v45 = vpop.f32.mrb[198].mxu1  ;;  %v11027_v62 = vadd.f32 %v2222_v25, %v10997_v36  ;;  %v4118_v20 = vmul.f32 %v7674_v39, %v10936_v5 }
 0x3e7   :  { %v7678_v3 = vpop.eup %7677  ;;  %v4125_v10 = vmul.f32 %v7676_v4, %v10940_v37  ;;  %7697 = vpow2.f32 %v6044_v6  ;;  %v6059_v26 = vmul.f32 -1.442695, %v11021_v21  ;;  %v2226_v43 = vpop.f32.mrb[199].mxu1  ;;  %v11032_v0 = vadd.f32 %v2224_v45, %v10993_v54 }
 0x3e8   :  { %v7680_v1 = vpop.eup %7679  ;;  %v4126_v13 = vmul.f32 %v7678_v3, %v10943_v52  ;;  %7699 = vpow2.f32 %v6051_v44  ;;  %5608 = vmatmul.mubr.bf16.gmra.mrb[48].mxu0 %v4261_v23  ;;  %v11035_v37 = vadd.f32 %v2226_v43, %v10997_v36  ;;  %v6060_v52 = vmul.f32 -1.442695, %v11027_v62 }
 0x3e9   :  { %v7682_v63 = vpop.eup %7681  ;;  %v3382_v38 = vadd.f32 1.0, %v7680_v1  ;;  %7701 = vpow2.f32 %v6052_v8  ;;  %v4269_v61 = vpack.c.bf16 %v4125_v10, %v4117_v17  ;;  %v6067_v33 = vmul.f32 -1.442695, %v11032_v0 }
 0x3ea   :  { %v7684_v15 = vpop.eup %7683  ;;  %v3389_v14 = vadd.f32 1.0, %v7682_v63  ;;  %7703 = vpow2.f32 %v6059_v26  ;;  %v4270_v9 = vpack.c.bf16 %v4126_v13, %v4118_v20  ;;  %v6068_v50 = vmul.f32 -1.442695, %v11035_v37 }
 0x3eb   :  { %v7686_v41 = vpop.eup %7685  ;;  %7705 = vrcp.f32 %v3382_v38  ;;  %v3390_v5 = vadd.f32 1.0, %v7684_v15 }
 0x3ec   :  { %v7688_v60 = vpop.eup %7687  ;;  %7707 = vrcp.f32 %v3389_v14  ;;  %v3143_v35 = vadd.f32 1.0, %v7686_v41  ;;  %5617 = vmatprep.mubr.bf16.mxu0 %v4270_v9  ;;  %v2230_v27 = vpop.f32.mrb[200].mxu1 }
 0x3ed   :  { %v7690_v32 = vpop.eup %7689  ;;  %7709 = vrcp.f32 %v3390_v5  ;;  %v11041_v57 = vadd.f32 %v2230_v27, %v10993_v54  ;;  %v2232_v29 = vpop.f32.mrb[201].mxu1  ;;  %v4133_v18 = vmul.f32 %v7688_v60, %v10952_v49 }
 0x3ee   :  { %v7692_v22 = vpop.eup %7691  ;;  %7711 = vrcp.f32 %v3143_v35  ;;  %v11045_v53 = vadd.f32 %v2232_v29, %v10997_v36  ;;  %v2234_v56 = vpop.f32.mrb[202].mxu1  ;;  %v4134_v11 = vmul.f32 %v7690_v32, %v10956_v12 }
 0x3ef   :  { %v7694_v51 = vpop.eup %7693  ;;  %v4141_v46 = vmul.f32 %v7692_v22, %v10960_v7  ;;  %7713 = vpow2.f32 %v6060_v52  ;;  %v6075_v40 = vmul.f32 -1.442695, %v11041_v57  ;;  %v2236_v23 = vpop.f32.mrb[203].mxu1  ;;  %v11053_v6 = vadd.f32 %v2234_v56, %v10993_v54 }
 0x3f0   :  { %v7696_v2 = vpop.eup %7695  ;;  %v4142_v58 = vmul.f32 %v7694_v51, %v10963_v16  ;;  %7715 = vpow2.f32 %v6067_v33  ;;  %5618 = vmatmul.mubr.bf16.gmra.mrb[52].mxu0 %v4269_v61  ;;  %v6076_v49 = vmul.f32 -1.442695, %v11045_v53  ;;  %v11056_v12 = vadd.f32 %v2236_v23, %v10997_v36 }
 0x3f1   :  { %v7698_v24 = vpop.eup %7697  ;;  %7717 = vpow2.f32 %v6068_v50  ;;  %v4277_v7 = vpack.c.bf16 %v4141_v46, %v4133_v18  ;;  %v6083_v4 = vmul.f32 -1.442695, %v11053_v6  ;;  %v4149_v38 = vmul.f32 %v7696_v2, %v10973_v48 }
 0x3f2   :  { %v7700_v42 = vpop.eup %7699  ;;  %v3144_v44 = vadd.f32 1.0, %v7698_v24  ;;  %7719 = vpow2.f32 %v6075_v40  ;;  %v4278_v34 = vpack.c.bf16 %v4142_v58, %v4134_v11  ;;  %v6084_v10 = vmul.f32 -1.442695, %v11056_v12 }
 0x3f3   :  { %v7702_v39 = vpop.eup %7701  ;;  %v3151_v8 = vadd.f32 1.0, %v7700_v42  ;;  %7721 = vpow2.f32 %v6076_v49 }
 0x3f4   :  { %v7704_v16 = vpop.eup %7703  ;;  %7723 = vrcp.f32 %v3144_v44  ;;  %v3152_v25 = vadd.f32 1.0, %v7702_v39  ;;  %5627 = vmatprep.mubr.bf16.mxu0 %v4278_v34  ;;  %v2240_v17 = vpop.f32.mrb[204].mxu1 }
 0x3f5   :  { %v7706_v45 = vpop.eup %7705  ;;  %7725 = vrcp.f32 %v3151_v8  ;;  %v3159_v3 = vadd.f32 1.0, %v7704_v16  ;;  %v11061_v26 = vadd.f32 %v2240_v17, %v10993_v54  ;;  %v2242_v43 = vpop.f32.mrb[205].mxu1 }
 0x3f6   :  { %v7708_v1 = vpop.eup %7707  ;;  %7727 = vrcp.f32 %v3152_v25  ;;  %v11064_v20 = vadd.f32 %v2242_v43, %v10997_v36  ;;  %v2244_v13 = vpop.f32.mrb[206].mxu1  ;;  %v4150_v41 = vmul.f32 %v7706_v45, %v10979_v28 }
 0x3f7   :  { %v7710_v63 = vpop.eup %7709  ;;  %v4157_v61 = vmul.f32 %v7708_v1, %v10984_v19  ;;  %7729 = vrcp.f32 %v3159_v3  ;;  %v6091_v15 = vmul.f32 -1.442695, %v11061_v26  ;;  %v2246_v14 = vpop.f32.mrb[207].mxu1  ;;  %v11073_v35 = vadd.f32 %v2244_v13, %v10993_v54 }
 0x3f8   :  { %v7712_v9 = vpop.eup %7711  ;;  %v4158_v5 = vmul.f32 %v7710_v63, %v10988_v31  ;;  %7731 = vpow2.f32 %v6083_v4  ;;  %5628 = vmatmul.mubr.bf16.gmra.mrb[56].mxu0 %v4277_v7  ;;  %v6092_v52 = vmul.f32 -1.442695, %v11064_v20  ;;  %v11076_v27 = vadd.f32 %v2246_v14, %v10997_v36 }
 0x3f9   :  { %v7714_v60 = vpop.eup %7713  ;;  %7733 = vpow2.f32 %v6084_v10  ;;  %v4285_v48 = vpack.c.bf16 %v4157_v61, %v4149_v38  ;;  %v6099_v51 = vmul.f32 -1.442695, %v11073_v35  ;;  %v3911_v34 = vmul.f32 %v7712_v9, %v11001_v55 }
 0x3fa   :  { %v7716_v19 = vpop.eup %7715  ;;  %v3160_v33 = vadd.f32 1.0, %v7714_v60  ;;  %7735 = vpow2.f32 %v6091_v15  ;;  %v4286_v32 = vpack.c.bf16 %v4158_v5, %v4150_v41  ;;  %v6100_v2 = vmul.f32 -1.442695, %v11076_v27 }
 0x3fb   :  { %v7718_v28 = vpop.eup %7717  ;;  %v3167_v50 = vadd.f32 1.0, %v7716_v19  ;;  %7737 = vpow2.f32 %v6092_v52 }
 0x3fc   :  { %v7720_v31 = vpop.eup %7719  ;;  %7739 = vrcp.f32 %v3160_v33  ;;  %v3168_v29 = vadd.f32 1.0, %v7718_v28  ;;  %5637 = vmatprep.mubr.bf16.mxu0 %v4286_v32  ;;  %v2250_v22 = vpop.f32.mrb[208].mxu1 }
 0x3fd   :  { %v7722_v18 = vpop.eup %7721  ;;  %7741 = vrcp.f32 %v3167_v50  ;;  %v3175_v56 = vadd.f32 1.0, %v7720_v31  ;;  %v11080_v11 = vadd.f32 %v2250_v22, %v10993_v54  ;;  %v2252_v46 = vpop.f32.mrb[209].mxu1 }
 0x3fe   :  { %v7724_v40 = vpop.eup %7723  ;;  %7743 = vrcp.f32 %v3168_v29  ;;  %v3176_v23 = vadd.f32 1.0, %v7722_v18  ;;  %v11084_v58 = vadd.f32 %v2252_v46, %v10997_v36  ;;  %v2254_v49 = vpop.f32.mrb[210].mxu1 }
 0x3ff   :  { %v7726_v24 = vpop.eup %7725  ;;  %7745 = vrcp.f32 %v3175_v56  ;;  %v6107_v7 = vmul.f32 -1.442695, %v11080_v11  ;;  %v2256_v42 = vpop.f32.mrb[211].mxu1  ;;  %v3912_v25 = vmul.f32 %v7724_v40, %v11008_v59  ;;  %v11093_v17 = vadd.f32 %v2254_v49, %v10993_v54 }
 0x400   :  { %v7728_v44 = vpop.eup %7727  ;;  %v3919_v39 = vmul.f32 %v7726_v24, %v11012_v30  ;;  %7747 = vrcp.f32 %v3176_v23  ;;  %5638 = vmatmul.mubr.bf16.gmra.mrb[60].mxu0 %v4285_v48  ;;  %v6108_v8 = vmul.f32 -1.442695, %v11084_v58  ;;  %v11096_v55 = vadd.f32 %v2256_v42, %v10997_v36 }
 0x401   :  { %v7730_v16 = vpop.eup %7729  ;;  %v3920_v4 = vmul.f32 %v7728_v44, %v11015_v47  ;;  %7749 = vpow2.f32 %v6099_v51  ;;  %v6115_v38 = vmul.f32 -1.442695, %v11093_v17 }
 0x402   :  { %v7732_v45 = vpop.eup %7731  ;;  %v4167_v3 = vpack.c.bf16 %v3919_v39, %v3911_v34  ;;  %7751 = vpow2.f32 %v6100_v2  ;;  %v6116_v41 = vmul.f32 -1.442695, %v11096_v55  ;;  %v3927_v28 = vmul.f32 %v7730_v16, %v11021_v21 }
 0x403   :  { %v7734_v30 = vpop.eup %7733  ;;  %v3183_v10 = vadd.f32 1.0, %v7732_v45  ;;  %7753 = vpow2.f32 %v6107_v7  ;;  %v4168_v43 = vpack.c.bf16 %v3920_v4, %v3912_v25 }
 0x404   :  { %v7736_v1 = vpop.eup %7735  ;;  %v3184_v13 = vadd.f32 1.0, %v7734_v30  ;;  %7755 = vpow2.f32 %v6108_v8  ;;  %v2260_v59 = vpop.f32.mrb[212].mxu1 }
 0x405   :  { %v7738_v63 = vpop.eup %7737  ;;  %7757 = vrcp.f32 %v3183_v10  ;;  %v3191_v47 = vadd.f32 1.0, %v7736_v1  ;;  %5680 = vmatprep.mubr.bf16.mxu0 %v4168_v43  ;;  %v11100_v61 = vadd.f32 %v2260_v59, %v10993_v54  ;;  %v2262_v15 = vpop.f32.mrb[213].mxu1 }
 0x406   :  { %v7740_v14 = vpop.eup %7739  ;;  %7759 = vrcp.f32 %v3184_v13  ;;  %v3192_v9 = vadd.f32 1.0, %v7738_v63  ;;  %v11104_v5 = vadd.f32 %v2262_v15, %v10997_v36  ;;  %v2264_v52 = vpop.f32.mrb[214].mxu1 }
 0x407   :  { %v7742_v60 = vpop.eup %7741  ;;  %7761 = vrcp.f32 %v3191_v47  ;;  %v6123_v48 = vmul.f32 -1.442695, %v11100_v61  ;;  %v11108_v19 = vadd.f32 %v2264_v52, %v10993_v54  ;;  %v2266_v33 = vpop.f32.mrb[215].mxu1  ;;  %v3928_v22 = vmul.f32 %v7740_v14, %v11027_v62 }
 0x408   :  { %v7744_v32 = vpop.eup %7743  ;;  %v3935_v50 = vmul.f32 %v7742_v60, %v11032_v0  ;;  %7763 = vrcp.f32 %v3192_v9  ;;  %5681 = vmatmul.mubr.bf16.vlgmr.msra.gmra.mrb[0].mxu0 %v4167_v3  ;;  %v6124_v31 = vmul.f32 -1.442695, %v11104_v5  ;;  %v11117_v46 = vadd.f32 %v2266_v33, %v10997_v36 }
 0x409   :  { %v7746_v29 = vpop.eup %7745  ;;  %v3936_v18 = vmul.f32 %v7744_v32, %v11035_v37  ;;  %7765 = vpow2.f32 %v6115_v38  ;;  %v6131_v56 = vmul.f32 -1.442695, %v11108_v19 }
 0x40a   :  { %v7748_v51 = vpop.eup %7747  ;;  %7767 = vpow2.f32 %v6116_v41  ;;  %v4175_v21 = vpack.c.bf16 %v3935_v50, %v3927_v28  ;;  %v6132_v34 = vmul.f32 -1.442695, %v11117_v46  ;;  %v3943_v10 = vmul.f32 %v7746_v29, %v11041_v57 }
 0x40b   :  { %v7750_v40 = vpop.eup %7749  ;;  %7769 = vpow2.f32 %v6123_v48  ;;  %v4176_v0 = vpack.c.bf16 %v3936_v18, %v3928_v22  ;;  %v3944_v59 = vmul.f32 %v7748_v51, %v11045_v53 }
 0x40c   :  { %v7752_v23 = vpop.eup %7751  ;;  %v3199_v2 = vadd.f32 1.0, %v7750_v40  ;;  %7771 = vpow2.f32 %v6124_v31  ;;  %v2270_v49 = vpop.f32.mrb[216].mxu1 }
 0x40d   :  { %v7754_v24 = vpop.eup %7753  ;;  %v3200_v62 = vadd.f32 1.0, %v7752_v23  ;;  %7773 = vpow2.f32 %v6131_v56  ;;  %5690 = vmatprep.mubr.bf16.mxu0 %v4176_v0  ;;  %v11120_v37 = vadd.f32 %v2270_v49, %v10993_v54  ;;  %v2272_v7 = vpop.f32.mrb[217].mxu1 }
 0x40e   :  { %v7756_v42 = vpop.eup %7755  ;;  %7775 = vrcp.f32 %v3199_v2  ;;  %v3207_v44 = vadd.f32 1.0, %v7754_v24  ;;  %v11124_v39 = vadd.f32 %v2272_v7, %v10997_v36  ;;  %v2274_v8 = vpop.f32.mrb[218].mxu1 }
 0x40f   :  { %v7758_v16 = vpop.eup %7757  ;;  %7777 = vrcp.f32 %v3200_v62  ;;  %v3208_v25 = vadd.f32 1.0, %v7756_v42  ;;  %v6139_v4 = vmul.f32 -1.442695, %v11120_v37  ;;  %v11128_v45 = vadd.f32 %v2274_v8, %v10993_v54  ;;  %v2276_v3 = vpop.f32.mrb[219].mxu1 }
 0x410   :  { %v7760_v30 = vpop.eup %7759  ;;  %v3951_v43 = vmul.f32 %v7758_v16, %v11053_v6  ;;  %7779 = vrcp.f32 %v3207_v44  ;;  %5691 = vmatmul.mubr.bf16.gmra.mrb[4].mxu0 %v4175_v21  ;;  %v6140_v1 = vmul.f32 -1.442695, %v11124_v39  ;;  %v11137_v57 = vadd.f32 %v2276_v3, %v10997_v36 }
 0x411   :  { %v7762_v13 = vpop.eup %7761  ;;  %v3952_v63 = vmul.f32 %v7760_v30, %v11056_v12  ;;  %7781 = vrcp.f32 %v3208_v25  ;;  %v6147_v47 = vmul.f32 -1.442695, %v11128_v45 }
 0x412   :  { %v7764_v38 = vpop.eup %7763  ;;  %7783 = vpow2.f32 %v6132_v34  ;;  %v4183_v15 = vpack.c.bf16 %v3951_v43, %v3943_v10  ;;  %v6148_v22 = vmul.f32 -1.442695, %v11137_v57  ;;  %v3959_v23 = vmul.f32 %v7762_v13, %v11061_v26 }
 0x413   :  { %v7766_v14 = vpop.eup %7765  ;;  %7785 = vpow2.f32 %v6139_v4  ;;  %v4184_v6 = vpack.c.bf16 %v3952_v63, %v3944_v59  ;;  %v3960_v62 = vmul.f32 %v7764_v38, %v11064_v20 }
 0x414   :  { %v7768_v9 = vpop.eup %7767  ;;  %v3215_v41 = vadd.f32 1.0, %v7766_v14  ;;  %7787 = vpow2.f32 %v6140_v1  ;;  %v2280_v52 = vpop.f32.mrb[220].mxu1 }
 0x415   :  { %v7770_v60 = vpop.eup %7769  ;;  %v3216_v53 = vadd.f32 1.0, %v7768_v9  ;;  %7789 = vpow2.f32 %v6147_v47  ;;  %5700 = vmatprep.mubr.bf16.mxu0 %v4184_v6  ;;  %v11140_v12 = vadd.f32 %v2280_v52, %v10993_v54  ;;  %v2282_v48 = vpop.f32.mrb[221].mxu1 }
 0x416   :  { %v7772_v33 = vpop.eup %7771  ;;  %7791 = vrcp.f32 %v3215_v41  ;;  %v3223_v32 = vadd.f32 1.0, %v7770_v60  ;;  %v11143_v28 = vadd.f32 %v2282_v48, %v10997_v36  ;;  %v2284_v50 = vpop.f32.mrb[222].mxu1 }
 0x417   :  { %v7774_v31 = vpop.eup %7773  ;;  %7793 = vrcp.f32 %v3216_v53  ;;  %v3224_v29 = vadd.f32 1.0, %v7772_v33  ;;  %v11147_v18 = vadd.f32 %v2284_v50, %v10993_v54  ;;  %v2286_v56 = vpop.f32.mrb[223].mxu1  ;;  %v6155_v40 = vmul.f32 -1.442695, %v11140_v12 }
 0x418   :  { %v7776_v51 = vpop.eup %7775  ;;  %7795 = vrcp.f32 %v3223_v32  ;;  %v3231_v21 = vadd.f32 1.0, %v7774_v31  ;;  %5701 = vmatmul.mubr.bf16.gmra.mrb[8].mxu0 %v4183_v15  ;;  %v6156_v49 = vmul.f32 -1.442695, %v11143_v28  ;;  %v11157_v34 = vadd.f32 %v2286_v56, %v10997_v36 }
 0x419   :  { %v7778_v0 = vpop.eup %7777  ;;  %v3967_v2 = vmul.f32 %v7776_v51, %v11073_v35  ;;  %7797 = vrcp.f32 %v3224_v29  ;;  %v6163_v42 = vmul.f32 -1.442695, %v11147_v18 }
 0x41a   :  { %v7780_v24 = vpop.eup %7779  ;;  %v3968_v7 = vmul.f32 %v7778_v0, %v11076_v27  ;;  %7799 = vrcp.f32 %v3231_v21  ;;  %v6164_v59 = vmul.f32 -1.442695, %v11157_v34 }
 0x41b   :  { %v7782_v44 = vpop.eup %7781  ;;  %7801 = vpow2.f32 %v6148_v22  ;;  %v4191_v8 = vpack.c.bf16 %v3967_v2, %v3959_v23  ;;  %v3975_v41 = vmul.f32 %v7780_v24, %v11080_v11 }
 0x41c   :  { %v7784_v26 = vpop.eup %7783  ;;  %7803 = vpow2.f32 %v6155_v40  ;;  %v4192_v35 = vpack.c.bf16 %v3968_v7, %v3960_v62  ;;  %v2290_v16 = vpop.f32.mrb[224].mxu1  ;;  %v3976_v48 = vmul.f32 %v7782_v44, %v11084_v58 }
 0x41d   :  { %v7786_v25 = vpop.eup %7785  ;;  %v3232_v4 = vadd.f32 1.0, %v7784_v26  ;;  %7805 = vpow2.f32 %v6156_v49  ;;  %v11160_v20 = vadd.f32 %v2290_v16, %v10993_v54  ;;  %v2292_v27 = vpop.f32.mrb[225].mxu1 }
 0x41e   :  { %v7788_v3 = vpop.eup %7787  ;;  %v3239_v30 = vadd.f32 1.0, %v7786_v25  ;;  %7807 = vpow2.f32 %v6163_v42  ;;  %5710 = vmatprep.mubr.bf16.mxu0 %v4192_v35  ;;  %v11163_v10 = vadd.f32 %v2292_v27, %v10997_v36  ;;  %v2294_v43 = vpop.f32.mrb[226].mxu1 }
 0x41f   :  { %v7790_v1 = vpop.eup %7789  ;;  %7809 = vrcp.f32 %v3232_v4  ;;  %v3240_v13 = vadd.f32 1.0, %v7788_v3  ;;  %v11167_v63 = vadd.f32 %v2294_v43, %v10993_v54  ;;  %v2296_v47 = vpop.f32.mrb[227].mxu1  ;;  %v6171_v14 = vmul.f32 -1.442695, %v11160_v20 }
 0x420   :  { %v7792_v38 = vpop.eup %7791  ;;  %7811 = vrcp.f32 %v3239_v30  ;;  %v3247_v15 = vadd.f32 1.0, %v7790_v1  ;;  %5711 = vmatmul.mubr.bf16.gmra.mrb[12].mxu0 %v4191_v8  ;;  %v11171_v6 = vadd.f32 %v2296_v47, %v10997_v36  ;;  %v6172_v60 = vmul.f32 -1.442695, %v11163_v10 }
 0x421   :  { %v7794_v9 = vpop.eup %7793  ;;  %v3983_v52 = vmul.f32 %v7792_v38, %v11093_v17  ;;  %7813 = vrcp.f32 %v3240_v13  ;;  %v6179_v32 = vmul.f32 -1.442695, %v11167_v63 }
 0x422   :  { %v7796_v53 = vpop.eup %7795  ;;  %v3984_v33 = vmul.f32 %v7794_v9, %v11096_v55  ;;  %7815 = vrcp.f32 %v3247_v15  ;;  %v6180_v31 = vmul.f32 -1.442695, %v11171_v6 }
 0x423   :  { %v7798_v50 = vpop.eup %7797  ;;  %7817 = vpow2.f32 %v6164_v59  ;;  %v4199_v29 = vpack.c.bf16 %v3983_v52, %v3975_v41  ;;  %v3991_v49 = vmul.f32 %v7796_v53, %v11100_v61 }
 0x424   :  { %v7800_v22 = vpop.eup %7799  ;;  %7819 = vpow2.f32 %v6171_v14  ;;  %v4200_v11 = vpack.c.bf16 %v3984_v33, %v3976_v48  ;;  %v2300_v17 = vpop.f32.mrb[228].mxu1  ;;  %v3992_v4 = vmul.f32 %v7798_v50, %v11104_v5 }
 0x425   :  { %v7802_v56 = vpop.eup %7801  ;;  %v3999_v51 = vmul.f32 %v7800_v22, %v11108_v19  ;;  %7821 = vpow2.f32 %v6172_v60  ;;  %v11182_v58 = vadd.f32 %v2300_v17, %v10993_v54  ;;  %v2302_v55 = vpop.f32.mrb[229].mxu1 }
 0x426   :  { %v7804_v21 = vpop.eup %7803  ;;  %v3248_v40 = vadd.f32 1.0, %v7802_v56  ;;  %7823 = vpow2.f32 %v6179_v32  ;;  %5720 = vmatprep.mubr.bf16.mxu0 %v4200_v11  ;;  %v11185_v0 = vadd.f32 %v2302_v55, %v10997_v36  ;;  %v2304_v23 = vpop.f32.mrb[230].mxu1 }
 0x427   :  { %v7806_v2 = vpop.eup %7805  ;;  %v3255_v24 = vadd.f32 1.0, %v7804_v21  ;;  %7825 = vpow2.f32 %v6180_v31  ;;  %v11189_v19 = vadd.f32 %v2304_v23, %v10993_v54  ;;  %v2306_v62 = vpop.f32.mrb[231].mxu1  ;;  %v6187_v44 = vmul.f32 -1.442695, %v11182_v58 }
 0x428   :  { %v7808_v7 = vpop.eup %7807  ;;  %7827 = vrcp.f32 %v3248_v40  ;;  %v3256_v42 = vadd.f32 1.0, %v7806_v2  ;;  %5721 = vmatmul.mubr.bf16.gmra.mrb[16].mxu0 %v4199_v29  ;;  %v11193_v8 = vadd.f32 %v2306_v62, %v10997_v36  ;;  %v6188_v61 = vmul.f32 -1.442695, %v11185_v0 }
 0x429   :  { %v7810_v26 = vpop.eup %7809  ;;  %7829 = vrcp.f32 %v3255_v24  ;;  %v3263_v35 = vadd.f32 1.0, %v7808_v7  ;;  %v4207_v16 = vpack.c.bf16 %v3999_v51, %v3991_v49  ;;  %v6195_v3 = vmul.f32 -1.442695, %v11189_v19 }
 0x42a   :  { %v7812_v25 = vpop.eup %7811  ;;  %v4000_v27 = vmul.f32 %v7810_v26, %v11117_v46  ;;  %7831 = vrcp.f32 %v3256_v42  ;;  %v6196_v43 = vmul.f32 -1.442695, %v11193_v8 }
 0x42b   :  { %v7814_v30 = vpop.eup %7813  ;;  %7833 = vrcp.f32 %v3263_v35  ;;  %v4007_v60 = vmul.f32 %v7812_v25, %v11120_v37 }
 0x42c   :  { %v7816_v1 = vpop.eup %7815  ;;  %7835 = vpow2.f32 %v6187_v44  ;;  %v4208_v13 = vpack.c.bf16 %v4000_v27, %v3992_v4  ;;  %v2310_v59 = vpop.f32.mrb[232].mxu1  ;;  %v4008_v55 = vmul.f32 %v7814_v30, %v11124_v39 }
 0x42d   :  { %v7818_v47 = vpop.eup %7817  ;;  %v4015_v38 = vmul.f32 %v7816_v1, %v11128_v45  ;;  %7837 = vpow2.f32 %v6188_v61  ;;  %v11202_v15 = vadd.f32 %v2310_v59, %v10993_v54  ;;  %v2312_v5 = vpop.f32.mrb[233].mxu1 }
 0x42e   :  { %v7820_v46 = vpop.eup %7819  ;;  %v3264_v14 = vadd.f32 1.0, %v7818_v47  ;;  %7839 = vpow2.f32 %v6195_v3  ;;  %5730 = vmatprep.mubr.bf16.mxu0 %v4208_v13  ;;  %v11205_v9 = vadd.f32 %v2312_v5, %v10997_v36  ;;  %v2314_v41 = vpop.f32.mrb[234].mxu1 }
 0x42f   :  { %v7822_v52 = vpop.eup %7821  ;;  %v3271_v53 = vadd.f32 1.0, %v7820_v46  ;;  %7841 = vpow2.f32 %v6196_v43  ;;  %v11209_v45 = vadd.f32 %v2314_v41, %v10993_v54  ;;  %v2316_v48 = vpop.f32.mrb[235].mxu1  ;;  %v6203_v22 = vmul.f32 -1.442695, %v11202_v15 }
 0x430   :  { %v7824_v33 = vpop.eup %7823  ;;  %7843 = vrcp.f32 %v3264_v14  ;;  %v3272_v32 = vadd.f32 1.0, %v7822_v52  ;;  %5731 = vmatmul.mubr.bf16.gmra.mrb[20].mxu0 %v4207_v16  ;;  %v11212_v50 = vadd.f32 %v2316_v48, %v10997_v36  ;;  %v4215_v11 = vpack.c.bf16 %v4015_v38, %v4007_v60 }
 0x431   :  { %v7826_v31 = vpop.eup %7825  ;;  %7845 = vrcp.f32 %v3271_v53  ;;  %v3279_v29 = vadd.f32 1.0, %v7824_v33  ;;  %v6204_v56 = vmul.f32 -1.442695, %v11205_v9  ;;  %v6211_v40 = vmul.f32 -1.442695, %v11209_v45 }
 0x432   :  { %v7828_v37 = vpop.eup %7827  ;;  %7847 = vrcp.f32 %v3272_v32  ;;  %v3280_v17 = vadd.f32 1.0, %v7826_v31  ;;  %v6212_v2 = vmul.f32 -1.442695, %v11212_v50 }
 0x433   :  { %v7830_v51 = vpop.eup %7829  ;;  %v4016_v21 = vmul.f32 %v7828_v37, %v11137_v57  ;;  %7849 = vrcp.f32 %v3279_v29 }
 0x434   :  { %v7832_v23 = vpop.eup %7831  ;;  %7851 = vrcp.f32 %v3280_v17  ;;  %v2320_v49 = vpop.f32.mrb[236].mxu1  ;;  %v4023_v61 = vmul.f32 %v7830_v51, %v11140_v12 }
 0x435   :  { %v7834_v24 = vpop.eup %7833  ;;  %7853 = vpow2.f32 %v6203_v22  ;;  %v4216_v62 = vpack.c.bf16 %v4016_v21, %v4008_v55  ;;  %v11221_v7 = vadd.f32 %v2320_v49, %v10993_v54  ;;  %v2322_v42 = vpop.f32.mrb[237].mxu1  ;;  %v4024_v5 = vmul.f32 %v7832_v23, %v11143_v28 }
 0x436   :  { %v7836_v44 = vpop.eup %7835  ;;  %v4031_v39 = vmul.f32 %v7834_v24, %v11147_v18  ;;  %7855 = vpow2.f32 %v6204_v56  ;;  %v11225_v57 = vadd.f32 %v2322_v42, %v10997_v36  ;;  %v2324_v26 = vpop.f32.mrb[238].mxu1 }
 0x437   :  { %v7838_v35 = vpop.eup %7837  ;;  %v3287_v16 = vadd.f32 1.0, %v7836_v44  ;;  %7857 = vpow2.f32 %v6211_v40  ;;  %5740 = vmatprep.mubr.bf16.mxu0 %v4216_v62  ;;  %v11229_v25 = vadd.f32 %v2324_v26, %v10993_v54  ;;  %v2326_v4 = vpop.f32.mrb[239].mxu1  ;;  %v6219_v1 = vmul.f32 -1.442695, %v11221_v7 }
 0x438   :  { %v7840_v27 = vpop.eup %7839  ;;  %v3288_v3 = vadd.f32 1.0, %v7838_v35  ;;  %7859 = vpow2.f32 %v6212_v2  ;;  %5741 = vmatmul.mubr.bf16.gmra.mrb[24].mxu0 %v4215_v11  ;;  %v11232_v18 = vadd.f32 %v2326_v4, %v10997_v36  ;;  %v4223_v12 = vpack.c.bf16 %v4031_v39, %v4023_v61 }
 0x439   :  { %v7842_v30 = vpop.eup %7841  ;;  %7861 = vrcp.f32 %v3287_v16  ;;  %v3295_v43 = vadd.f32 1.0, %v7840_v27  ;;  %v6220_v47 = vmul.f32 -1.442695, %v11225_v57  ;;  %v6227_v14 = vmul.f32 -1.442695, %v11229_v25 }
 0x43a   :  { %v7844_v13 = vpop.eup %7843  ;;  %7863 = vrcp.f32 %v3288_v3  ;;  %v3296_v59 = vadd.f32 1.0, %v7842_v30  ;;  %v6228_v52 = vmul.f32 -1.442695, %v11232_v18 }
 0x43b   :  { %v7846_v38 = vpop.eup %7845  ;;  %v4032_v46 = vmul.f32 %v7844_v13, %v11157_v34  ;;  %7865 = vrcp.f32 %v3295_v43 }
 0x43c   :  { %v7848_v41 = vpop.eup %7847  ;;  %7867 = vrcp.f32 %v3296_v59  ;;  %v2330_v60 = vpop.f32.mrb[240].mxu1 }
 0x43d   :  { %v7850_v53 = vpop.eup %7849  ;;  %7869 = vpow2.f32 %v6219_v1  ;;  %v4224_v48 = vpack.c.bf16 %v4032_v46, %v4024_v5  ;;  %v11241_v33 = vadd.f32 %v2330_v60, %v10993_v54  ;;  %v2332_v32 = vpop.f32.mrb[241].mxu1  ;;  %v4040_v28 = vmul.f32 %v7848_v41, %v11163_v10 }
 0x43e   :  { %v7852_v31 = vpop.eup %7851  ;;  %v4047_v34 = vmul.f32 %v7850_v53, %v11167_v63  ;;  %7871 = vpow2.f32 %v6220_v47  ;;  %v11246_v29 = vadd.f32 %v2332_v32, %v10997_v36  ;;  %v2334_v22 = vpop.f32.mrb[242].mxu1  ;;  %v4039_v10 = vmul.f32 %v7846_v38, %v11160_v20 }
 0x43f   :  { %v7854_v11 = vpop.eup %7853  ;;  %v4048_v37 = vmul.f32 %v7852_v31, %v11171_v6  ;;  %7873 = vpow2.f32 %v6227_v14  ;;  %5750 = vmatprep.mubr.bf16.mxu0 %v4224_v48  ;;  %v6235_v17 = vmul.f32 -1.442695, %v11241_v33  ;;  %v11251_v56 = vadd.f32 %v2334_v22, %v10993_v54  ;;  %v2336_v51 = vpop.f32.mrb[243].mxu1 }
 0x440   :  { %v7856_v55 = vpop.eup %7855  ;;  %v3303_v63 = vadd.f32 1.0, %v7854_v11  ;;  %7875 = vpow2.f32 %v6228_v52  ;;  %5751 = vmatmul.mubr.bf16.gmra.mrb[28].mxu0 %v4223_v12  ;;  %v11255_v21 = vadd.f32 %v2336_v51, %v10997_v36  ;;  %v6236_v24 = vmul.f32 -1.442695, %v11246_v29 }
 0x441   :  { %v7858_v40 = vpop.eup %7857  ;;  %v3304_v23 = vadd.f32 1.0, %v7856_v55  ;;  %7877 = vpow2.f32 %v6235_v17  ;;  %v4232_v6 = vpack.c.bf16 %v4048_v37, %v4040_v28  ;;  %v4231_v62 = vpack.c.bf16 %v4047_v34, %v4039_v10 }
 0x442   :  { %v7860_v2 = vpop.eup %7859  ;;  %7879 = vrcp.f32 %v3303_v63  ;;  %v3311_v49 = vadd.f32 1.0, %v7858_v40  ;;  %v6243_v20 = vmul.f32 -1.442695, %v11251_v56  ;;  %v6244_v26 = vmul.f32 -1.442695, %v11255_v21 }
 0x443   :  { %v7862_v42 = vpop.eup %7861  ;;  %7881 = vrcp.f32 %v3304_v23  ;;  %v3312_v44 = vadd.f32 1.0, %v7860_v2  ;;  %5760 = vmatprep.mubr.bf16.mxu0 %v4232_v6 }
 0x444   :  { %v7864_v39 = vpop.eup %7863  ;;  %7883 = vrcp.f32 %v3311_v49  ;;  %v2340_v35 = vpop.f32.mrb[244].mxu1  ;;  %v4055_v5 = vmul.f32 %v7862_v42, %v11182_v58 }
 0x445   :  { %v7866_v61 = vpop.eup %7865  ;;  %7885 = vrcp.f32 %v3312_v44  ;;  %v11261_v16 = vadd.f32 %v2340_v35, %v10993_v54  ;;  %v2342_v4 = vpop.f32.mrb[245].mxu1  ;;  %v4056_v3 = vmul.f32 %v7864_v39, %v11185_v0 }
 0x446   :  { %v7868_v27 = vpop.eup %7867  ;;  %v4063_v30 = vmul.f32 %v7866_v61, %v11189_v19  ;;  %7887 = vpow2.f32 %v6236_v24  ;;  %v2344_v43 = vpop.f32.mrb[246].mxu1  ;;  %v11268_v59 = vadd.f32 %v2342_v4, %v10997_v36 }
 0x447   :  { %v7870_v1 = vpop.eup %7869  ;;  %v4064_v12 = vmul.f32 %v7868_v27, %v11193_v8  ;;  %7889 = vpow2.f32 %v6243_v20  ;;  %v6251_v13 = vmul.f32 -1.442695, %v11261_v16  ;;  %v2346_v47 = vpop.f32.mrb[247].mxu1  ;;  %v11272_v0 = vadd.f32 %v2344_v43, %v10993_v54 }
 0x448   :  { %v7872_v38 = vpop.eup %7871  ;;  %v3319_v46 = vadd.f32 1.0, %v7870_v1  ;;  %7891 = vpow2.f32 %v6244_v26  ;;  %5761 = vmatmul.mubr.bf16.gmra.mrb[32].mxu0 %v4231_v62  ;;  %v11275_v8 = vadd.f32 %v2346_v47, %v10997_v36  ;;  %v4239_v53 = vpack.c.bf16 %v4063_v30, %v4055_v5 }
 0x449   :  { %v7874_v19 = vpop.eup %7873  ;;  %v3320_v14 = vadd.f32 1.0, %v7872_v38  ;;  %7893 = vpow2.f32 %v6251_v13  ;;  %v4240_v41 = vpack.c.bf16 %v4064_v12, %v4056_v3  ;;  %v6252_v32 = vmul.f32 -1.442695, %v11268_v59 }
 0x44a   :  { %v7876_v52 = vpop.eup %7875  ;;  %7895 = vrcp.f32 %v3319_v46  ;;  %v3327_v60 = vadd.f32 1.0, %v7874_v19  ;;  %v6259_v34 = vmul.f32 -1.442695, %v11272_v0  ;;  %v6260_v37 = vmul.f32 -1.442695, %v11275_v8 }
 0x44b   :  { %v7878_v48 = vpop.eup %7877  ;;  %7897 = vrcp.f32 %v3320_v14  ;;  %v3328_v58 = vadd.f32 1.0, %v7876_v52  ;;  %5770 = vmatprep.mubr.bf16.mxu0 %v4240_v41 }
 0x44c   :  { %v7880_v31 = vpop.eup %7879  ;;  %7899 = vrcp.f32 %v3327_v60  ;;  %v3335_v28 = vadd.f32 1.0, %v7878_v48  ;;  %v2350_v22 = vpop.f32.mrb[248].mxu1 }
 0x44d   :  { %v7882_v11 = vpop.eup %7881  ;;  %7901 = vrcp.f32 %v3328_v58  ;;  %v11281_v17 = vadd.f32 %v2350_v22, %v10993_v54  ;;  %v2352_v51 = vpop.f32.mrb[249].mxu1  ;;  %v4071_v10 = vmul.f32 %v7880_v31, %v11202_v15 }
 0x44e   :  { %v7884_v55 = vpop.eup %7883  ;;  %7903 = vrcp.f32 %v3335_v28  ;;  %v2354_v63 = vpop.f32.mrb[250].mxu1  ;;  %v11287_v2 = vadd.f32 %v2352_v51, %v10997_v36  ;;  %v4072_v62 = vmul.f32 %v7882_v11, %v11205_v9 }
 0x44f   :  { %v7886_v40 = vpop.eup %7885  ;;  %v4079_v23 = vmul.f32 %v7884_v55, %v11209_v45  ;;  %7905 = vpow2.f32 %v6252_v32  ;;  %v6267_v6 = vmul.f32 -1.442695, %v11281_v17  ;;  %v2356_v49 = vpop.f32.mrb[251].mxu1  ;;  %v11292_v15 = vadd.f32 %v2354_v63, %v10993_v54 }
 0x450   :  { %v7888_v24 = vpop.eup %7887  ;;  %v4080_v42 = vmul.f32 %v7886_v40, %v11212_v50  ;;  %7907 = vpow2.f32 %v6259_v34  ;;  %5771 = vmatmul.mubr.bf16.gmra.mrb[36].mxu0 %v4239_v53  ;;  %v11295_v45 = vadd.f32 %v2356_v49, %v10997_v36  ;;  %v6268_v50 = vmul.f32 -1.442695, %v11287_v2 }
 0x451   :  { %v7890_v44 = vpop.eup %7889  ;;  %v3336_v20 = vadd.f32 1.0, %v7888_v24  ;;  %7909 = vpow2.f32 %v6260_v37  ;;  %v4247_v39 = vpack.c.bf16 %v4079_v23, %v4071_v10  ;;  %v6275_v30 = vmul.f32 -1.442695, %v11292_v15 }
 0x452   :  { %v7892_v26 = vpop.eup %7891  ;;  %v3343_v35 = vadd.f32 1.0, %v7890_v44  ;;  %7911 = vpow2.f32 %v6267_v6  ;;  %v4248_v61 = vpack.c.bf16 %v4080_v42, %v4072_v62  ;;  %v6276_v12 = vmul.f32 -1.442695, %v11295_v45 }
 0x453   :  { %v7894_v4 = vpop.eup %7893  ;;  %7913 = vrcp.f32 %v3336_v20  ;;  %v3344_v9 = vadd.f32 1.0, %v7892_v26 }
 0x454   :  { %v7896_v27 = vpop.eup %7895  ;;  %7915 = vrcp.f32 %v3343_v35  ;;  %v3351_v3 = vadd.f32 1.0, %v7894_v4  ;;  %5780 = vmatprep.mubr.bf16.mxu0 %v4248_v61  ;;  %v2360_v43 = vpop.f32.mrb[252].mxu1 }
 0x455   :  { %v7898_v1 = vpop.eup %7897  ;;  %7917 = vrcp.f32 %v3344_v9  ;;  %v11301_v13 = vadd.f32 %v2360_v43, %v10993_v54  ;;  %v2362_v47 = vpop.f32.mrb[253].mxu1  ;;  %v4087_v5 = vmul.f32 %v7896_v27, %v11221_v7 }
 0x456   :  { %v7900_v38 = vpop.eup %7899  ;;  %7919 = vrcp.f32 %v3351_v3  ;;  %v11305_v46 = vadd.f32 %v2362_v47, %v10997_v36  ;;  %v2364_v19 = vpop.f32.mrb[254].mxu1  ;;  %v4088_v41 = vmul.f32 %v7898_v1, %v11225_v57 }
 0x457   :  { %v7902_v14 = vpop.eup %7901  ;;  %v4095_v52 = vmul.f32 %v7900_v38, %v11229_v25  ;;  %7921 = vpow2.f32 %v6268_v50  ;;  %v6283_v60 = vmul.f32 -1.442695, %v11301_v13  ;;  %v2366_v53 = vpop.f32.mrb[255].mxu1  ;;  %v11313_v32 = vadd.f32 %v2364_v19, %v10993_v54 }
 0x458   :  { %v7904_v48 = vpop.eup %7903  ;;  %v4096_v58 = vmul.f32 %v7902_v14, %v11232_v18  ;;  %7923 = vpow2.f32 %v6275_v30  ;;  %5781 = vmatmul.mubr.bf16.gmra.mrb[40].mxu0 %v4247_v39  ;;  %v6284_v7 = vmul.f32 -1.442695, %v11305_v46  ;;  %v11316_v57 = vadd.f32 %v2366_v53, %v10997_v36 }
 0x459   :  { %v7906_v31 = vpop.eup %7905  ;;  %7925 = vpow2.f32 %v6276_v12  ;;  %v4255_v25 = vpack.c.bf16 %v4095_v52, %v4087_v5  ;;  %v6291_v55 = vmul.f32 -1.442695, %v11313_v32  ;;  %v4103_v40 = vmul.f32 %v7904_v48, %v11241_v33 }
 0x45a   :  { %v7908_v28 = vpop.eup %7907  ;;  %v3352_v34 = vadd.f32 1.0, %v7906_v31  ;;  %7927 = vpow2.f32 %v6283_v60  ;;  %v4256_v22 = vpack.c.bf16 %v4096_v58, %v4088_v41  ;;  %v6292_v10 = vmul.f32 -1.442695, %v11316_v57 }
 0x45b   :  { %v7910_v11 = vpop.eup %7909  ;;  %v3359_v37 = vadd.f32 1.0, %v7908_v28  ;;  %7929 = vpow2.f32 %v6284_v7 }
 0x45c   :  { %v7912_v18 = vpop.eup %7911  ;;  %7931 = vrcp.f32 %v3352_v34  ;;  %v3360_v51 = vadd.f32 1.0, %v7910_v11  ;;  %5790 = vmatprep.mubr.bf16.mxu0 %v4256_v22 }
 0x45d   :  { %v7914_v54 = vpop.eup %7913  ;;  %7933 = vrcp.f32 %v3359_v37  ;;  %v3367_v6 = vadd.f32 1.0, %v7912_v18  ;;  %v11807_v37 = vld [vmem:[#allocation37_spill] sm:$0xff] }
 0x45e   :  { %v7916_v36 = vpop.eup %7915  ;;  %7935 = vrcp.f32 %v3360_v51  ;;  %v4104_v24 = vmul.f32 %v7914_v54, %v11246_v29  ;;  %v11808_v51 = vld [vmem:[#allocation34_spill] sm:$0xff] }
 0x45f   :  { %v7918_v63 = vpop.eup %7917  ;;  %v4111_v23 = vmul.f32 %v7916_v36, %v11251_v56  ;;  %7937 = vpow2.f32 %v6291_v55 }
 0x460   :  { %v7920_v49 = vpop.eup %7919  ;;  %v4112_v62 = vmul.f32 %v7918_v63, %v11255_v21  ;;  %5791 = vmatmul.mubr.bf16.gmra.mrb[44].mxu0 %v4255_v25  ;;  %7939 = vpow2.f32 %v6292_v10 }
 0x461   :  { %v7922_v42 = vpop.eup %7921  ;;  %v4263_v44 = vpack.c.bf16 %v4111_v23, %v4103_v40  ;;  %7941 = vrcp.f32 %v3367_v6  ;;  %v4119_v27 = vmul.f32 %v7920_v49, %v11261_v16 }
 0x462   :  { %v7924_v20 = vpop.eup %7923  ;;  %v3368_v39 = vadd.f32 1.0, %v7922_v42  ;;  %v4264_v26 = vpack.c.bf16 %v4112_v62, %v4104_v24 }
 0x463   :  { %v7926_v35 = vpop.eup %7925  ;;  %v3375_v61 = vadd.f32 1.0, %v7924_v20 }
 0x464   :  { %v7928_v33 = vpop.eup %7927  ;;  %7943 = vrcp.f32 %v3368_v39  ;;  %v3376_v56 = vadd.f32 1.0, %v7926_v35  ;;  %5800 = vmatprep.mubr.bf16.mxu0 %v4264_v26 }
 0x465   :  { %v7930_v4 = vpop.eup %7929  ;;  %7945 = vrcp.f32 %v3375_v61  ;;  %v3383_v9 = vadd.f32 1.0, %v7928_v33 }
 0x466   :  { %v7932_v29 = vpop.eup %7931  ;;  %7947 = vrcp.f32 %v3376_v56  ;;  %v3384_v30 = vadd.f32 1.0, %v7930_v4 }
 0x467   :  { %v7934_v21 = vpop.eup %7933  ;;  %v4120_v43 = vmul.f32 %v7932_v29, %v11268_v59  ;;  %7949 = vrcp.f32 %v3383_v9 }
 0x468   :  { %v7936_v50 = vpop.eup %7935  ;;  %v4127_v3 = vmul.f32 %v7934_v21, %v11272_v0  ;;  %5801 = vmatmul.mubr.bf16.gmra.mrb[48].mxu0 %v4263_v44  ;;  %7951 = vrcp.f32 %v3384_v30 }
 0x469   :  { %v4128_v1 = vmul.f32 %v7936_v50, %v11275_v8  ;;  %v7938_v12 = vpop.eup %7937 }
 0x46a   :  { %v4271_v47 = vpack.c.bf16 %v4127_v3, %v4119_v27  ;;  %v7940_v38 = vpop.eup %7939  ;;  %v3391_v5 = vadd.f32 1.0, %v7938_v12 }
 0x46b   :  { %v4272_v19 = vpack.c.bf16 %v4128_v1, %v4120_v43  ;;  %v3392_v14 = vadd.f32 1.0, %v7940_v38  ;;  %v7942_v41 = vpop.eup %7941 }
 0x46c   :  { %7953 = vrcp.f32 %v3391_v5  ;;  %v4135_v60 = vmul.f32 %v7942_v41, %v11281_v17 }
 0x46d   :  { %5810 = vmatprep.mubr.bf16.mxu0 %v4272_v19  ;;  %7955 = vrcp.f32 %v3392_v14 }
 0x46e   :  { %v7944_v16 = vpop.eup %7943 }
 0x46f   :  { %v7946_v0 = vpop.eup %7945  ;;  %v4136_v8 = vmul.f32 %v7944_v16, %v11287_v2 }
 0x470   :  { %v7948_v52 = vpop.eup %7947  ;;  %v4143_v59 = vmul.f32 %v7946_v0, %v11292_v15  ;;  %5811 = vmatmul.mubr.bf16.gmra.mrb[52].mxu0 %v4271_v47 }
 0x471   :  { %v4144_v53 = vmul.f32 %v7948_v52, %v11295_v45  ;;  %v7950_v7 = vpop.eup %7949  ;;  %v4417_v45 = vld [vmem:[%s11607_s6] sm:$0x3] }
 0x472   :  { %v4279_v48 = vpack.c.bf16 %v4143_v59, %v4135_v60  ;;  %v7952_v31 = vpop.eup %7951  ;;  %v4151_v34 = vmul.f32 %v7950_v7, %v11301_v13  ;;  %v11340_v18 = vrot.slane %v4417_v45, %v11807_v37  ;;  %v11343_v13 = vrot.slane %v4417_v45, %v11808_v51 }
 0x473   :  { %v4280_v58 = vpack.c.bf16 %v4144_v53, %v4136_v8  ;;  %v4152_v17 = vmul.f32 %v7952_v31, %v11305_v46 }
 0x475   :  { %5820 = vmatprep.mubr.bf16.mxu0 %v4280_v58 }
 0x476   :  { %v7954_v25 = vpop.eup %7953 }
 0x477   :  { %v7956_v28 = vpop.eup %7955  ;;  %v4159_v22 = vmul.f32 %v7954_v25, %v11313_v32 }
 0x478   :  { %5821 = vmatmul.mubr.bf16.gmra.mrb[56].mxu0 %v4279_v48  ;;  %v4160_v15 = vmul.f32 %v7956_v28, %v11316_v57 }
 0x479   :  { %v4287_v11 = vpack.c.bf16 %v4159_v22, %v4151_v34 }
 0x47a   :  { %v4288_v2 = vpack.c.bf16 %v4160_v15, %v4152_v17 }
 0x47c   :  { %5830 = vmatprep.mubr.bf16.mxu0 %v4288_v2 }
 0x480   :  { %5831 = vmatmul.mubr.bf16.gmra.mrb[60].mxu0 %v4287_v11 }
 0x4db   :  { %v5682_v32 = vpop.f32.mrb[0].mxu0 }
 0x4dc   :  { %v6421_v55 = vadd.f32 %v5682_v32, %v11340_v18  ;;  %v5684_v46 = vpop.f32.mrb[1].mxu0 }
 0x4dd   :  { %v6422_v57 = vadd.f32 %v5684_v46, %v11343_v13  ;;  %v5686_v54 = vpop.f32.mrb[2].mxu0 }
 0x4de   :  { %5841 = vst [vmem:[%s11608_s7] sm:$0xff] %v6421_v55  ;;  %v6423_v10 = vadd.f32 %v5686_v54, %v11340_v18  ;;  %v5688_v36 = vpop.f32.mrb[3].mxu0 }
 0x4df   :  { %5842 = vst [vmem:[%s11608_s7 + $0x8] sm:$0xff] %v6422_v57  ;;  %v6424_v63 = vadd.f32 %v5688_v36, %v11343_v13 }
 0x4e0   :  { %5843 = vst [vmem:[%s11608_s7 + $0x10] sm:$0xff] %v6423_v10 }
 0x4e1   :  { %5844 = vst [vmem:[%s11608_s7 + $0x18] sm:$0xff] %v6424_v63 }
 0x4e3   :  { %v5692_v40 = vpop.f32.mrb[4].mxu0 }
 0x4e4   :  { %v6425_v23 = vadd.f32 %v5692_v40, %v11340_v18  ;;  %v5694_v6 = vpop.f32.mrb[5].mxu0 }
 0x4e5   :  { %v6426_v49 = vadd.f32 %v5694_v6, %v11343_v13  ;;  %v5696_v24 = vpop.f32.mrb[6].mxu0 }
 0x4e6   :  { %5845 = vst [vmem:[%s11608_s7 + $0x20] sm:$0xff] %v6425_v23  ;;  %v6427_v62 = vadd.f32 %v5696_v24, %v11340_v18  ;;  %v5698_v42 = vpop.f32.mrb[7].mxu0 }
 0x4e7   :  { %5846 = vst [vmem:[%s11608_s7 + $0x28] sm:$0xff] %v6426_v49  ;;  %v6428_v44 = vadd.f32 %v5698_v42, %v11343_v13 }
 0x4e8   :  { %5847 = vst [vmem:[%s11608_s7 + $0x30] sm:$0xff] %v6427_v62 }
 0x4e9   :  { %5848 = vst [vmem:[%s11608_s7 + $0x38] sm:$0xff] %v6428_v44 }
 0x4eb   :  { %v5702_v20 = vpop.f32.mrb[8].mxu0 }
 0x4ec   :  { %v6429_v39 = vadd.f32 %v5702_v20, %v11340_v18  ;;  %v5704_v26 = vpop.f32.mrb[9].mxu0 }
 0x4ed   :  { %v6430_v35 = vadd.f32 %v5704_v26, %v11343_v13  ;;  %v5706_v61 = vpop.f32.mrb[10].mxu0 }
 0x4ee   :  { %5849 = vst [vmem:[%s11608_s7 + $0x40] sm:$0xff] %v6429_v39  ;;  %v6431_v33 = vadd.f32 %v5706_v61, %v11340_v18  ;;  %v5708_v56 = vpop.f32.mrb[11].mxu0 }
 0x4ef   :  { %5850 = vst [vmem:[%s11608_s7 + $0x48] sm:$0xff] %v6430_v35  ;;  %v6432_v4 = vadd.f32 %v5708_v56, %v11343_v13 }
 0x4f0   :  { %5851 = vst [vmem:[%s11608_s7 + $0x50] sm:$0xff] %v6431_v33 }
 0x4f1   :  { %5852 = vst [vmem:[%s11608_s7 + $0x58] sm:$0xff] %v6432_v4 }
 0x4f3   :  { %v5712_v29 = vpop.f32.mrb[12].mxu0 }
 0x4f4   :  { %v6433_v21 = vadd.f32 %v5712_v29, %v11340_v18  ;;  %v5714_v9 = vpop.f32.mrb[13].mxu0 }
 0x4f5   :  { %v6434_v50 = vadd.f32 %v5714_v9, %v11343_v13  ;;  %v5716_v27 = vpop.f32.mrb[14].mxu0 }
 0x4f6   :  { %5853 = vst [vmem:[%s11608_s7 + $0x60] sm:$0xff] %v6433_v21  ;;  %v6435_v3 = vadd.f32 %v5716_v27, %v11340_v18  ;;  %v5718_v30 = vpop.f32.mrb[15].mxu0 }
 0x4f7   :  { %5854 = vst [vmem:[%s11608_s7 + $0x68] sm:$0xff] %v6434_v50  ;;  %v6436_v43 = vadd.f32 %v5718_v30, %v11343_v13 }
 0x4f8   :  { %5855 = vst [vmem:[%s11608_s7 + $0x70] sm:$0xff] %v6435_v3 }
 0x4f9   :  { %5856 = vst [vmem:[%s11608_s7 + $0x78] sm:$0xff] %v6436_v43 }
 0x4fb   :  { %v5722_v1 = vpop.f32.mrb[16].mxu0 }
 0x4fc   :  { %v6437_v12 = vadd.f32 %v5722_v1, %v11340_v18  ;;  %v5724_v47 = vpop.f32.mrb[17].mxu0 }
 0x4fd   :  { %v6438_v38 = vadd.f32 %v5724_v47, %v11343_v13  ;;  %v5726_v5 = vpop.f32.mrb[18].mxu0 }
 0x4fe   :  { %5857 = vst [vmem:[%s11608_s7 + $0x80] sm:$0xff] %v6437_v12  ;;  %v6439_v19 = vadd.f32 %v5726_v5, %v11340_v18  ;;  %v5728_v14 = vpop.f32.mrb[19].mxu0 }
 0x4ff   :  { %5858 = vst [vmem:[%s11608_s7 + $0x88] sm:$0xff] %v6438_v38  ;;  %v6440_v41 = vadd.f32 %v5728_v14, %v11343_v13 }
 0x500   :  { %5859 = vst [vmem:[%s11608_s7 + $0x90] sm:$0xff] %v6439_v19 }
 0x501   :  { %5860 = vst [vmem:[%s11608_s7 + $0x98] sm:$0xff] %v6440_v41 }
 0x503   :  { %v5732_v16 = vpop.f32.mrb[20].mxu0 }
 0x504   :  { %v6441_v0 = vadd.f32 %v5732_v16, %v11340_v18  ;;  %v5734_v52 = vpop.f32.mrb[21].mxu0 }
 0x505   :  { %v6442_v60 = vadd.f32 %v5734_v52, %v11343_v13  ;;  %v5736_v59 = vpop.f32.mrb[22].mxu0 }
 0x506   :  { %5861 = vst [vmem:[%s11608_s7 + $0xa0] sm:$0xff] %v6441_v0  ;;  %v6443_v8 = vadd.f32 %v5736_v59, %v11340_v18  ;;  %v5738_v53 = vpop.f32.mrb[23].mxu0 }
 0x507   :  { %5862 = vst [vmem:[%s11608_s7 + $0xa8] sm:$0xff] %v6442_v60  ;;  %v6444_v48 = vadd.f32 %v5738_v53, %v11343_v13 }
 0x508   :  { %5863 = vst [vmem:[%s11608_s7 + $0xb0] sm:$0xff] %v6443_v8 }
 0x509   :  { %5864 = vst [vmem:[%s11608_s7 + $0xb8] sm:$0xff] %v6444_v48 }
 0x50b   :  { %v5742_v58 = vpop.f32.mrb[24].mxu0 }
 0x50c   :  { %v6445_v7 = vadd.f32 %v5742_v58, %v11340_v18  ;;  %v5744_v31 = vpop.f32.mrb[25].mxu0 }
 0x50d   :  { %v6446_v25 = vadd.f32 %v5744_v31, %v11343_v13  ;;  %v5746_v28 = vpop.f32.mrb[26].mxu0 }
 0x50e   :  { %5865 = vst [vmem:[%s11608_s7 + $0xc0] sm:$0xff] %v6445_v7  ;;  %v6447_v34 = vadd.f32 %v5746_v28, %v11340_v18  ;;  %v5748_v22 = vpop.f32.mrb[27].mxu0 }
 0x50f   :  { %5866 = vst [vmem:[%s11608_s7 + $0xc8] sm:$0xff] %v6446_v25  ;;  %v6448_v17 = vadd.f32 %v5748_v22, %v11343_v13 }
 0x510   :  { %5867 = vst [vmem:[%s11608_s7 + $0xd0] sm:$0xff] %v6447_v34 }
 0x511   :  { %5868 = vst [vmem:[%s11608_s7 + $0xd8] sm:$0xff] %v6448_v17 }
 0x513   :  { %v5752_v15 = vpop.f32.mrb[28].mxu0 }
 0x514   :  { %v6449_v11 = vadd.f32 %v5752_v15, %v11340_v18  ;;  %v5754_v2 = vpop.f32.mrb[29].mxu0 }
 0x515   :  { %v6450_v45 = vadd.f32 %v5754_v2, %v11343_v13  ;;  %v5756_v37 = vpop.f32.mrb[30].mxu0 }
 0x516   :  { %5869 = vst [vmem:[%s11608_s7 + $0xe0] sm:$0xff] %v6449_v11  ;;  %v6451_v51 = vadd.f32 %v5756_v37, %v11340_v18  ;;  %v5758_v32 = vpop.f32.mrb[31].mxu0 }
 0x517   :  { %5870 = vst [vmem:[%s11608_s7 + $0xe8] sm:$0xff] %v6450_v45  ;;  %v6452_v55 = vadd.f32 %v5758_v32, %v11343_v13 }
 0x518   :  { %5871 = vst [vmem:[%s11608_s7 + $0xf0] sm:$0xff] %v6451_v51 }
 0x519   :  { %5872 = vst [vmem:[%s11608_s7 + $0xf8] sm:$0xff] %v6452_v55 }
 0x51b   :  { %v5762_v46 = vpop.f32.mrb[32].mxu0 }
 0x51c   :  { %v6453_v57 = vadd.f32 %v5762_v46, %v11340_v18  ;;  %v5764_v54 = vpop.f32.mrb[33].mxu0 }
 0x51d   :  { %v6454_v10 = vadd.f32 %v5764_v54, %v11343_v13  ;;  %v5766_v36 = vpop.f32.mrb[34].mxu0 }
 0x51e   :  { %5873 = vst [vmem:[%s11608_s7 + $0x100] sm:$0xff] %v6453_v57  ;;  %v6455_v63 = vadd.f32 %v5766_v36, %v11340_v18  ;;  %v5768_v40 = vpop.f32.mrb[35].mxu0 }
 0x51f   :  { %5874 = vst [vmem:[%s11608_s7 + $0x108] sm:$0xff] %v6454_v10  ;;  %v6456_v23 = vadd.f32 %v5768_v40, %v11343_v13 }
 0x520   :  { %5875 = vst [vmem:[%s11608_s7 + $0x110] sm:$0xff] %v6455_v63 }
 0x521   :  { %5876 = vst [vmem:[%s11608_s7 + $0x118] sm:$0xff] %v6456_v23 }
 0x523   :  { %v5772_v6 = vpop.f32.mrb[36].mxu0 }
 0x524   :  { %v6457_v49 = vadd.f32 %v5772_v6, %v11340_v18  ;;  %v5774_v24 = vpop.f32.mrb[37].mxu0 }
 0x525   :  { %v6458_v62 = vadd.f32 %v5774_v24, %v11343_v13  ;;  %v5776_v42 = vpop.f32.mrb[38].mxu0 }
 0x526   :  { %5877 = vst [vmem:[%s11608_s7 + $0x120] sm:$0xff] %v6457_v49  ;;  %v6459_v44 = vadd.f32 %v5776_v42, %v11340_v18  ;;  %v5778_v20 = vpop.f32.mrb[39].mxu0 }
 0x527   :  { %5878 = vst [vmem:[%s11608_s7 + $0x128] sm:$0xff] %v6458_v62  ;;  %v6460_v39 = vadd.f32 %v5778_v20, %v11343_v13 }
 0x528   :  { %5879 = vst [vmem:[%s11608_s7 + $0x130] sm:$0xff] %v6459_v44 }
 0x529   :  { %5880 = vst [vmem:[%s11608_s7 + $0x138] sm:$0xff] %v6460_v39 }
 0x52b   :  { %v5782_v26 = vpop.f32.mrb[40].mxu0 }
 0x52c   :  { %v6461_v35 = vadd.f32 %v5782_v26, %v11340_v18  ;;  %v5784_v61 = vpop.f32.mrb[41].mxu0 }
 0x52d   :  { %v6462_v33 = vadd.f32 %v5784_v61, %v11343_v13  ;;  %v5786_v56 = vpop.f32.mrb[42].mxu0 }
 0x52e   :  { %5881 = vst [vmem:[%s11608_s7 + $0x140] sm:$0xff] %v6461_v35  ;;  %v6463_v4 = vadd.f32 %v5786_v56, %v11340_v18  ;;  %v5788_v29 = vpop.f32.mrb[43].mxu0 }
 0x52f   :  { %5882 = vst [vmem:[%s11608_s7 + $0x148] sm:$0xff] %v6462_v33  ;;  %v6464_v21 = vadd.f32 %v5788_v29, %v11343_v13 }
 0x530   :  { %5883 = vst [vmem:[%s11608_s7 + $0x150] sm:$0xff] %v6463_v4 }
 0x531   :  { %5884 = vst [vmem:[%s11608_s7 + $0x158] sm:$0xff] %v6464_v21 }
 0x533   :  { %v5792_v9 = vpop.f32.mrb[44].mxu0 }
 0x534   :  { %v6465_v50 = vadd.f32 %v5792_v9, %v11340_v18  ;;  %v5794_v27 = vpop.f32.mrb[45].mxu0 }
 0x535   :  { %v6466_v3 = vadd.f32 %v5794_v27, %v11343_v13  ;;  %v5796_v30 = vpop.f32.mrb[46].mxu0 }
 0x536   :  { %5885 = vst [vmem:[%s11608_s7 + $0x160] sm:$0xff] %v6465_v50  ;;  %v6467_v43 = vadd.f32 %v5796_v30, %v11340_v18  ;;  %v5798_v1 = vpop.f32.mrb[47].mxu0 }
 0x537   :  { %5886 = vst [vmem:[%s11608_s7 + $0x168] sm:$0xff] %v6466_v3  ;;  %v6468_v12 = vadd.f32 %v5798_v1, %v11343_v13 }
 0x538   :  { %5887 = vst [vmem:[%s11608_s7 + $0x170] sm:$0xff] %v6467_v43 }
 0x539   :  { %5888 = vst [vmem:[%s11608_s7 + $0x178] sm:$0xff] %v6468_v12 }
 0x53b   :  { %v5802_v47 = vpop.f32.mrb[48].mxu0 }
 0x53c   :  { %v6469_v38 = vadd.f32 %v5802_v47, %v11340_v18  ;;  %v5804_v5 = vpop.f32.mrb[49].mxu0 }
 0x53d   :  { %v6470_v19 = vadd.f32 %v5804_v5, %v11343_v13  ;;  %v5806_v14 = vpop.f32.mrb[50].mxu0 }
 0x53e   :  { %5889 = vst [vmem:[%s11608_s7 + $0x180] sm:$0xff] %v6469_v38  ;;  %v6471_v41 = vadd.f32 %v5806_v14, %v11340_v18  ;;  %v5808_v16 = vpop.f32.mrb[51].mxu0 }
 0x53f   :  { %5890 = vst [vmem:[%s11608_s7 + $0x188] sm:$0xff] %v6470_v19  ;;  %v6472_v0 = vadd.f32 %v5808_v16, %v11343_v13 }
 0x540   :  { %5891 = vst [vmem:[%s11608_s7 + $0x190] sm:$0xff] %v6471_v41 }
 0x541   :  { %5892 = vst [vmem:[%s11608_s7 + $0x198] sm:$0xff] %v6472_v0 }
 0x543   :  { %v5812_v52 = vpop.f32.mrb[52].mxu0 }
 0x544   :  { %v6473_v60 = vadd.f32 %v5812_v52, %v11340_v18  ;;  %v5814_v59 = vpop.f32.mrb[53].mxu0 }
 0x545   :  { %v6474_v8 = vadd.f32 %v5814_v59, %v11343_v13  ;;  %v5816_v53 = vpop.f32.mrb[54].mxu0 }
 0x546   :  { %5893 = vst [vmem:[%s11608_s7 + $0x1a0] sm:$0xff] %v6473_v60  ;;  %v6475_v48 = vadd.f32 %v5816_v53, %v11340_v18  ;;  %v5818_v58 = vpop.f32.mrb[55].mxu0 }
 0x547   :  { %5894 = vst [vmem:[%s11608_s7 + $0x1a8] sm:$0xff] %v6474_v8  ;;  %v6476_v7 = vadd.f32 %v5818_v58, %v11343_v13 }
 0x548   :  { %5895 = vst [vmem:[%s11608_s7 + $0x1b0] sm:$0xff] %v6475_v48 }
 0x549   :  { %5896 = vst [vmem:[%s11608_s7 + $0x1b8] sm:$0xff] %v6476_v7 }
 0x54b   :  { %v5822_v31 = vpop.f32.mrb[56].mxu0 }
 0x54c   :  { %v6477_v25 = vadd.f32 %v5822_v31, %v11340_v18  ;;  %v5824_v28 = vpop.f32.mrb[57].mxu0 }
 0x54d   :  { %v6478_v34 = vadd.f32 %v5824_v28, %v11343_v13  ;;  %v5826_v22 = vpop.f32.mrb[58].mxu0 }
 0x54e   :  { %5897 = vst [vmem:[%s11608_s7 + $0x1c0] sm:$0xff] %v6477_v25  ;;  %v6479_v17 = vadd.f32 %v5826_v22, %v11340_v18  ;;  %v5828_v15 = vpop.f32.mrb[59].mxu0 }
 0x54f   :  { %5898 = vst [vmem:[%s11608_s7 + $0x1c8] sm:$0xff] %v6478_v34  ;;  %v6480_v11 = vadd.f32 %v5828_v15, %v11343_v13 }
 0x550   :  { %5899 = vst [vmem:[%s11608_s7 + $0x1d0] sm:$0xff] %v6479_v17 }
 0x551   :  { %5900 = vst [vmem:[%s11608_s7 + $0x1d8] sm:$0xff] %v6480_v11 }
 0x553   :  { %v5832_v2 = vpop.f32.mrb[60].mxu0 }
 0x554   :  { %v6481_v45 = vadd.f32 %v5832_v2, %v11340_v18  ;;  %v5834_v37 = vpop.f32.mrb[61].mxu0 }
 0x555   :  { %v6482_v51 = vadd.f32 %v5834_v37, %v11343_v13  ;;  %v5836_v32 = vpop.f32.mrb[62].mxu0 }
 0x556   :  { %5901 = vst [vmem:[%s11608_s7 + $0x1e0] sm:$0xff] %v6481_v45  ;;  %v6483_v55 = vadd.f32 %v5836_v32, %v11340_v18  ;;  %v5838_v46 = vpop.f32.mrb[63].mxu0 }
 0x557   :  { %5902 = vst [vmem:[%s11608_s7 + $0x1e8] sm:$0xff] %v6482_v51  ;;  %v6484_v57 = vadd.f32 %v5838_v46, %v11343_v13 }
 0x558   :  { %5903 = vst [vmem:[%s11608_s7 + $0x1f0] sm:$0xff] %v6483_v55 }
 0x559   :  { %5904 = vst [vmem:[%s11608_s7 + $0x1f8] sm:$0xff] %v6484_v57 }

</bundles_post_ra>
